<compile_context>
chip_gen: v5e
topology: v5e:2x2
jax: 0.10.0
libtpu: 0.0.40
codegen_flags: <defaults>
</compile_context>

<pallas_src>
import math

import jax
import jax.numpy as jnp
from jax import lax
from jax.experimental import pallas as pl
from jax.experimental.pallas import tpu as pltpu

NUM_GROUPS = 32
EPS = 1e-5


def _attn_block_kernel(x_ref, gamma_ref, beta_ref, wqkv_ref, bqkv_ref,
                       wo_ref, bo_ref, o_ref):
    # x_ref block: (C, HW) channel-major, lane dim = HW (lane dense).
    x_cm = x_ref[...].astype(jnp.float32)                 # (C, HW)
    c, hw = x_cm.shape
    cpg = c // NUM_GROUPS

    # token-major view for GroupNorm stats + attention (single XLU transpose)
    x_t = x_cm.T                                          # (HW, C) f32

    # ---- GroupNorm (two-pass, all stats in f32) -------------------------
    # group-indicator matrices built in-kernel (no shipped inputs, no DMAs)
    ch_i = lax.broadcasted_iota(jnp.int32, (c, NUM_GROUPS), 0)
    g_i = lax.broadcasted_iota(jnp.int32, (c, NUM_GROUPS), 1)
    grp_cg = jnp.logical_and(ch_i >= g_i * cpg,
                             ch_i < (g_i + 1) * cpg).astype(jnp.float32)  # (C, G)
    g_j = lax.broadcasted_iota(jnp.int32, (NUM_GROUPS, c), 0)
    ch_j = lax.broadcasted_iota(jnp.int32, (NUM_GROUPS, c), 1)
    grp_gc = jnp.logical_and(ch_j >= g_j * cpg,
                             ch_j < (g_j + 1) * cpg).astype(jnp.float32)  # (G, C)

    count = jnp.float32(hw * cpg)
    ch_sum = jnp.sum(x_t, axis=0, keepdims=True)                           # (1, C)
    mean_g = jnp.dot(ch_sum, grp_cg,
                     preferred_element_type=jnp.float32) / count           # (1, G)
    mean_c = jnp.dot(mean_g, grp_gc,
                     preferred_element_type=jnp.float32)                   # (1, C)
    d = x_t - mean_c                                                       # (HW, C)
    ch_cs = jnp.sum(d * d, axis=0, keepdims=True)                          # (1, C)
    var_g = jnp.dot(ch_cs, grp_cg,
                    preferred_element_type=jnp.float32) / count            # (1, G)
    var_c = jnp.dot(var_g, grp_gc,
                    preferred_element_type=jnp.float32)                    # (1, C)
    inv = lax.rsqrt(var_c + EPS)
    xn = d * (inv * gamma_ref[...]) + beta_ref[...]                        # (HW, C) f32

    # ---- single-head self-attention (bf16 MXU operands, f32 accumulate) -
    bf = jnp.bfloat16
    qkv = jnp.dot(xn.astype(bf), wqkv_ref[...],
                  preferred_element_type=jnp.float32) + bqkv_ref[...]      # (HW, 3C)
    scale = jnp.float32(1.0 / math.sqrt(c))   # d_head == C (1 head)
    q = (qkv[:, :c] * scale).astype(bf)       # fold softmax scale into q
    k = qkv[:, c:2 * c].astype(bf)
    v = qkv[:, 2 * c:].astype(bf)

    # scores: contract feature dims (q @ k^T), f32 result
    s = lax.dot_general(q, k, (((1,), (1,)), ((), ())),
                        preferred_element_type=jnp.float32)                # (HW, HW)
    m = jnp.max(s, axis=-1, keepdims=True)
    p = jnp.exp(s - m)                                                     # unnormalized, f32
    denom = jnp.sum(p, axis=-1, keepdims=True)                             # (HW, 1)
    attn = jnp.dot(p.astype(bf), v, preferred_element_type=jnp.float32)    # (HW, C)
    # normalize after the matmul: O(HW*C) mults + EUP reciprocal instead of
    # an O(HW^2) divide on the score tile.
    attn = attn * pl.reciprocal(denom, approx=True)

    y = jnp.dot(attn.astype(bf), wo_ref[...],
                preferred_element_type=jnp.float32) + bo_ref[...]          # (HW, C)

    # ---- residual add + lane-dense store in channel-major ---------------
    o_ref[...] = (x_cm + y.T).astype(o_ref.dtype)


def vae_attention_block(x_nchw, params):
    """x_nchw: (N, C, H, W) float32. Returns (N, C, H, W)."""
    n, c, h, w = x_nchw.shape
    assert c % NUM_GROUPS == 0, "GroupNorm(32, C) requires C % 32 == 0"
    hw = h * w
    # NCHW -> (N, C, HW) is a pure reshape: no HBM transpose round-trip.
    x_cm = x_nchw.reshape(n, c, hw)

    gamma = params["gamma"].reshape(1, c).astype(jnp.float32)
    beta = params["beta"].reshape(1, c).astype(jnp.float32)
    # fused QKV projection: one (C, 3C) bf16 weight instead of three (C, C)
    w_qkv = jnp.concatenate([params["wq"], params["wk"], params["wv"]],
                            axis=1).astype(jnp.bfloat16)                  # (C, 3C)
    b_qkv = jnp.concatenate([params["bq"], params["bk"], params["bv"]],
                            axis=1).reshape(1, 3 * c).astype(jnp.float32)  # (1, 3C)
    wo = params["wo"].astype(jnp.bfloat16)                                # (C, C)
    bo = params["bo"].reshape(1, c).astype(jnp.float32)

    # generous scoped-VMEM budget (the f32 score tile dominates at large HW);
    # default scoped limits (16/32 MiB) are too small long before physical VMEM.
    est = 4 * (4 * c * hw + hw * hw + 6 * hw * c) + 2 * (4 * c * c) + (1 << 12)
    vmem_limit = int(min(max(2 * est, 16 * 1024 * 1024), 64 * 1024 * 1024))

    const2d = lambda a: pl.BlockSpec(a.shape, lambda i: (0, 0))

    out = pl.pallas_call(
        _attn_block_kernel,
        out_shape=jax.ShapeDtypeStruct((n, c, hw), x_cm.dtype),
        grid_spec=pltpu.PrefetchScalarGridSpec(
            num_scalar_prefetch=0,
            grid=(n,),
            in_specs=[
                pl.BlockSpec((None, c, hw), lambda i: (i, 0, 0)),   # x (leading dim squeezed)
                const2d(gamma), const2d(beta),
                const2d(w_qkv), const2d(b_qkv),
                const2d(wo), const2d(bo),
            ],
            out_specs=pl.BlockSpec((None, c, hw), lambda i: (i, 0, 0)),
        ),
        compiler_params=pltpu.CompilerParams(
            dimension_semantics=("parallel",),
            vmem_limit_bytes=vmem_limit,
        ),
    )(x_cm, gamma, beta, w_qkv, b_qkv, wo, bo)

    return out.reshape(n, c, h, w)


def reference(x_nchw, params):
    """Pure-JAX f32 reference mirroring the PyTorch forward."""
    n, c, h, w = x_nchw.shape
    gamma, beta = params["gamma"], params["beta"]
    xg = x_nchw.reshape(n, NUM_GROUPS, c // NUM_GROUPS, h, w)
    mean = xg.mean(axis=(2, 3, 4), keepdims=True)
    var = xg.var(axis=(2, 3, 4), keepdims=True)
    xn = (xg - mean) / jnp.sqrt(var + EPS)
    xn = xn.reshape(n, c, h, w) * gamma.reshape(1, c, 1, 1) + beta.reshape(1, c, 1, 1)
    t = jnp.transpose(xn.reshape(n, c, h * w), (0, 2, 1))          # (N, HW, C)
    q = t @ params["wq"] + params["bq"]
    k = t @ params["wk"] + params["bk"]
    v = t @ params["wv"] + params["bv"]
    s = jnp.einsum("nqc,nkc->nqk", q, k) / math.sqrt(c)
    p = jax.nn.softmax(s, axis=-1)
    o = jnp.einsum("nqk,nkc->nqc", p, v)
    o = o @ params["wo"] + params["bo"]
    o = jnp.transpose(o, (0, 2, 1)).reshape(n, c, h, w)
    return x_nchw + o


def make_params(key, c):
    ks = jax.random.split(key, 10)
    scale = 0.05
    gamma = (1.0 + 0.1 * jax.random.normal(ks[0], (1, c))).astype(jnp.float32)
    beta = (0.1 * jax.random.normal(ks[1], (1, c))).astype(jnp.float32)
    # in_proj: Linear(c, 3c) stored pre-transposed so y = x @ W
    wq = scale * jax.random.normal(ks[2], (c, c), jnp.float32)
    wk = scale * jax.random.normal(ks[3], (c, c), jnp.float32)
    wv = scale * jax.random.normal(ks[4], (c, c), jnp.float32)
    bq = scale * jax.random.normal(ks[5], (1, c), jnp.float32)
    bk = scale * jax.random.normal(ks[6], (1, c), jnp.float32)
    bv = scale * jax.random.normal(ks[7], (1, c), jnp.float32)
    # out_proj: Linear(c, c)
    wo = scale * jax.random.normal(ks[8], (c, c), jnp.float32)
    bo = scale * jax.random.normal(ks[9], (1, c), jnp.float32)
    return dict(gamma=gamma, beta=beta, wq=wq, wk=wk, wv=wv,
                bq=bq, bk=bk, bv=bv, wo=wo, bo=bo)


if __name__ == "__main__":
    key = jax.random.PRNGKey(0)
    kx, kp = jax.random.split(key)
    # C must be divisible by 32 (GroupNorm groups); HW = 256 keeps stores lane-dense.
    N, C, H, W = 2, 64, 16, 16
    x = jax.random.normal(kx, (N, C, H, W), jnp.float32)
    params = make_params(kp, C)

    out = jax.block_until_ready(vae_attention_block(x, params))
    ref = jax.block_until_ready(reference(x, params))

    assert out.shape == x.shape and out.dtype == x.dtype
    max_err = float(jnp.max(jnp.abs(out - ref)))
    # tolerance relaxed vs. a pure-f32 version: matmuls use bf16 operands
    # (f32 accumulation) and the softmax denom uses the approx EUP reciprocal.
    assert jnp.allclose(out, ref, atol=2e-2, rtol=2e-2), max_err
    print("KERNEL_OK")
</pallas_src>

<mosaic_0001>
module attributes {stable_mosaic.version = 11 : i64} {
  func.func @_attn_block_kernel(%arg0: i32, %arg1: memref<1x64x256xf32, #tpu.memory_space<vmem>>, %arg2: memref<1x64xf32, #tpu.memory_space<vmem>>, %arg3: memref<1x64xf32, #tpu.memory_space<vmem>>, %arg4: memref<64x192xbf16, #tpu.memory_space<vmem>>, %arg5: memref<1x192xf32, #tpu.memory_space<vmem>>, %arg6: memref<64x64xbf16, #tpu.memory_space<vmem>>, %arg7: memref<1x64xf32, #tpu.memory_space<vmem>>, %arg8: memref<1x64x256xf32, #tpu.memory_space<vmem>>) attributes {dimension_semantics = [#tpu.dimension_semantics<parallel>], iteration_bounds = array<i64: 2>, scalar_prefetch = 0 : i64, scratch_operands = 0 : i64, tpu.core_type = #tpu.core_type<tc>, window_params = [{transform_indices = @transform_0, window_bounds = array<i64: 1, 64, 256>}, {pipeline_mode = #tpu.pipeline_mode<synchronous>, transform_indices = @transform_1, window_bounds = array<i64: 1, 64>}, {pipeline_mode = #tpu.pipeline_mode<synchronous>, transform_indices = @transform_2, window_bounds = array<i64: 1, 64>}, {pipeline_mode = #tpu.pipeline_mode<synchronous>, transform_indices = @transform_3, window_bounds = array<i64: 64, 192>}, {pipeline_mode = #tpu.pipeline_mode<synchronous>, transform_indices = @transform_4, window_bounds = array<i64: 1, 192>}, {pipeline_mode = #tpu.pipeline_mode<synchronous>, transform_indices = @transform_5, window_bounds = array<i64: 64, 64>}, {pipeline_mode = #tpu.pipeline_mode<synchronous>, transform_indices = @transform_6, window_bounds = array<i64: 1, 64>}, {transform_indices = @transform_7, window_bounds = array<i64: 1, 64, 256>}]} {
    %c0 = arith.constant 0 : index
    %c0_0 = arith.constant 0 : index
    %c0_1 = arith.constant 0 : index
    %0 = vector.load %arg1[%c0, %c0_0, %c0_1] : memref<1x64x256xf32, #tpu.memory_space<vmem>>, vector<1x64x256xf32>
    %1 = vector.shape_cast %0 : vector<1x64x256xf32> to vector<64x256xf32>
    %2 = tpu.transpose %1, [1, 0] : vector<64x256xf32> -> vector<256x64xf32>
    %3 = tpu.iota {dimensions = array<i32: 0>} : vector<64x32xi32>
    %4 = tpu.iota {dimensions = array<i32: 1>} : vector<64x32xi32>
    %c2_i32 = arith.constant 2 : i32
    %5 = vector.broadcast %c2_i32 : i32 to vector<64x32xi32>
    %6 = arith.muli %4, %5 : vector<64x32xi32>
    %7 = arith.cmpi sge, %3, %6 : vector<64x32xi32>
    %c1_i32 = arith.constant 1 : i32
    %8 = vector.broadcast %c1_i32 : i32 to vector<64x32xi32>
    %9 = arith.addi %4, %8 : vector<64x32xi32>
    %c2_i32_2 = arith.constant 2 : i32
    %10 = vector.broadcast %c2_i32_2 : i32 to vector<64x32xi32>
    %11 = arith.muli %9, %10 : vector<64x32xi32>
    %12 = arith.cmpi slt, %3, %11 : vector<64x32xi32>
    %13 = arith.andi %7, %12 : vector<64x32xi1>
    %14 = arith.extui %13 : vector<64x32xi1> to vector<64x32xi32>
    %15 = arith.sitofp %14 : vector<64x32xi32> to vector<64x32xf32>
    %16 = tpu.iota {dimensions = array<i32: 0>} : vector<32x64xi32>
    %17 = tpu.iota {dimensions = array<i32: 1>} : vector<32x64xi32>
    %c2_i32_3 = arith.constant 2 : i32
    %18 = vector.broadcast %c2_i32_3 : i32 to vector<32x64xi32>
    %19 = arith.muli %16, %18 : vector<32x64xi32>
    %20 = arith.cmpi sge, %17, %19 : vector<32x64xi32>
    %c1_i32_4 = arith.constant 1 : i32
    %21 = vector.broadcast %c1_i32_4 : i32 to vector<32x64xi32>
    %22 = arith.addi %16, %21 : vector<32x64xi32>
    %c2_i32_5 = arith.constant 2 : i32
    %23 = vector.broadcast %c2_i32_5 : i32 to vector<32x64xi32>
    %24 = arith.muli %22, %23 : vector<32x64xi32>
    %25 = arith.cmpi slt, %17, %24 : vector<32x64xi32>
    %26 = arith.andi %20, %25 : vector<32x64xi1>
    %27 = arith.extui %26 : vector<32x64xi1> to vector<32x64xi32>
    %28 = arith.sitofp %27 : vector<32x64xi32> to vector<32x64xf32>
    %cst = arith.constant dense<0.000000e+00> : vector<64xf32>
    %29 = vector.multi_reduction <add>, %2, %cst [0] : vector<256x64xf32> to vector<64xf32>
    %30 = vector.shape_cast %29 : vector<64xf32> to vector<1x64xf32>
    %cst_6 = arith.constant dense<0.000000e+00> : vector<1x32xf32>
    %31 = tpu.matmul %30, %15, %cst_6 {dimension_numbers = #tpu.dot_dimension_numbers<[1], [0], [0], [1], [0, 0, 1, 1], [], []>} : vector<1x64xf32>, vector<64x32xf32>, vector<1x32xf32> -> vector<1x32xf32>
    %cst_7 = arith.constant 5.120000e+02 : f32
    %32 = vector.broadcast %cst_7 : f32 to vector<1x32xf32>
    %33 = arith.divf %31, %32 : vector<1x32xf32>
    %cst_8 = arith.constant dense<0.000000e+00> : vector<1x64xf32>
    %34 = tpu.matmul %33, %28, %cst_8 {dimension_numbers = #tpu.dot_dimension_numbers<[1], [0], [0], [1], [0, 0, 1, 1], [], []>} : vector<1x32xf32>, vector<32x64xf32>, vector<1x64xf32> -> vector<1x64xf32>
    %35 = vector.broadcast %34 : vector<1x64xf32> to vector<256x64xf32>
    %36 = arith.subf %2, %35 : vector<256x64xf32>
    %37 = arith.mulf %36, %36 : vector<256x64xf32>
    %cst_9 = arith.constant dense<0.000000e+00> : vector<64xf32>
    %38 = vector.multi_reduction <add>, %37, %cst_9 [0] : vector<256x64xf32> to vector<64xf32>
    %39 = vector.shape_cast %38 : vector<64xf32> to vector<1x64xf32>
    %cst_10 = arith.constant dense<0.000000e+00> : vector<1x32xf32>
    %40 = tpu.matmul %39, %15, %cst_10 {dimension_numbers = #tpu.dot_dimension_numbers<[1], [0], [0], [1], [0, 0, 1, 1], [], []>} : vector<1x64xf32>, vector<64x32xf32>, vector<1x32xf32> -> vector<1x32xf32>
    %cst_11 = arith.constant 5.120000e+02 : f32
    %41 = vector.broadcast %cst_11 : f32 to vector<1x32xf32>
    %42 = arith.divf %40, %41 : vector<1x32xf32>
    %cst_12 = arith.constant dense<0.000000e+00> : vector<1x64xf32>
    %43 = tpu.matmul %42, %28, %cst_12 {dimension_numbers = #tpu.dot_dimension_numbers<[1], [0], [0], [1], [0, 0, 1, 1], [], []>} : vector<1x32xf32>, vector<32x64xf32>, vector<1x64xf32> -> vector<1x64xf32>
    %cst_13 = arith.constant 9.99999974E-6 : f32
    %44 = vector.broadcast %cst_13 : f32 to vector<1x64xf32>
    %45 = arith.addf %43, %44 : vector<1x64xf32>
    %46 = math.rsqrt %45 : vector<1x64xf32>
    %c0_14 = arith.constant 0 : index
    %c0_15 = arith.constant 0 : index
    %47 = vector.load %arg2[%c0_14, %c0_15] : memref<1x64xf32, #tpu.memory_space<vmem>>, vector<1x64xf32>
    %48 = arith.mulf %46, %47 : vector<1x64xf32>
    %49 = vector.broadcast %48 : vector<1x64xf32> to vector<256x64xf32>
    %50 = arith.mulf %36, %49 : vector<256x64xf32>
    %c0_16 = arith.constant 0 : index
    %c0_17 = arith.constant 0 : index
    %51 = vector.load %arg3[%c0_16, %c0_17] : memref<1x64xf32, #tpu.memory_space<vmem>>, vector<1x64xf32>
    %52 = vector.broadcast %51 : vector<1x64xf32> to vector<256x64xf32>
    %53 = arith.addf %50, %52 : vector<256x64xf32>
    %54 = arith.truncf %53 : vector<256x64xf32> to vector<256x64xbf16>
    %c0_18 = arith.constant 0 : index
    %c0_19 = arith.constant 0 : index
    %55 = vector.load %arg4[%c0_18, %c0_19] : memref<64x192xbf16, #tpu.memory_space<vmem>>, vector<64x192xbf16>
    %cst_20 = arith.constant dense<0.000000e+00> : vector<256x192xf32>
    %56 = tpu.matmul %54, %55, %cst_20 {dimension_numbers = #tpu.dot_dimension_numbers<[1], [0], [0], [1], [0, 0, 1, 1], [], []>} : vector<256x64xbf16>, vector<64x192xbf16>, vector<256x192xf32> -> vector<256x192xf32>
    %c0_21 = arith.constant 0 : index
    %c0_22 = arith.constant 0 : index
    %57 = vector.load %arg5[%c0_21, %c0_22] : memref<1x192xf32, #tpu.memory_space<vmem>>, vector<1x192xf32>
    %58 = vector.broadcast %57 : vector<1x192xf32> to vector<256x192xf32>
    %59 = arith.addf %56, %58 : vector<256x192xf32>
    %60 = vector.extract_strided_slice %59 {offsets = [0, 0], sizes = [256, 64], strides = [1, 1]} : vector<256x192xf32> to vector<256x64xf32>
    %cst_23 = arith.constant 1.250000e-01 : f32
    %61 = vector.broadcast %cst_23 : f32 to vector<256x64xf32>
    %62 = arith.mulf %60, %61 : vector<256x64xf32>
    %63 = arith.truncf %62 : vector<256x64xf32> to vector<256x64xbf16>
    %64 = vector.extract_strided_slice %59 {offsets = [0, 64], sizes = [256, 64], strides = [1, 1]} : vector<256x192xf32> to vector<256x64xf32>
    %65 = arith.truncf %64 : vector<256x64xf32> to vector<256x64xbf16>
    %66 = vector.extract_strided_slice %59 {offsets = [0, 128], sizes = [256, 64], strides = [1, 1]} : vector<256x192xf32> to vector<256x64xf32>
    %67 = arith.truncf %66 : vector<256x64xf32> to vector<256x64xbf16>
    %cst_24 = arith.constant dense<0.000000e+00> : vector<256x256xf32>
    %68 = tpu.matmul %63, %65, %cst_24 {dimension_numbers = #tpu.dot_dimension_numbers<[1], [1], [0], [0], [0, 0, 1, 0], [], []>} : vector<256x64xbf16>, vector<256x64xbf16>, vector<256x256xf32> -> vector<256x256xf32>
    %cst_25 = arith.constant dense<0xFF800000> : vector<256xf32>
    %69 = vector.multi_reduction <maximumf>, %68, %cst_25 [1] : vector<256x256xf32> to vector<256xf32>
    %70 = vector.shape_cast %69 : vector<256xf32> to vector<256x1xf32>
    %71 = vector.broadcast %70 : vector<256x1xf32> to vector<256x256xf32>
    %72 = arith.subf %68, %71 : vector<256x256xf32>
    %73 = math.exp %72 : vector<256x256xf32>
    %cst_26 = arith.constant dense<0.000000e+00> : vector<256xf32>
    %74 = vector.multi_reduction <add>, %73, %cst_26 [1] : vector<256x256xf32> to vector<256xf32>
    %75 = vector.shape_cast %74 : vector<256xf32> to vector<256x1xf32>
    %76 = arith.truncf %73 : vector<256x256xf32> to vector<256x256xbf16>
    %cst_27 = arith.constant dense<0.000000e+00> : vector<256x64xf32>
    %77 = tpu.matmul %76, %67, %cst_27 {dimension_numbers = #tpu.dot_dimension_numbers<[1], [0], [0], [1], [0, 0, 1, 1], [], []>} : vector<256x256xbf16>, vector<256x64xbf16>, vector<256x64xf32> -> vector<256x64xf32>
    %78 = tpu.reciprocal %75 {approx = true} : vector<256x1xf32> -> vector<256x1xf32>
    %79 = vector.broadcast %78 : vector<256x1xf32> to vector<256x64xf32>
    %80 = arith.mulf %77, %79 : vector<256x64xf32>
    %81 = arith.truncf %80 : vector<256x64xf32> to vector<256x64xbf16>
    %c0_28 = arith.constant 0 : index
    %c0_29 = arith.constant 0 : index
    %82 = vector.load %arg6[%c0_28, %c0_29] : memref<64x64xbf16, #tpu.memory_space<vmem>>, vector<64x64xbf16>
    %cst_30 = arith.constant dense<0.000000e+00> : vector<256x64xf32>
    %83 = tpu.matmul %81, %82, %cst_30 {dimension_numbers = #tpu.dot_dimension_numbers<[1], [0], [0], [1], [0, 0, 1, 1], [], []>} : vector<256x64xbf16>, vector<64x64xbf16>, vector<256x64xf32> -> vector<256x64xf32>
    %c0_31 = arith.constant 0 : index
    %c0_32 = arith.constant 0 : index
    %84 = vector.load %arg7[%c0_31, %c0_32] : memref<1x64xf32, #tpu.memory_space<vmem>>, vector<1x64xf32>
    %85 = vector.broadcast %84 : vector<1x64xf32> to vector<256x64xf32>
    %86 = arith.addf %83, %85 : vector<256x64xf32>
    %87 = tpu.transpose %86, [1, 0] : vector<256x64xf32> -> vector<64x256xf32>
    %88 = arith.addf %1, %87 : vector<64x256xf32>
    %c0_33 = arith.constant 0 : index
    %c0_34 = arith.constant 0 : index
    %c0_35 = arith.constant 0 : index
    %89 = vector.load %arg8[%c0_33, %c0_34, %c0_35] : memref<1x64x256xf32, #tpu.memory_space<vmem>>, vector<1x64x256xf32>
    %90 = vector.shape_cast %89 : vector<1x64x256xf32> to vector<64x256xf32>
    %91 = vector.shape_cast %88 : vector<64x256xf32> to vector<1x64x256xf32>
    tpu.vector_store %arg8[%c0_33, %c0_34, %c0_35], %91 {strides = array<i32>} : memref<1x64x256xf32, #tpu.memory_space<vmem>>, vector<1x64x256xf32>,
    return
  }
  func.func @transform_0(%arg0: i32) -> (i32, i32, i32) {
    %c0_i32 = arith.constant 0 : i32
    %c0_i32_0 = arith.constant 0 : i32
    %c0_i32_1 = arith.constant 0 : i32
    return %arg0, %c0_i32, %c0_i32_0 : i32, i32, i32
  }
  func.func @transform_1(%arg0: i32) -> (i32, i32) {
    %c0_i32 = arith.constant 0 : i32
    %c0_i32_0 = arith.constant 0 : i32
    %c0_i32_1 = arith.constant 0 : i32
    return %c0_i32, %c0_i32_0 : i32, i32
  }
  func.func @transform_2(%arg0: i32) -> (i32, i32) {
    %c0_i32 = arith.constant 0 : i32
    %c0_i32_0 = arith.constant 0 : i32
    %c0_i32_1 = arith.constant 0 : i32
    return %c0_i32, %c0_i32_0 : i32, i32
  }
  func.func @transform_3(%arg0: i32) -> (i32, i32) {
    %c0_i32 = arith.constant 0 : i32
    %c0_i32_0 = arith.constant 0 : i32
    %c0_i32_1 = arith.constant 0 : i32
    return %c0_i32, %c0_i32_0 : i32, i32
  }
  func.func @transform_4(%arg0: i32) -> (i32, i32) {
    %c0_i32 = arith.constant 0 : i32
    %c0_i32_0 = arith.constant 0 : i32
    %c0_i32_1 = arith.constant 0 : i32
    return %c0_i32, %c0_i32_0 : i32, i32
  }
  func.func @transform_5(%arg0: i32) -> (i32, i32) {
    %c0_i32 = arith.constant 0 : i32
    %c0_i32_0 = arith.constant 0 : i32
    %c0_i32_1 = arith.constant 0 : i32
    return %c0_i32, %c0_i32_0 : i32, i32
  }
  func.func @transform_6(%arg0: i32) -> (i32, i32) {
    %c0_i32 = arith.constant 0 : i32
    %c0_i32_0 = arith.constant 0 : i32
    %c0_i32_1 = arith.constant 0 : i32
    return %c0_i32, %c0_i32_0 : i32, i32
  }
  func.func @transform_7(%arg0: i32) -> (i32, i32, i32) {
    %c0_i32 = arith.constant 0 : i32
    %c0_i32_0 = arith.constant 0 : i32
    %c0_i32_1 = arith.constant 0 : i32
    return %arg0, %c0_i32, %c0_i32_0 : i32, i32, i32
  }
}

</mosaic_0001>

<bundles_post_ra>
// kernel: tpu_custom_call.1
= control target key start
LH: loop header
LB: loop body
LE: loop exit
PB: predicated region body
PF: predicated region fallthrough
CT: control target
= control target key end

     0   :  { %s5140_s0 = inlined_call_operand.hbm [shape: f32[2,64,256], index: 0, kind: input, shape index: {}]   ;;  %s5141_s1 = inlined_call_operand.hbm [shape: f32[1,64], index: 1, kind: input, shape index: {}]   ;;  %s5142_s2 = inlined_call_operand.vmem [shape: f32[1,64], index: 2, kind: input, shape index: {}]   ;;  %s5143_s3 = inlined_call_operand.hbm [shape: bf16[64,192], index: 3, kind: input, shape index: {}]   ;;  %s5144_s4 = inlined_call_operand.vmem [shape: f32[1,192], index: 4, kind: input, shape index: {}]   ;;  %s5145_s5 = inlined_call_operand.hbm [shape: bf16[64,64], index: 5, kind: input, shape index: {}]   ;;  %s5146_s6 = inlined_call_operand.vmem [shape: f32[1,64], index: 6, kind: input, shape index: {}]   ;;  %s5147_s7 = inlined_call_operand.hbm [shape: f32[2,64,256], index: 7, kind: output, shape index: {}]  }
   0x1   :  { %5161 = sst [smem:[#allocation28_spill]] %s5141_s1 }
   0x2   :  { %12 = vsyncpa [#allocation3], 0 }
   0x3   :  { %14 = vsyncpa [#allocation3 + $0x1], 0 }
   0x4   :  { %15 = vsyncpa [#allocation6], 0 }
   0x5   :  { %16 = vsyncpa [#allocation9], 0 }
   0x6   :  { %17 = vsyncpa [#allocation4], 0 }
   0x7   :  { %19 = vsyncpa [#allocation4 + $0x1], 0  ;;  %s3439_s24 = smov 0   ;;  %s3441_s25 = smov 0  }
   0x8   :  { %s3443_s26 = smov 0   ;;  %s3445_s27 = smov 0  }
   0x9 LB: > { %s3460_s28 = sadd.s32 4294967295, %s3383_s27   ;;  %s2660_s29 = sadd.s32 4294967294, %s3383_s27   ;;  %s3383_s27 = sphi %s3445_s27, %s5221_s27   ;;  %s3379_s26 = sphi %s3443_s26, %s5220_s26   ;;  %s3375_s25 = sphi %s3441_s25, %s5219_s25   ;;  %s3371_s24 = sphi %s3439_s24, %s5218_s24  }
   0xa   : > { %p45_p0 = scmp.ne.s32.totalorder %s3375_s25, %s3371_s24  ;;  %p46_p1 = scmp.eq.s32.totalorder %s3460_s28, 0 }
   0xb   : > { %p195_p2 = scmp.eq.s32.totalorder %s3460_s28, 1  ;;  %p201_p3 = scmp.eq.s32.totalorder %s2660_s29, 1 }
   0xc   : > { %p3469_p4 = por %p46_p1, %p45_p0  ;;  %p2661_p5 = scmp.ge.s32.totalorder %s3383_s27, 1 }
   0xd   : > { %p3474_p6 = por %p201_p3, %p45_p0  ;;  %p208_p7 = scmp.lt.s32.totalorder %s3383_s27, 3 }
   0xe   : > { %s5164_s1 = sld [smem:[#allocation28_spill]]  ;;  %s3385_s13 = smov [#allocation5]  }
   0xf   : > { %p3482_p8 = pnand %p2661_p5, %p208_p7  ;;  %s222_s14 = sshll.u32 %s3385_s13, 4  ;;  %s223_s14 = int_to_ptr.vmem [resolvable:$true] %s222_s14 }
  0x10   : > { %s234_s17 = sshll.u32 %s5143_s3, 4  ;;  %s3386_s19 = smov [#allocation7]   ;;  %s235_s17 = int_to_ptr.hbm [resolvable:$true] %s234_s17 }
  0x11   : > { %p2902_p10 = pneg %p3482_p8  ;;  %s236_s20 = sshll.u32 %s3386_s19, 4  ;;  %s237_s20 = int_to_ptr.vmem [resolvable:$true] %s236_s20 }
  0x12   : > { %s3387_s21 = smov 128   ;;  %s3388_s22 = smov 8  }
  0x13   : > { %p3494_p11 = pnand %p2902_p10, %p46_p1  ;;  %s251_s9 = sshll.u32 %s5145_s5, 4  ;;  %s252_s9 = int_to_ptr.hbm [resolvable:$true] %s251_s9 }
  0x14   : > { %s220_s11 = sshll.u32 %s5164_s1, 4  ;;  %s3389_s10 = smov [#allocation8]   ;;  %s221_s11 = int_to_ptr.hbm [resolvable:$true] %s220_s11 }
  0x15   : > { %2905 = dma.hbm_to_vmem [thread:$0]  (!%p3494_p11), %s221_s11, 16, %s223_s14, [#allocation6]  }
  0x16   : > { %2908 = dma.hbm_to_vmem [thread:$0]  (!%p3494_p11), %s235_s17, 1024, %s237_s20, [#allocation6], %s3387_s21, %s3387_s21, %s3388_s22  }
  0x17   : > { %s253_s13 = sshll.u32 %s3389_s10, 4  ;;  %s3390_s11 = smov 64   ;;  %s254_s13 = int_to_ptr.vmem [resolvable:$true] %s253_s13 }
  0x18   : > { %s3391_s14 = smov 4   ;;  %s3508_s15 = sadd.s32 1, %s3383_s27  }
  0x19   : > { %2911 = dma.hbm_to_vmem [thread:$0]  (!%p3494_p11), %s252_s9, 512, %s254_s13, [#allocation9], %s3390_s11, %s3390_s11, %s3391_s14  }
  0x1a   : > { %s29_s16 = ssub.s32 %s3383_s27, %s3508_s15  ;;  %s32_s17 = sadd.s32 1, %s3379_s26 }
  0x1b   : > { %p30_p12 = scmp.eq.s32.totalorder %s29_s16, 0  ;;  %p39_p13 = scmp.ne.s32.totalorder %s3379_s26, %s3375_s25 }
  0x1c   : > { %p40_p0 = scmp.eq.s32.totalorder %s3383_s27, 0  ;;  %p2923_p3 = scmp.lt.s32.totalorder %s3383_s27, 2 }
  0x1d   : > { %s3518_s19 = scalar_select %p30_p12, %s3379_s26, %s32_s17  }
  0x1e   : > { %p41_p5 = por %p40_p0, %p39_p13  ;;  %p3522_p7 = por %p195_p2, %p39_p13 }
  0x1f   : > { %s270_s18 = sand.u32 1, %s3379_s26   ;;  %s2848_s21 = sshll.u32 %s3383_s27, 7 }
  0x20   : > { %s2666_s22 = sshll.u32 %s270_s18, 7  ;;  %s279_s9 = scalar_lea.hbm %s5140_s0, %s2848_s21 }
  0x21   : > { %s280_s10 = sshll.u32 %s279_s9, 4  ;;  %s274_s13 = scalar_lea.vmem [#allocation2], %s2666_s22  ;;  %s281_s10 = int_to_ptr.hbm [resolvable:$true] %s280_s10 }
  0x22   : > { %s282_s11 = sshll.u32 %s274_s13, 4  ;;  %p3533_p10 = pnand %p2923_p3, %p41_p5  ;;  %s283_s11 = int_to_ptr.vmem [resolvable:$true] %s282_s11 }
  0x23   : > { %s271_s16 = scalar_lea.sflag [#allocation3], %s270_s18  ;;  %s3279_s17 = sshra.s32 %s281_s10, 4  ;;  %s3280_s17 = int_to_ptr.hbm [resolvable:$true] %s3279_s17 }
  0x24   : > { %s3281_s1 = scalar_lea.hbm %s3280_s17, 128  ;;  %p3283_p11 = pneg %p3533_p10 }
  0x25   : > { %p3282_p2 = scmp.ne.s32.totalorder %s3280_s17, %s3281_s1  ;;  %s3286_s23 = scalar_lea.hbm %s5140_s0, 256 }
  0x26   : > { %p3287_p0 = scmp.lt.s32.totalorder %s3280_s17, %s5140_s0  ;;  %p3288_p3 = scmp.lt.s32.totalorder %s3286_s23, %s3281_s1 }
  0x27   : > { %p3284_p12 = pnand %p3283_p11, %p3282_p2 }
  0x28   : > { %p3289_p5 = por %p3288_p3, %p3287_p0 }
  0x29   : > { %p3285_p13 = pneg %p3284_p12 }
  0x2b   : > { %p3290_p9 = pnand %p3289_p5, %p3285_p13 }
  0x2d   : > { %3293 = shalt.err (!%p3290_p9)
}
  0x2e   : > { %s3392_s18 = smov 256   ;;  %s3393_s13 = smov 16  }
  0x2f   : > { %2915 = dma.hbm_to_vmem [thread:$0]  (!%p3533_p10), %s281_s10, 2048, %s283_s11, %s271_s16, %s3392_s18, %s3392_s18, %s3393_s13  }
  0x30   : > { %294 = sbr.rel (%p3482_p8) target bundleno = 2743 (0xab7), region = 48 }
  0x35   : > { %s3550_s21 = sand.u32 1, %s3375_s25  }
  0x36   : > { %s2670_s17 = sshll.u32 %s3550_s21, 7  ;;  %s297_s1 = scalar_lea.sflag [#allocation3], %s3550_s21 }
  0x37   : > { %s3556_s22 = scalar_lea.vmem [#allocation2], %s2670_s17 }
  0x38   : > { %3354 = dma.done.wait (%p3469_p4), %s297_s1, 2048  }
  0x39   : > { %3356 = vsyncadd (%p3469_p4), %s297_s1, 4294965248 }
  0x3a   : > { %3358 = dma.done.wait (%p46_p1), [#allocation6], 1040  }
  0x3b   : > { %3360 = vsyncadd (%p46_p1), [#allocation6], 4294966256 }
  0x3c   : > { %3362 = dma.done.wait (%p46_p1), [#allocation9], 512  }
  0x3d   : > { %3364 = vsyncadd (%p46_p1), [#allocation9], 4294966784  ;;  %v348_v0 = vld [vmem:[%s3556_s22] sm:$0xff]  ;;  %v349_v1 = vld [vmem:[%s3556_s22 + $0x8] sm:$0xff]  ;;  %vm514_vm0 = vcmask 523264   ;;  %v428_v63 = vlaneseq  ;;  %s3396_s14 = smov 64  }
  0x3e   : > { %364 = vxpose.xlu0.b32.start [1/8] (short) %v348_v0, 128  ;;  %396 = vxpose.xlu1.b32.start [1/8] (short) %v349_v1, 128  ;;  %v350_v2 = vld [vmem:[%s3556_s22 + $0x10] sm:$0xff]  ;;  %v351_v3 = vld [vmem:[%s3556_s22 + $0x18] sm:$0xff]  ;;  %v352_v4 = vld [vmem:[%s3556_s22 + $0x20] sm:$0xff]  ;;  %s5069_s29 = scalar_lea.vmem [#allocation10], %s2670_s17  ;;  %s2861_s9 = sshll.u32 %s3460_s28, 7 }
  0x3f   : > { %v353_v5 = vld [vmem:[%s3556_s22 + $0x28] sm:$0xff]  ;;  %v354_v6 = vld [vmem:[%s3556_s22 + $0x30] sm:$0xff]  ;;  %v355_v7 = vld [vmem:[%s3556_s22 + $0x38] sm:$0xff]  ;;  %s2554_s17 = scalar_lea.hbm %s5147_s7, %s2861_s9  ;;  %s2555_s1 = sshll.u32 %s5069_s29, 4  ;;  %s2556_s1 = int_to_ptr.vmem [resolvable:$true] %s2555_s1 }
  0x40   : > { %v356_v8 = vld [vmem:[%s3556_s22 + $0x40] sm:$0xff]  ;;  %v357_v9 = vld [vmem:[%s3556_s22 + $0x48] sm:$0xff]  ;;  %v358_v10 = vld [vmem:[%s3556_s22 + $0x50] sm:$0xff]  ;;  %s2557_s30 = sshll.u32 %s2554_s17, 4  ;;  %s2543_s12 = scalar_lea.sflag [#allocation4], %s3550_s21  ;;  %s2558_s30 = int_to_ptr.hbm [resolvable:$true] %s2557_s30 }
  0x41   : > { %v359_v11 = vld [vmem:[%s3556_s22 + $0x58] sm:$0xff]  ;;  %v360_v12 = vld [vmem:[%s3556_s22 + $0x60] sm:$0xff]  ;;  %v361_v13 = vld [vmem:[%s3556_s22 + $0x68] sm:$0xff]  ;;  %s3323_s10 = sshra.s32 %s2558_s30, 4  ;;  %s3329_s16 = scalar_lea.hbm %s5147_s7, 256  ;;  %s3324_s10 = int_to_ptr.hbm [resolvable:$true] %s3323_s10 }
  0x42   : > { %v362_v14 = vld [vmem:[%s3556_s22 + $0x70] sm:$0xff]  ;;  %v363_v15 = vld [vmem:[%s3556_s22 + $0x78] sm:$0xff]  ;;  %s3325_s28 = scalar_lea.hbm %s3324_s10, 128  ;;  %p3330_p9 = scmp.lt.s32.totalorder %s3324_s10, %s5147_s7 }
  0x43   : > { %p3326_p1 = scmp.ne.s32.totalorder %s3324_s10, %s3325_s28  ;;  %p3331_p10 = scmp.lt.s32.totalorder %s3329_s16, %s3325_s28 }
  0x45   : > { %p3327_p4 = pnand %p3326_p1, %p3522_p7  ;;  %p3332_p2 = por %p3331_p10, %p3330_p9 }
  0x46   : > { %365 = vxpose.xlu0.b32.cont [2/8] (short) %v350_v2, 128  ;;  %397 = vxpose.xlu1.b32.cont [2/8] (short) %v351_v3, 128  ;;  %v3666_v3 = vand.u32 127, %v428_v63 }
  0x47   : > { %p3328_p8 = pneg %p3327_p4 }
  0x49   : > { %p3333_p11 = pnand %p3332_p2, %p3328_p8 }
  0x4e   : > { %366 = vxpose.xlu0.b32.cont [3/8] (short) %v352_v4, 128  ;;  %398 = vxpose.xlu1.b32.cont [3/8] (short) %v353_v5, 128 }
  0x56   : > { %367 = vxpose.xlu0.b32.cont [4/8] (short) %v354_v6, 128  ;;  %399 = vxpose.xlu1.b32.cont [4/8] (short) %v355_v7, 128  ;;  %v3670_v6 = vshrl.u32 %v428_v63, 7  ;;  %v448_v7 = vadd.s32 1, %v3666_v3 }
  0x5e   : > { %368 = vxpose.xlu0.b32.cont [5/8] (short) %v356_v8, 128  ;;  %400 = vxpose.xlu1.b32.cont [5/8] (short) %v357_v9, 128 }
  0x66   : > { %369 = vxpose.xlu0.b32.cont [6/8] (short) %v358_v10, 128  ;;  %401 = vxpose.xlu1.b32.cont [6/8] (short) %v359_v11, 128  ;;  %v436_v10 = vadd.s32 56, %v3670_v6  ;;  %v439_v11 = vmul.u32 2, %v3666_v3 }
  0x68   : > { %vm447_vm1 = vcmp.ge.s32.totalorder %v436_v10, %v439_v11 }
  0x6e   : > { %370 = vxpose.xlu0.b32.cont [7/8] (short) %v360_v12, 128  ;;  %402 = vxpose.xlu1.b32.cont [7/8] (short) %v361_v13, 128  ;;  %v449_v12 = vmul.u32 2, %v448_v7 }
  0x70   : > { %vm457_vm2 = vcmp.lt.s32.totalorder %v436_v10, %v449_v12 }
  0x71   : > { %vm3682_vm3 = vmand %vm447_vm1, %vm457_vm2 }
  0x76   : > { %371 = vxpose.xlu0.b32.end [8/8] (short) %v362_v14, 128  ;;  %403 = vxpose.xlu1.b32.end [8/8] (short) %v363_v15, 128  ;;  %v435_v15 = vadd.s32 48, %v3670_v6 }
  0x78   : > { %vm446_vm4 = vcmp.ge.s32.totalorder %v435_v15, %v439_v11  ;;  %vm456_vm5 = vcmp.lt.s32.totalorder %v435_v15, %v449_v12 }
  0x79   : > { %vm3692_vm6 = vmand %vm446_vm4, %vm456_vm5  ;;  %vm440_vm4 = vcmp.ge.s32.totalorder %v3670_v6, %v439_v11  ;;  %vm450_vm5 = vcmp.lt.s32.totalorder %v3670_v6, %v449_v12 }
  0xe2   : > { %v3586_v16 = vpop.trf.xlu0  ;;  %v3588_v17 = vpop.trf.xlu1 }
  0xe3   : > { %v515_v39 = vsel %vm514_vm0, %v3586_v16, 0.0 }
  0xea   : > { %v3590_v18 = vpop.trf.xlu0  ;;  %v3592_v19 = vpop.trf.xlu1 }
  0xeb   : > { %v516_v38 = vsel %vm514_vm0, %v3590_v18, 0.0 }
  0xec   : > { %v517_v41 = vadd.f32 %v516_v38, %v515_v39 }
  0xf2   : > { %v3594_v20 = vpop.trf.xlu0  ;;  %v3596_v21 = vpop.trf.xlu1 }
  0xf3   : > { %v518_v40 = vsel %vm514_vm0, %v3594_v20, 0.0 }
  0xf4   : > { %v519_v43 = vadd.f32 %v518_v40, %v517_v41 }
  0xfa   : > { %v3598_v22 = vpop.trf.xlu0  ;;  %v3600_v23 = vpop.trf.xlu1 }
  0xfb   : > { %v520_v42 = vsel %vm514_vm0, %v3598_v22, 0.0 }
  0xfc   : > { %v521_v46 = vadd.f32 %v520_v42, %v519_v43  ;;  %v3394_v42 = vmov 1.0   ;;  %v434_v43 = vadd.s32 40, %v3670_v6 }
  0xfd   : > { %2687 = vmatpush.msk.msra.mxu2 %vm3682_vm3, %v3394_v42 }
  0xfe   : > { %vm445_vm7 = vcmp.ge.s32.totalorder %v434_v43, %v439_v11  ;;  %vm455_vm8 = vcmp.lt.s32.totalorder %v434_v43, %v449_v12 }
  0xff   : > { %2688 = vmatpush.msk.msra.mxu2 %vm3692_vm6, %v3394_v42  ;;  %vm3702_vm9 = vmand %vm445_vm7, %vm455_vm8 }
 0x101   : > { %2689 = vmatpush.msk.msra.mxu2 %vm3702_vm9, %v3394_v42 }
 0x102   : > { %v3602_v24 = vpop.trf.xlu0  ;;  %v3604_v25 = vpop.trf.xlu1 }
 0x103   : > { %v522_v45 = vsel %vm514_vm0, %v3602_v24, 0.0 }
 0x104   : > { %v523_v49 = vadd.f32 %v522_v45, %v521_v46 }
 0x10a   : > { %v3606_v26 = vpop.trf.xlu0  ;;  %v3610_v28 = vpop.trf.xlu1 }
 0x10b   : > { %v524_v48 = vsel %vm514_vm0, %v3606_v26, 0.0  ;;  %v556_v10 = vsel %vm514_vm0, %v3610_v28, 0.0 }
 0x10c   : > { %v525_v51 = vadd.f32 %v524_v48, %v523_v49  ;;  %v546_v48 = vsel %vm514_vm0, %v3588_v17, 0.0  ;;  %v433_v49 = vadd.s32 32, %v3670_v6 }
 0x10e   : > { %vm444_vm10 = vcmp.ge.s32.totalorder %v433_v49, %v439_v11  ;;  %vm454_vm11 = vcmp.lt.s32.totalorder %v433_v49, %v449_v12 }
 0x10f   : > { %vm3712_vm12 = vmand %vm444_vm10, %vm454_vm11 }
 0x110   : > { %2690 = vmatpush.msk.msra.mxu2 %vm3712_vm12, %v3394_v42 }
 0x112   : > { %v3608_v27 = vpop.trf.xlu0  ;;  %v3614_v30 = vpop.trf.xlu1 }
 0x113   : > { %v526_v50 = vsel %vm514_vm0, %v3608_v27, 0.0 }
 0x114   : > { %v527_v53 = vadd.f32 %v526_v50, %v525_v51 }
 0x11a   : > { %v3612_v29 = vpop.trf.xlu0  ;;  %v3618_v32 = vpop.trf.xlu1 }
 0x11b   : > { %v528_v52 = vsel %vm514_vm0, %v3612_v29, 0.0  ;;  %v560_v43 = vsel %vm514_vm0, %v3618_v32, 0.0 }
 0x11c   : > { %v529_v56 = vadd.f32 %v528_v52, %v527_v53  ;;  %v548_v52 = vsel %vm514_vm0, %v3592_v19, 0.0  ;;  %v432_v53 = vadd.s32 24, %v3670_v6 }
 0x11e   : > { %vm443_vm13 = vcmp.ge.s32.totalorder %v432_v53, %v439_v11  ;;  %vm453_vm14 = vcmp.lt.s32.totalorder %v432_v53, %v449_v12  ;;  %v485_v15 = vmul.u32 2, %v432_v53 }
 0x11f   : > { %vm3726_vm15 = vmand %vm443_vm13, %vm453_vm14 }
 0x120   : > { %2691 = vmatpush.msk.msra.mxu2 %vm3726_vm15, %v3394_v42  ;;  %vm3753_vm13 = vmand %vm440_vm4, %vm450_vm5  ;;  %vm3775_vm14 = vcmp.ge.s32.totalorder %v3666_v3, %v485_v15 }
 0x122   : > { %v3616_v31 = vpop.trf.xlu0  ;;  %v3622_v34 = vpop.trf.xlu1 }
 0x123   : > { %v530_v55 = vsel %vm514_vm0, %v3616_v31, 0.0  ;;  %v562_v40 = vsel %vm514_vm0, %v3622_v34, 0.0 }
 0x124   : > { %v531_v58 = vadd.f32 %v530_v55, %v529_v56 }
 0x12a   : > { %v3620_v33 = vpop.trf.xlu0  ;;  %v3628_v37 = vpop.trf.xlu1 }
 0x12b   : > { %v532_v57 = vsel %vm514_vm0, %v3620_v33, 0.0  ;;  %v564_v46 = vsel %vm514_vm0, %v3628_v37, 0.0 }
 0x12c   : > { %v533_v61 = vadd.f32 %v532_v57, %v531_v58  ;;  %v550_v57 = vsel %vm514_vm0, %v3596_v21, 0.0  ;;  %v431_v58 = vadd.s32 16, %v3670_v6 }
 0x12e   : > { %vm442_vm1 = vcmp.ge.s32.totalorder %v431_v58, %v439_v11  ;;  %vm452_vm2 = vcmp.lt.s32.totalorder %v431_v58, %v449_v12 }
 0x12f   : > { %vm3738_vm7 = vmand %vm442_vm1, %vm452_vm2 }
 0x130   : > { %2692 = vmatpush.msk.msra.mxu2 %vm3738_vm7, %v3394_v42 }
 0x132   : > { %v3624_v35 = vpop.trf.xlu0  ;;  %v3642_v47 = vpop.trf.xlu1 }
 0x133   : > { %v534_v60 = vsel %vm514_vm0, %v3624_v35, 0.0  ;;  %v566_v51 = vsel %vm514_vm0, %v3642_v47, 0.0 }
 0x134   : > { %v535_v0 = vadd.f32 %v534_v60, %v533_v61  ;;  %v552_v60 = vsel %vm514_vm0, %v3600_v23, 0.0 }
 0x13a   : > { %v3626_v36 = vpop.trf.xlu0  ;;  %v3656_v59 = vpop.trf.xlu1 }
 0x13b   : > { %v536_v62 = vsel %vm514_vm0, %v3626_v36, 0.0 }
 0x13c   : > { %v537_v4 = vadd.f32 %v536_v62, %v535_v0  ;;  %v3731_v0 = vadd.s32 8, %v3670_v6 }
 0x13e   : > { %vm441_vm8 = vcmp.ge.s32.totalorder %v3731_v0, %v439_v11  ;;  %vm451_vm10 = vcmp.lt.s32.totalorder %v3731_v0, %v449_v12  ;;  %v558_v12 = vsel %vm514_vm0, %v3614_v30, 0.0 }
 0x13f   : > { %vm3749_vm11 = vmand %vm441_vm8, %vm451_vm10 }
 0x140   : > { %2693 = vmatpush.msk.msra.mxu2 %vm3749_vm11, %v3394_v42 }
 0x142   : > { %v3638_v44 = vpop.trf.xlu0  ;;  %v3677_v14 = vpop.trf.xlu1  ;;  %2694 = vmatpush.msk.msra.mxu2 %vm3753_vm13, %v3394_v42 }
 0x143   : > { %v538_v2 = vsel %vm514_vm0, %v3638_v44, 0.0  ;;  %v570_v56 = vsel %vm514_vm0, %v3677_v14, 0.0 }
 0x144   : > { %v539_v8 = vadd.f32 %v538_v2, %v537_v4  ;;  %2701 = vmatpush.msk.msrb.mxu2 %vm3682_vm3, %v3394_v42 }
 0x146   : > { %2702 = vmatpush.msk.msrb.mxu2 %vm3692_vm6, %v3394_v42 }
 0x148   : > { %2703 = vmatpush.msk.msrb.mxu2 %vm3702_vm9, %v3394_v42 }
 0x14a   : > { %v3650_v54 = vpop.trf.xlu0  ;;  %v3724_v62 = vpop.trf.xlu1  ;;  %2704 = vmatpush.msk.msrb.mxu2 %vm3712_vm12, %v3394_v42 }
 0x14b   : > { %v540_v5 = vsel %vm514_vm0, %v3650_v54, 0.0  ;;  %v572_v63 = vsel %vm514_vm0, %v3724_v62, 0.0 }
 0x14c   : > { %v541_v13 = vadd.f32 %v540_v5, %v539_v8  ;;  %v554_v5 = vsel %vm514_vm0, %v3604_v25, 0.0  ;;  %2705 = vmatpush.msk.msrb.mxu2 %vm3726_vm15, %v3394_v42 }
 0x14e   : > { %2706 = vmatpush.msk.msrb.mxu2 %vm3738_vm7, %v3394_v42 }
 0x150   : > { %2707 = vmatpush.msk.msrb.mxu2 %vm3749_vm11, %v3394_v42  ;;  %vm615_vm11 = vcmask 261120  }
 0x152   : > { %v3662_v1 = vpop.trf.xlu0  ;;  %v3772_v49 = vpop.trf.xlu1  ;;  %2708 = vmatpush.msk.msrb.mxu2 %vm3753_vm13, %v3394_v42 }
 0x153   : > { %v542_v9 = vsel %vm514_vm0, %v3662_v1, 0.0  ;;  %v574_v4 = vsel %vm514_vm0, %v3772_v49, 0.0 }
 0x154   : > { %v543_v38 = vadd.f32 %v542_v9, %v541_v13  ;;  %v483_v9 = vmul.u32 2, %v3731_v0 }
 0x156   : > { %vm487_vm9 = vcmp.ge.s32.totalorder %v3666_v3, %v483_v9 }
 0x15a   : > { %v3680_v39 = vpop.trf.xlu0 }
 0x15b   : > { %v544_v41 = vsel %vm514_vm0, %v3680_v39, 0.0 }
 0x15c   : > { %v545_v45 = vadd.f32 %v544_v41, %v543_v38  ;;  %v493_v38 = vadd.s32 1, %v432_v53  ;;  %v484_v41 = vmul.u32 2, %v431_v58 }
 0x15e   : > { %v547_v50 = vadd.f32 %v546_v48, %v545_v45  ;;  %v492_v45 = vadd.s32 1, %v431_v58  ;;  %vm3785_vm3 = vcmp.ge.s32.totalorder %v3666_v3, %v484_v41 }
 0x160   : > { %v549_v55 = vadd.f32 %v548_v52, %v547_v50  ;;  %v497_v52 = vmul.u32 2, %v493_v38 }
 0x162   : > { %v551_v61 = vadd.f32 %v550_v57, %v549_v55  ;;  %v496_v55 = vmul.u32 2, %v492_v45  ;;  %vm501_vm1 = vcmp.lt.s32.totalorder %v3666_v3, %v497_v52  ;;  %v490_v52 = vadd.s32 1, %v3670_v6 }
 0x163   : > { %vm505_vm6 = vmand %vm3775_vm14, %vm501_vm1 }
 0x164   : > { %v553_v2 = vadd.f32 %v552_v60, %v551_v61  ;;  %vm500_vm2 = vcmp.lt.s32.totalorder %v3666_v3, %v496_v55  ;;  %2696 = vmatpush.msk.msra.mxu1 %vm505_vm6, %v3394_v42  ;;  %2710 = vmatpush.msk.msra.mxu3 %vm505_vm6, %v3394_v42  ;;  %v568_v61 = vsel %vm514_vm0, %v3656_v59, 0.0  ;;  %v494_v53 = vmul.u32 2, %v490_v52 }
 0x165   : > { %vm504_vm4 = vmand %vm3785_vm3, %vm500_vm2 }
 0x166   : > { %v555_v8 = vadd.f32 %v554_v5, %v553_v2  ;;  %2697 = vmatpush.msk.msra.mxu1 %vm504_vm4, %v3394_v42  ;;  %2711 = vmatpush.msk.msra.mxu3 %vm504_vm4, %v3394_v42  ;;  %vm498_vm7 = vcmp.lt.s32.totalorder %v3666_v3, %v494_v53 }
 0x168   : > { %v557_v11 = vadd.f32 %v556_v10, %v555_v8  ;;  %v3819_v8 = vpop.trf.xlu1 }
 0x16a   : > { %v559_v13 = vadd.f32 %v558_v12, %v557_v11  ;;  %v576_v11 = vsel %vm514_vm0, %v3819_v8, 0.0 }
 0x16c   : > { %v561_v48 = vadd.f32 %v560_v43, %v559_v13 }
 0x16e   : > { %v563_v57 = vadd.f32 %v562_v40, %v561_v48  ;;  %v491_v48 = vadd.s32 1, %v3731_v0  ;;  %v482_v40 = vmul.u32 2, %v3670_v6  ;;  %v3395_v0 = vmov 512.0  }
 0x16f   : > { %2977 = vrcp.f32 %v3395_v0 }
 0x170   : > { %v565_v58 = vadd.f32 %v564_v46, %v563_v57  ;;  %v495_v50 = vmul.u32 2, %v491_v48  ;;  %vm486_vm5 = vcmp.ge.s32.totalorder %v3666_v3, %v482_v40 }
 0x171   : > { %vm502_vm8 = vmand %vm486_vm5, %vm498_vm7 }
 0x172   : > { %v567_v60 = vadd.f32 %v566_v51, %v565_v58  ;;  %vm499_vm12 = vcmp.lt.s32.totalorder %v3666_v3, %v495_v50 }
 0x173   : > { %vm503_vm15 = vmand %vm487_vm9, %vm499_vm12 }
 0x174   : > { %v569_v2 = vadd.f32 %v568_v61, %v567_v60  ;;  %2698 = vmatpush.msk.msra.mxu1 %vm503_vm15, %v3394_v42  ;;  %2712 = vmatpush.msk.msra.mxu3 %vm503_vm15, %v3394_v42 }
 0x175   : > { %v2978_v55 = vpop.eup %2977 }
 0x176   : > { %v571_v5 = vadd.f32 %v570_v56, %v569_v2  ;;  %2699 = vmatpush.msk.msra.mxu1 %vm502_vm8, %v3394_v42  ;;  %2713 = vmatpush.msk.msra.mxu3 %vm502_vm8, %v3394_v42  ;;  %v608_v57 = vmul.f32 512.0, %v2978_v55  ;;  %vm612_vm10 = vweird.f32 %v2978_v55 }
 0x178   : > { %v573_v10 = vadd.f32 %v572_v63, %v571_v5  ;;  %v609_v6 = vsub.f32 1.0, %v608_v57 }
 0x17a   : > { %v575_v12 = vadd.f32 %v574_v4, %v573_v10  ;;  %v610_v46 = vmul.f32 %v2978_v55, %v609_v6 }
 0x17c   : > { %v577_v13 = vadd.f32 %v576_v11, %v575_v12  ;;  %v611_v58 = vadd.f32 %v2978_v55, %v610_v46 }
 0x17e   : > { %v578_v15 = vrot.slane %v577_v13, 4  ;;  %v3846_v51 = vsel %vm612_vm10, %v2978_v55, %v611_v58 }
 0x180   : > { %v579_v38 = vadd.f32 %v578_v15, %v577_v13 }
 0x182   : > { %v580_v7 = vrot.slane %v579_v38, 2 }
 0x184   : > { %v581_v41 = vadd.f32 %v580_v7, %v579_v38 }
 0x186   : > { %v582_v43 = vrot.slane %v581_v41, 1 }
 0x188   : > { %v583_v45 = vadd.f32 %v582_v43, %v581_v41 }
 0x18a   : > { %2695 = vmatmul.msk.f32.vlgmr.msra.gmra.mxu2 %vm514_vm0, %v583_v45 }
 0x20d   : > { %v604_v60 = vpop.f32.mrf.mxu2 }
 0x20e   : > { %v614_v61 = vmul.f32 %v3846_v51, %v604_v60 }
 0x210   : > { %2700 = vmatmul.msk.f32.vlgmr.msra.gmra.mxu1 %vm615_vm11, %v614_v61 }
 0x28d   : > { %v636_v3 = vpop.f32.mrf.mxu1 }
 0x28e   : > { %v3850_v2 = vperm.slane %v636_v3, 0 }
 0x290   : > { %v3854_v42 = vsub.f32 %v3586_v16, %v3850_v2  ;;  %v3858_v56 = vsub.f32 %v3590_v18, %v3850_v2  ;;  %v3862_v5 = vsub.f32 %v3594_v20, %v3850_v2  ;;  %v3866_v63 = vsub.f32 %v3598_v22, %v3850_v2 }
 0x291   : > { %v3874_v16 = vsub.f32 %v3602_v24, %v3850_v2  ;;  %v3880_v20 = vsub.f32 %v3606_v26, %v3850_v2  ;;  %v3888_v15 = vsub.f32 %v3608_v27, %v3850_v2  ;;  %v3895_v26 = vsub.f32 %v3612_v29, %v3850_v2 }
 0x292   : > { %v672_v10 = vmul.f32 %v3854_v42, %v3854_v42  ;;  %v673_v4 = vmul.f32 %v3858_v56, %v3858_v56  ;;  %v674_v18 = vmul.f32 %v3862_v5, %v3862_v5  ;;  %v675_v22 = vmul.f32 %v3866_v63, %v3866_v63 }
 0x293   : > { %v676_v24 = vmul.f32 %v3874_v16, %v3874_v16  ;;  %v677_v41 = vmul.f32 %v3880_v20, %v3880_v20  ;;  %v3902_v27 = vsub.f32 %v3616_v31, %v3850_v2  ;;  %v678_v48 = vmul.f32 %v3888_v15, %v3888_v15 }
 0x294   : > { %v704_v11 = vsel %vm514_vm0, %v672_v10, 0.0  ;;  %v705_v12 = vsel %vm514_vm0, %v673_v4, 0.0  ;;  %v707_v38 = vsel %vm514_vm0, %v674_v18, 0.0  ;;  %v709_v43 = vsel %vm514_vm0, %v675_v22, 0.0 }
 0x295   : > { %v706_v13 = vadd.f32 %v705_v12, %v704_v11  ;;  %v711_v9 = vsel %vm514_vm0, %v676_v24, 0.0  ;;  %v3909_v29 = vsub.f32 %v3620_v33, %v3850_v2  ;;  %v679_v52 = vmul.f32 %v3895_v26, %v3895_v26 }
 0x296   : > { %v713_v40 = vsel %vm514_vm0, %v677_v41, 0.0  ;;  %v3916_v31 = vsub.f32 %v3624_v35, %v3850_v2  ;;  %v680_v0 = vmul.f32 %v3902_v27, %v3902_v27  ;;  %v715_v55 = vsel %vm514_vm0, %v678_v48, 0.0 }
 0x297   : > { %v708_v7 = vadd.f32 %v707_v38, %v706_v13  ;;  %v3923_v33 = vsub.f32 %v3626_v36, %v3850_v2  ;;  %v681_v6 = vmul.f32 %v3909_v29, %v3909_v29  ;;  %v717_v46 = vsel %vm514_vm0, %v679_v52, 0.0 }
 0x298   : > { %v3930_v35 = vsub.f32 %v3638_v44, %v3850_v2  ;;  %v682_v60 = vmul.f32 %v3916_v31, %v3916_v31  ;;  %v719_v61 = vsel %vm514_vm0, %v680_v0, 0.0  ;;  %v3937_v36 = vsub.f32 %v3650_v54, %v3850_v2 }
 0x299   : > { %v710_v45 = vadd.f32 %v709_v43, %v708_v7  ;;  %v683_v10 = vmul.f32 %v3923_v33, %v3923_v33  ;;  %v721_v4 = vsel %vm514_vm0, %v681_v6, 0.0  ;;  %v3944_v44 = vsub.f32 %v3662_v1, %v3850_v2 }
 0x29a   : > { %v684_v22 = vmul.f32 %v3930_v35, %v3930_v35  ;;  %v723_v11 = vsel %vm514_vm0, %v682_v60, 0.0  ;;  %v3951_v54 = vsub.f32 %v3680_v39, %v3850_v2  ;;  %v685_v13 = vmul.f32 %v3937_v36, %v3937_v36 }
 0x29b   : > { %v712_v50 = vadd.f32 %v711_v9, %v710_v45  ;;  %v725_v24 = vsel %vm514_vm0, %v683_v10, 0.0  ;;  %v3958_v1 = vsub.f32 %v3588_v17, %v3850_v2  ;;  %v686_v7 = vmul.f32 %v3944_v44, %v3944_v44 }
 0x29c   : > { %v727_v41 = vsel %vm514_vm0, %v684_v22, 0.0  ;;  %v3965_v39 = vsub.f32 %v3592_v19, %v3850_v2  ;;  %v687_v45 = vmul.f32 %v3951_v54, %v3951_v54  ;;  %v729_v48 = vsel %vm514_vm0, %v685_v13, 0.0 }
 0x29d   : > { %v714_v53 = vadd.f32 %v713_v40, %v712_v50  ;;  %v3972_v17 = vsub.f32 %v3596_v21, %v3850_v2  ;;  %v688_v50 = vmul.f32 %v3958_v1, %v3958_v1  ;;  %v731_v52 = vsel %vm514_vm0, %v686_v7, 0.0 }
 0x29e   : > { %v3979_v19 = vsub.f32 %v3600_v23, %v3850_v2  ;;  %v733_v0 = vsel %vm514_vm0, %v687_v45, 0.0  ;;  %v3986_v21 = vsub.f32 %v3604_v25, %v3850_v2  ;;  %v3993_v23 = vsub.f32 %v3610_v28, %v3850_v2 }
 0x29f   : > { %v716_v57 = vadd.f32 %v715_v55, %v714_v53  ;;  %v689_v53 = vmul.f32 %v3965_v39, %v3965_v39  ;;  %v735_v6 = vsel %vm514_vm0, %v688_v50, 0.0  ;;  %v4000_v25 = vsub.f32 %v3614_v30, %v3850_v2 }
 0x2a0   : > { %v4007_v28 = vsub.f32 %v3618_v32, %v3850_v2  ;;  %v4014_v30 = vsub.f32 %v3622_v34, %v3850_v2  ;;  %v4021_v32 = vsub.f32 %v3628_v37, %v3850_v2  ;;  %v4028_v34 = vsub.f32 %v3642_v47, %v3850_v2 }
 0x2a1   : > { %v718_v58 = vadd.f32 %v717_v46, %v716_v57  ;;  %v690_v57 = vmul.f32 %v3972_v17, %v3972_v17  ;;  %v737_v60 = vsel %vm514_vm0, %v689_v53, 0.0  ;;  %v4035_v37 = vsub.f32 %v3656_v59, %v3850_v2 }
 0x2a2   : > { %v4042_v47 = vsub.f32 %v3677_v14, %v3850_v2  ;;  %v4049_v59 = vsub.f32 %v3724_v62, %v3850_v2  ;;  %v4056_v14 = vsub.f32 %v3772_v49, %v3850_v2  ;;  %v4063_v62 = vsub.f32 %v3819_v8, %v3850_v2 }
 0x2a3   : > { %v720_v3 = vadd.f32 %v719_v61, %v718_v58  ;;  %v691_v58 = vmul.f32 %v3979_v19, %v3979_v19  ;;  %v739_v10 = vsel %vm514_vm0, %v690_v57, 0.0 }
 0x2a4   : > { %v702_v49 = vmul.f32 %v4056_v14, %v4056_v14 }
 0x2a5   : > { %v722_v18 = vadd.f32 %v721_v4, %v720_v3  ;;  %v692_v3 = vmul.f32 %v3986_v21, %v3986_v21  ;;  %v741_v22 = vsel %vm514_vm0, %v691_v58, 0.0 }
 0x2a6   : > { %v763_v8 = vsel %vm514_vm0, %v702_v49, 0.0 }
 0x2a7   : > { %v724_v12 = vadd.f32 %v723_v11, %v722_v18  ;;  %v693_v18 = vmul.f32 %v3993_v23, %v3993_v23  ;;  %v743_v13 = vsel %vm514_vm0, %v692_v3, 0.0 }
 0x2a9   : > { %v726_v38 = vadd.f32 %v725_v24, %v724_v12  ;;  %v694_v12 = vmul.f32 %v4000_v25, %v4000_v25  ;;  %v745_v7 = vsel %vm514_vm0, %v693_v18, 0.0 }
 0x2ab   : > { %v728_v43 = vadd.f32 %v727_v41, %v726_v38  ;;  %v695_v38 = vmul.f32 %v4007_v28, %v4007_v28  ;;  %v747_v45 = vsel %vm514_vm0, %v694_v12, 0.0 }
 0x2ad   : > { %v730_v9 = vadd.f32 %v729_v48, %v728_v43  ;;  %v696_v43 = vmul.f32 %v4014_v30, %v4014_v30  ;;  %v749_v50 = vsel %vm514_vm0, %v695_v38, 0.0 }
 0x2af   : > { %v732_v40 = vadd.f32 %v731_v52, %v730_v9  ;;  %v697_v9 = vmul.f32 %v4021_v32, %v4021_v32  ;;  %v751_v53 = vsel %vm514_vm0, %v696_v43, 0.0 }
 0x2b1   : > { %v734_v55 = vadd.f32 %v733_v0, %v732_v40  ;;  %v698_v40 = vmul.f32 %v4028_v34, %v4028_v34  ;;  %v753_v57 = vsel %vm514_vm0, %v697_v9, 0.0 }
 0x2b3   : > { %v736_v46 = vadd.f32 %v735_v6, %v734_v55  ;;  %v699_v55 = vmul.f32 %v4035_v37, %v4035_v37  ;;  %v755_v58 = vsel %vm514_vm0, %v698_v40, 0.0  ;;  %v2856_v40 = vld [vmem:[#allocation7 + $0x34] sm:$0xf0] }
 0x2b5   : > { %v738_v61 = vadd.f32 %v737_v60, %v736_v46  ;;  %v700_v46 = vmul.f32 %v4042_v47, %v4042_v47  ;;  %v757_v3 = vsel %vm514_vm0, %v699_v55, 0.0  ;;  %v2743_v55 = vld [vmem:[#allocation7 + $0x38] sm:$0xf0] }
 0x2b7   : > { %v740_v4 = vadd.f32 %v739_v10, %v738_v61  ;;  %v701_v61 = vmul.f32 %v4049_v59, %v4049_v59 }
 0x2b9   : > { %v742_v11 = vadd.f32 %v741_v22, %v740_v4  ;;  %v759_v4 = vsel %vm514_vm0, %v700_v46, 0.0  ;;  %v703_v22 = vmul.f32 %v4063_v62, %v4063_v62  ;;  %v2854_v46 = vld [vmem:[#allocation7 + $0x24] sm:$0xf0] }
 0x2bb   : > { %v744_v24 = vadd.f32 %v743_v13, %v742_v11  ;;  %v761_v11 = vsel %vm514_vm0, %v701_v61, 0.0  ;;  %v765_v13 = vsel %vm514_vm0, %v703_v22, 0.0  ;;  %v2735_v61 = vld [vmem:[#allocation7 + $0x28] sm:$0xf0] }
 0x2bd   : > { %v746_v41 = vadd.f32 %v745_v7, %v744_v24 }
 0x2bf   : > { %v748_v48 = vadd.f32 %v747_v45, %v746_v41 }
 0x2c1   : > { %v750_v52 = vadd.f32 %v749_v50, %v748_v48 }
 0x2c3   : > { %v752_v0 = vadd.f32 %v751_v53, %v750_v52  ;;  %v2741_v52 = vld [vmem:[#allocation7 + $0x30] sm:$0xf]  ;;  %v2855_v53 = vld [vmem:[#allocation7 + $0x34] sm:$0xf] }
 0x2c5   : > { %v754_v6 = vadd.f32 %v753_v57, %v752_v0  ;;  %v2742_v0 = vor.u32 %v2856_v40, %v2741_v52  ;;  %v2746_v57 = vor.u32 %v2855_v53, %v2743_v55  ;;  %v830_v52 = vld [vmem:[#allocation5] sm:$0x1] }
 0x2c7   : > { %v756_v60 = vadd.f32 %v755_v58, %v754_v6  ;;  %1023 = vmatpush.bf16.msrb.mxu1 %v2742_v0  ;;  %1112 = vmatpush.bf16.msrb.mxu3 %v2746_v57  ;;  %v2733_v6 = vld [vmem:[#allocation7 + $0x20] sm:$0xf]  ;;  %v2853_v58 = vld [vmem:[#allocation7 + $0x24] sm:$0xf] }
 0x2c9   : > { %v758_v10 = vadd.f32 %v757_v3, %v756_v60  ;;  %v2734_v60 = vor.u32 %v2854_v46, %v2733_v6 }
 0x2cb   : > { %v760_v18 = vadd.f32 %v759_v4, %v758_v10  ;;  %v2738_v10 = vor.u32 %v2853_v58, %v2735_v61  ;;  %1024 = vmatpush.bf16.msrb.mxu1 %v2734_v60  ;;  %v2852_v4 = vld [vmem:[#allocation7 + $0x14] sm:$0xf0] }
 0x2cd   : > { %v762_v12 = vadd.f32 %v761_v11, %v760_v18  ;;  %1113 = vmatpush.bf16.msrb.mxu3 %v2738_v10  ;;  %v2851_v18 = vld [vmem:[#allocation7 + $0x14] sm:$0xf]  ;;  %v2727_v11 = vld [vmem:[#allocation7 + $0x18] sm:$0xf0] }
 0x2cf   : > { %v764_v2 = vadd.f32 %v763_v8, %v762_v12  ;;  %v2730_v12 = vor.u32 %v2851_v18, %v2727_v11  ;;  %v2717_v8 = vld [vmem:[#allocation7] sm:$0xf] }
 0x2d1   : > { %v766_v24 = vadd.f32 %v765_v13, %v764_v2  ;;  %1114 = vmatpush.bf16.msrb.mxu3 %v2730_v12  ;;  %v2850_v2 = vld [vmem:[#allocation7 + $0x4] sm:$0xf0]  ;;  %v2849_v13 = vld [vmem:[#allocation7 + $0x4] sm:$0xf] }
 0x2d3   : > { %v767_v38 = vrot.slane %v766_v24, 4 }
 0x2d5   : > { %v768_v7 = vadd.f32 %v767_v38, %v766_v24  ;;  %v2718_v24 = vor.u32 %v2850_v2, %v2717_v8  ;;  %v2719_v38 = vld [vmem:[#allocation7 + $0x8] sm:$0xf0] }
 0x2d7   : > { %v769_v41 = vrot.slane %v768_v7, 2 }
 0x2d9   : > { %v770_v43 = vadd.f32 %v769_v41, %v768_v7  ;;  %v2722_v7 = vor.u32 %v2849_v13, %v2719_v38 }
 0x2db   : > { %v771_v45 = vrot.slane %v770_v43, 1  ;;  %1115 = vmatpush.bf16.msrb.mxu3 %v2722_v7 }
 0x2dd   : > { %v772_v48 = vadd.f32 %v771_v45, %v770_v43 }
 0x2df   : > { %2709 = vmatmul.msk.f32.vlgmr.msrb.gmra.mxu2 %vm514_vm0, %v772_v48 }
 0x362   : > { %v793_v9 = vpop.f32.mrf.mxu2 }
 0x363   : > { %v796_v50 = vmul.f32 %v793_v9, %v3846_v51  ;;  %v2725_v51 = vld [vmem:[#allocation7 + $0x10] sm:$0xf] }
 0x364   : > { %v2726_v22 = vor.u32 %v2852_v4, %v2725_v51 }
 0x365   : > { %2714 = vmatmul.msk.f32.vlgmr.msra.gmra.mxu3 %vm615_vm11, %v796_v50 }
 0x366   : > { %1025 = vmatpush.bf16.msrb.mxu1 %v2726_v22 }
 0x36a   : > { %1026 = vmatpush.bf16.msrb.mxu1 %v2718_v24 }
 0x3e8   : > { %v817_v3 = vpop.f32.mrf.mxu3 }
 0x3e9   : > { %v818_v49 = vadd.f32 1e-05, %v817_v3 }
 0x3eb   : > { %2979 = vrsqrt.f32 %v818_v49  ;;  %vm826_vm14 = vweird.f32 %v818_v49 }
 0x3f1   : > { %v2980_v41 = vpop.eup %2979 }
 0x3f2   : > { %v821_v43 = vmul.f32 %v2980_v41, %v818_v49  ;;  %vm827_vm13 = vweird.f32 %v2980_v41 }
 0x3f3   : > { %vm828_vm3 = vmor %vm826_vm14, %vm827_vm13 }
 0x3f4   : > { %v822_v45 = vmul.f32 %v2980_v41, %v821_v43 }
 0x3f6   : > { %v823_v48 = vmul.f32 0.5, %v822_v45 }
 0x3f8   : > { %v824_v9 = vsub.f32 1.5, %v823_v48 }
 0x3fa   : > { %v825_v50 = vmul.f32 %v2980_v41, %v824_v9 }
 0x3fc   : > { %v829_v40 = vsel %vm828_vm3, %v2980_v41, %v825_v50 }
 0x3fd   : > { %v831_v53 = vmul.f32 %v830_v52, %v829_v40 }
 0x3ff   : > { %v4079_v0 = vperm.slane %v831_v53, 0 }
 0x401   : > { %v833_v55 = vmul.f32 %v4079_v0, %v3854_v42  ;;  %v834_v57 = vmul.f32 %v4079_v0, %v3858_v56  ;;  %v841_v6 = vmul.f32 %v4079_v0, %v3902_v27  ;;  %v842_v46 = vmul.f32 %v4079_v0, %v3909_v29  ;;  %v4100_v56 = vld [vmem:[%s5142_s2] ss:$0 sm:$0xff] }
 0x402   : > { %v843_v58 = vmul.f32 %v4079_v0, %v3916_v31  ;;  %v844_v60 = vmul.f32 %v4079_v0, %v3923_v33  ;;  %v845_v61 = vmul.f32 %v4079_v0, %v3930_v35  ;;  %v846_v42 = vmul.f32 %v4079_v0, %v3937_v36 }
 0x403   : > { %v847_v27 = vmul.f32 %v4079_v0, %v3944_v44  ;;  %v848_v29 = vmul.f32 %v4079_v0, %v3951_v54  ;;  %v849_v31 = vmul.f32 %v4079_v0, %v3958_v1  ;;  %v850_v33 = vmul.f32 %v4079_v0, %v3965_v39 }
 0x404   : > { %v851_v35 = vmul.f32 %v4079_v0, %v3972_v17  ;;  %v852_v36 = vmul.f32 %v4079_v0, %v3979_v19  ;;  %v853_v3 = vmul.f32 %v4079_v0, %v3986_v21  ;;  %v854_v44 = vmul.f32 %v4079_v0, %v3993_v23 }
 0x405   : > { %v855_v54 = vmul.f32 %v4079_v0, %v4000_v25  ;;  %v856_v1 = vmul.f32 %v4079_v0, %v4007_v28  ;;  %v857_v39 = vmul.f32 %v4079_v0, %v4014_v30  ;;  %v858_v17 = vmul.f32 %v4079_v0, %v4021_v32 }
 0x406   : > { %v859_v19 = vmul.f32 %v4079_v0, %v4028_v34  ;;  %v860_v21 = vmul.f32 %v4079_v0, %v4035_v37  ;;  %v861_v23 = vmul.f32 %v4079_v0, %v4042_v47  ;;  %v862_v25 = vmul.f32 %v4079_v0, %v4049_v59 }
 0x407   : > { %v863_v28 = vmul.f32 %v4079_v0, %v4056_v14  ;;  %v864_v30 = vmul.f32 %v4079_v0, %v4063_v62  ;;  %v869_v32 = vadd.f32 %v4100_v56, %v833_v55  ;;  %v870_v10 = vadd.f32 %v4100_v56, %v834_v57 }
 0x408   : > { %v877_v34 = vadd.f32 %v4100_v56, %v841_v6  ;;  %v878_v37 = vadd.f32 %v4100_v56, %v842_v46  ;;  %v879_v49 = vadd.f32 %v4100_v56, %v843_v58  ;;  %v880_v47 = vadd.f32 %v4100_v56, %v844_v60 }
 0x409   : > { %v881_v59 = vadd.f32 %v4100_v56, %v845_v61  ;;  %v882_v51 = vadd.f32 %v4100_v56, %v846_v42  ;;  %v883_v14 = vadd.f32 %v4100_v56, %v847_v27  ;;  %v884_v62 = vadd.f32 %v4100_v56, %v848_v29 }
 0x40a   : > { %v885_v4 = vadd.f32 %v4100_v56, %v849_v31  ;;  %v886_v18 = vadd.f32 %v4100_v56, %v850_v33  ;;  %v887_v22 = vadd.f32 %v4100_v56, %v851_v35  ;;  %v888_v11 = vadd.f32 %v4100_v56, %v852_v36 }
 0x40b   : > { %v889_v12 = vadd.f32 %v4100_v56, %v853_v3  ;;  %v890_v8 = vadd.f32 %v4100_v56, %v854_v44  ;;  %v891_v2 = vadd.f32 %v4100_v56, %v855_v54  ;;  %v892_v13 = vadd.f32 %v4100_v56, %v856_v1 }
 0x40c   : > { %v893_v24 = vadd.f32 %v4100_v56, %v857_v39  ;;  %v894_v38 = vadd.f32 %v4100_v56, %v858_v17  ;;  %v895_v7 = vadd.f32 %v4100_v56, %v859_v19  ;;  %v896_v41 = vadd.f32 %v4100_v56, %v860_v21 }
 0x40d   : > { %v897_v43 = vadd.f32 %v4100_v56, %v861_v23  ;;  %v898_v45 = vadd.f32 %v4100_v56, %v862_v25  ;;  %v899_v48 = vadd.f32 %v4100_v56, %v863_v28  ;;  %v900_v9 = vadd.f32 %v4100_v56, %v864_v30 }
 0x40e   : > { %v901_v50 = vpack.c.bf16 %v870_v10, %v869_v32  ;;  %v905_v52 = vpack.c.bf16 %v878_v37, %v877_v34  ;;  %v906_v40 = vpack.c.bf16 %v880_v47, %v879_v49  ;;  %v907_v53 = vpack.c.bf16 %v882_v51, %v881_v59 }
 0x40f   : > { %v908_v55 = vpack.c.bf16 %v884_v62, %v883_v14  ;;  %v909_v57 = vpack.c.bf16 %v886_v18, %v885_v4  ;;  %v910_v6 = vpack.c.bf16 %v888_v11, %v887_v22  ;;  %v4166_v46 = vpack.c.bf16 %v890_v8, %v889_v12 }
 0x410   : > { %2747 = vmatmul.msk.bf16.vlgmr.msrb.gmra.mxu1 %vm514_vm0, %v901_v50  ;;  %2763 = vmatmul.msk.bf16.vlgmr.msrb.gmra.mxu3 %vm514_vm0, %v901_v50  ;;  %v4168_v58 = vpack.c.bf16 %v892_v13, %v891_v2  ;;  %v4170_v60 = vpack.c.bf16 %v894_v38, %v893_v24  ;;  %v4172_v61 = vpack.c.bf16 %v896_v41, %v895_v7 }
 0x411   : > { %v4174_v42 = vpack.c.bf16 %v898_v45, %v897_v43  ;;  %v4176_v27 = vpack.c.bf16 %v900_v9, %v899_v48  ;;  %v835_v29 = vmul.f32 %v4079_v0, %v3862_v5  ;;  %v836_v31 = vmul.f32 %v4079_v0, %v3866_v63 }
 0x412   : > { %v837_v3 = vmul.f32 %v4079_v0, %v3874_v16  ;;  %v838_v44 = vmul.f32 %v4079_v0, %v3880_v20  ;;  %v839_v1 = vmul.f32 %v4079_v0, %v3888_v15  ;;  %v840_v39 = vmul.f32 %v4079_v0, %v3895_v26  ;;  %v925_v15 = vld [vmem:[%s5144_s4] sm:$0x3] }
 0x413   : > { %v871_v33 = vadd.f32 %v4100_v56, %v835_v29  ;;  %v872_v35 = vadd.f32 %v4100_v56, %v836_v31  ;;  %v4213_v0 = vperm.slane %v925_v15, 0  ;;  %v4224_v28 = vperm.slane %v925_v15, 1 }
 0x414   : > { %v873_v5 = vadd.f32 %v4100_v56, %v837_v3  ;;  %v874_v54 = vadd.f32 %v4100_v56, %v838_v44  ;;  %v875_v16 = vadd.f32 %v4100_v56, %v839_v1  ;;  %v876_v17 = vadd.f32 %v4100_v56, %v840_v39 }
 0x415   : > { %v902_v36 = vpack.c.bf16 %v872_v35, %v871_v33 }
 0x416   : > { %v903_v63 = vpack.c.bf16 %v874_v54, %v873_v5  ;;  %v904_v20 = vpack.c.bf16 %v876_v17, %v875_v16 }
 0x420   : > { %2748 = vmatmul.msk.bf16.gmra.mxu1 %vm514_vm0, %v902_v36  ;;  %2764 = vmatmul.msk.bf16.gmra.mxu3 %vm514_vm0, %v902_v36 }
 0x430   : > { %2749 = vmatmul.msk.bf16.gmra.mxu1 %vm514_vm0, %v903_v63  ;;  %2765 = vmatmul.msk.bf16.gmra.mxu3 %vm514_vm0, %v903_v63 }
 0x440   : > { %2750 = vmatmul.msk.bf16.gmra.mxu1 %vm514_vm0, %v904_v20  ;;  %2766 = vmatmul.msk.bf16.gmra.mxu3 %vm514_vm0, %v904_v20 }
 0x450   : > { %2751 = vmatmul.msk.bf16.gmra.mxu1 %vm514_vm0, %v905_v52  ;;  %2767 = vmatmul.msk.bf16.gmra.mxu3 %vm514_vm0, %v905_v52 }
 0x460   : > { %2752 = vmatmul.msk.bf16.gmra.mxu1 %vm514_vm0, %v906_v40  ;;  %2768 = vmatmul.msk.bf16.gmra.mxu3 %vm514_vm0, %v906_v40 }
 0x470   : > { %2753 = vmatmul.msk.bf16.gmra.mxu1 %vm514_vm0, %v907_v53  ;;  %2769 = vmatmul.msk.bf16.gmra.mxu3 %vm514_vm0, %v907_v53 }
 0x480   : > { %2754 = vmatmul.msk.bf16.gmra.mxu1 %vm514_vm0, %v908_v55  ;;  %2770 = vmatmul.msk.bf16.gmra.mxu3 %vm514_vm0, %v908_v55 }
 0x48d   : > { %v1028_v26 = vpop.f32.mrf.mxu1 }
 0x48e   : > { %v4218_v19 = vadd.f32 %v1028_v26, %v4213_v0 }
 0x490   : > { %2755 = vmatmul.msk.bf16.gmra.mxu1 %vm514_vm0, %v909_v57  ;;  %2771 = vmatmul.msk.bf16.gmra.mxu3 %vm514_vm0, %v909_v57  ;;  %v1197_v25 = vmul.f32 0.125, %v4218_v19 }
 0x493   : > { %v1117_v56 = vpop.f32.mrf.mxu3 }
 0x494   : > { %v1118_v37 = vadd.f32 %v1117_v56, %v4224_v28 }
 0x495   : > { %v1030_v21 = vpop.f32.mrf.mxu1 }
 0x496   : > { %v4221_v23 = vadd.f32 %v1030_v21, %v4213_v0 }
 0x498   : > { %v1198_v30 = vmul.f32 0.125, %v4221_v23  ;;  %v1245_v32 = vpack.c.bf16 %v4221_v23, %v4218_v19 }
 0x49a   : > { %v4229_v10 = vpack.c.bf16 %v1198_v30, %v1197_v25 }
 0x49b   : > { %v1119_v34 = vpop.f32.mrf.mxu3 }
 0x49c   : > { %v1120_v49 = vadd.f32 %v1119_v34, %v4224_v28 }
 0x49d   : > { %v1033_v47 = vpop.f32.mrf.mxu1 }
 0x49e   : > { %v4233_v59 = vpack.c.bf16 %v1120_v49, %v1118_v37  ;;  %v4238_v14 = vadd.f32 %v1033_v47, %v4213_v0 }
 0x4a0   : > { %2756 = vmatmul.msk.bf16.gmra.mxu1 %vm514_vm0, %v910_v6  ;;  %2772 = vmatmul.msk.bf16.gmra.mxu3 %vm514_vm0, %v910_v6  ;;  %v1199_v18 = vmul.f32 0.125, %v4238_v14 }
 0x4a3   : > { %v1122_v51 = vpop.f32.mrf.mxu3 }
 0x4a4   : > { %v1123_v2 = vadd.f32 %v1122_v51, %v4224_v28 }
 0x4a5   : > { %v1035_v62 = vpop.f32.mrf.mxu1 }
 0x4a6   : > { %v4241_v4 = vadd.f32 %v1035_v62, %v4213_v0 }
 0x4a8   : > { %v1200_v22 = vmul.f32 0.125, %v4241_v4  ;;  %v1246_v11 = vpack.c.bf16 %v4241_v4, %v4238_v14 }
 0x4aa   : > { %v4247_v12 = vpack.c.bf16 %v1200_v22, %v1199_v18 }
 0x4ab   : > { %v1124_v8 = vpop.f32.mrf.mxu3 }
 0x4ac   : > { %v1125_v13 = vadd.f32 %v1124_v8, %v4224_v28 }
 0x4ad   : > { %v1038_v24 = vpop.f32.mrf.mxu1 }
 0x4ae   : > { %v4251_v38 = vpack.c.bf16 %v1125_v13, %v1123_v2  ;;  %v4258_v41 = vadd.f32 %v1038_v24, %v4213_v0 }
 0x4b0   : > { %2757 = vmatmul.msk.bf16.gmra.mxu1 %vm514_vm0, %v4166_v46  ;;  %2773 = vmatmul.msk.bf16.gmra.mxu3 %vm514_vm0, %v4166_v46  ;;  %v1201_v48 = vmul.f32 0.125, %v4258_v41 }
 0x4b3   : > { %v1127_v7 = vpop.f32.mrf.mxu3 }
 0x4b4   : > { %v1128_v53 = vadd.f32 %v1127_v7, %v4224_v28 }
 0x4b5   : > { %v1040_v43 = vpop.f32.mrf.mxu1 }
 0x4b6   : > { %v4261_v45 = vadd.f32 %v1040_v43, %v4213_v0 }
 0x4b8   : > { %v1202_v9 = vmul.f32 0.125, %v4261_v45  ;;  %v1247_v50 = vpack.c.bf16 %v4261_v45, %v4258_v41 }
 0x4ba   : > { %v4267_v52 = vpack.c.bf16 %v1202_v9, %v1201_v48 }
 0x4bb   : > { %v1129_v40 = vpop.f32.mrf.mxu3 }
 0x4bc   : > { %v1130_v55 = vadd.f32 %v1129_v40, %v4224_v28 }
 0x4bd   : > { %v1043_v57 = vpop.f32.mrf.mxu1 }
 0x4be   : > { %v4271_v6 = vpack.c.bf16 %v1130_v55, %v1128_v53  ;;  %v4278_v29 = vadd.f32 %v1043_v57, %v4213_v0 }
 0x4c0   : > { %2758 = vmatmul.msk.bf16.gmra.mxu1 %vm514_vm0, %v4168_v58  ;;  %2774 = vmatmul.msk.bf16.gmra.mxu3 %vm514_vm0, %v4168_v58  ;;  %v1203_v35 = vmul.f32 0.125, %v4278_v29 }
 0x4c3   : > { %v1132_v46 = vpop.f32.mrf.mxu3 }
 0x4c4   : > { %v1133_v58 = vadd.f32 %v1132_v46, %v4224_v28 }
 0x4c5   : > { %v1045_v31 = vpop.f32.mrf.mxu1 }
 0x4c6   : > { %v4281_v33 = vadd.f32 %v1045_v31, %v4213_v0 }
 0x4c8   : > { %v1204_v36 = vmul.f32 0.125, %v4281_v33  ;;  %v1248_v3 = vpack.c.bf16 %v4281_v33, %v4278_v29 }
 0x4ca   : > { %v4287_v44 = vpack.c.bf16 %v1204_v36, %v1203_v35 }
 0x4cb   : > { %v1134_v5 = vpop.f32.mrf.mxu3 }
 0x4cc   : > { %v1135_v54 = vadd.f32 %v1134_v5, %v4224_v28 }
 0x4cd   : > { %v1048_v63 = vpop.f32.mrf.mxu1 }
 0x4ce   : > { %v4291_v1 = vpack.c.bf16 %v1135_v54, %v1133_v58  ;;  %v4300_v16 = vadd.f32 %v1048_v63, %v4213_v0 }
 0x4d0   : > { %2759 = vmatmul.msk.bf16.gmra.mxu1 %vm514_vm0, %v4170_v60  ;;  %2775 = vmatmul.msk.bf16.gmra.mxu3 %vm514_vm0, %v4170_v60  ;;  %v1205_v15 = vmul.f32 0.125, %v4300_v16 }
 0x4d3   : > { %v4297_v39 = vpop.f32.mrf.mxu3 }
 0x4d5   : > { %v1050_v17 = vpop.f32.mrf.mxu1 }
 0x4d6   : > { %v4303_v20 = vadd.f32 %v1050_v17, %v4213_v0 }
 0x4d8   : > { %v1206_v26 = vmul.f32 0.125, %v4303_v20 }
 0x4da   : > { %v4307_v56 = vpack.c.bf16 %v1206_v26, %v1205_v15 }
 0x4db   : > { %v1139_v21 = vpop.f32.mrf.mxu3 }
 0x4dd   : > { %v1053_v25 = vpop.f32.mrf.mxu1 }
 0x4de   : > { %v1054_v30 = vadd.f32 %v1053_v25, %v4213_v0 }
 0x4e0   : > { %2760 = vmatmul.msk.bf16.gmra.mxu1 %vm514_vm0, %v4172_v61  ;;  %2776 = vmatmul.msk.bf16.gmra.mxu3 %vm514_vm0, %v4172_v61  ;;  %v1207_v49 = vmul.f32 0.125, %v1054_v30 }
 0x4e3   : > { %v1142_v60 = vpop.f32.mrf.mxu3 }
 0x4e5   : > { %v1055_v34 = vpop.f32.mrf.mxu1 }
 0x4e6   : > { %v1056_v37 = vadd.f32 %v1055_v34, %v4213_v0  ;;  %v1143_v34 = vadd.f32 %v1142_v60, %v4224_v28 }
 0x4e8   : > { %v1208_v47 = vmul.f32 0.125, %v1056_v37 }
 0x4ea   : > { %v4315_v51 = vpack.c.bf16 %v1208_v47, %v1207_v49 }
 0x4eb   : > { %v1144_v62 = vpop.f32.mrf.mxu3 }
 0x4ec   : > { %v1145_v15 = vadd.f32 %v1144_v62, %v4224_v28 }
 0x4ed   : > { %v1058_v18 = vpop.f32.mrf.mxu1 }
 0x4ee   : > { %v1059_v61 = vadd.f32 %v1058_v18, %v4213_v0  ;;  %v1140_v18 = vadd.f32 %v1139_v21, %v4224_v28 }
 0x4f0   : > { %2761 = vmatmul.msk.bf16.gmra.mxu1 %vm514_vm0, %v4174_v42  ;;  %2777 = vmatmul.msk.bf16.gmra.mxu3 %vm514_vm0, %v4174_v42  ;;  %v1209_v13 = vmul.f32 0.125, %v1059_v61 }
 0x4f3   : > { %v1147_v22 = vpop.f32.mrf.mxu3 }
 0x4f4   : > { %v1148_v63 = vadd.f32 %v1147_v22, %v4224_v28  ;;  %v4353_v22 = vpack.c.bf16 %v1145_v15, %v1143_v34 }
 0x4f5   : > { %v1060_v8 = vpop.f32.mrf.mxu1 }
 0x4f6   : > { %v1061_v2 = vadd.f32 %v1060_v8, %v4213_v0  ;;  %v1250_v8 = vpack.c.bf16 %v1056_v37, %v1054_v30 }
 0x4f8   : > { %v1210_v24 = vmul.f32 0.125, %v1061_v2  ;;  %v1251_v17 = vpack.c.bf16 %v1061_v2, %v1059_v61  ;;  %v1138_v61 = vadd.f32 %v4297_v39, %v4224_v28  ;;  %v1249_v39 = vpack.c.bf16 %v4303_v20, %v4300_v16 }
 0x4fa   : > { %v4323_v7 = vpack.c.bf16 %v1210_v24, %v1209_v13  ;;  %v4363_v13 = vpack.c.bf16 %v1140_v18, %v1138_v61 }
 0x4fb   : > { %v1149_v43 = vpop.f32.mrf.mxu3 }
 0x4fc   : > { %v1150_v58 = vadd.f32 %v1149_v43, %v4224_v28 }
 0x4fd   : > { %v1063_v48 = vpop.f32.mrf.mxu1 }
 0x4fe   : > { %v1064_v42 = vadd.f32 %v1063_v48, %v4213_v0  ;;  %v4342_v26 = vpack.c.bf16 %v1150_v58, %v1148_v63 }
 0x500   : > { %2762 = vmatmul.msk.bf16.gmra.mxu1 %vm514_vm0, %v4176_v27  ;;  %2778 = vmatmul.msk.bf16.gmra.mxu3 %vm514_vm0, %v4176_v27  ;;  %v1211_v55 = vmul.f32 0.125, %v1064_v42 }
 0x503   : > { %v1152_v9 = vpop.f32.mrf.mxu3 }
 0x504   : > { %v1153_v36 = vadd.f32 %v1152_v9, %v4224_v28 }
 0x505   : > { %v1065_v40 = vpop.f32.mrf.mxu1 }
 0x506   : > { %v1066_v53 = vadd.f32 %v1065_v40, %v4213_v0 }
 0x508   : > { %v1212_v57 = vmul.f32 0.125, %v1066_v53  ;;  %v1252_v46 = vpack.c.bf16 %v1066_v53, %v1064_v42 }
 0x50a   : > { %1307 = vrot.lane.b32.xlu2 %v1252_v46, %s3396_s14  ;;  %v4332_v31 = vpack.c.bf16 %v1212_v57, %v1211_v55 }
 0x50b   : > { %v1154_v35 = vpop.f32.mrf.mxu3 }
 0x50c   : > { %v1155_v5 = vadd.f32 %v1154_v35, %v4224_v28 }
 0x50d   : > { %v1068_v27 = vpop.f32.mrf.mxu1 }
 0x50e   : > { %v4337_v54 = vpack.c.bf16 %v1155_v5, %v1153_v36  ;;  %v4349_v49 = vadd.f32 %v1068_v27, %v4213_v0 }
 0x510   : > { %2015 = vmatpush.bf16.msra.mxu1 %v4337_v54  ;;  %v1213_v2 = vmul.f32 0.125, %v4349_v49 }
 0x512   : > { %1305 = vrot.lane.b32.xlu2 %v1251_v17, %s3396_s14 }
 0x513   : > { %v4345_v25 = vpop.f32.mrf.mxu3 }
 0x514   : > { %2016 = vmatpush.bf16.msra.mxu1 %v4342_v26 }
 0x515   : > { %v1070_v47 = vpop.f32.mrf.mxu1 }
 0x516   : > { %v4356_v62 = vadd.f32 %v1070_v47, %v4213_v0 }
 0x518   : > { %v1214_v60 = vmul.f32 0.125, %v4356_v62  ;;  %2017 = vmatpush.bf16.msra.mxu1 %v4353_v22 }
 0x51a   : > { %1303 = vrot.lane.b32.xlu2 %v1250_v8, %s3396_s14  ;;  %v4366_v21 = vpack.c.bf16 %v1214_v60, %v1213_v2 }
 0x51b   : > { %v4368_v24 = vpop.f32.mrf.mxu3 }
 0x51c   : > { %2018 = vmatpush.bf16.msra.mxu1 %v4363_v13 }
 0x51d   : > { %v1073_v43 = vpop.f32.mrf.mxu1 }
 0x51e   : > { %v4378_v37 = vadd.f32 %v1073_v43, %v4213_v0 }
 0x520   : > { %2019 = vmatpush.bf16.msra.mxu1 %v4291_v1  ;;  %v1215_v42 = vmul.f32 0.125, %v4378_v37 }
 0x522   : > { %1301 = vrot.lane.b32.xlu2 %v1249_v39, %s3396_s14 }
 0x523   : > { %v4375_v30 = vpop.f32.mrf.mxu3 }
 0x524   : > { %2020 = vmatpush.bf16.msra.mxu1 %v4271_v6 }
 0x525   : > { %v1075_v48 = vpop.f32.mrf.mxu1 }
 0x526   : > { %v4382_v9 = vadd.f32 %v1075_v48, %v4213_v0 }
 0x528   : > { %v1216_v40 = vmul.f32 0.125, %v4382_v9  ;;  %2021 = vmatpush.bf16.msra.mxu1 %v4251_v38 }
 0x52a   : > { %1299 = vrot.lane.b32.xlu2 %v1248_v3, %s3396_s14  ;;  %v4391_v16 = vpack.c.bf16 %v1216_v40, %v1215_v42 }
 0x52b   : > { %v4393_v20 = vpop.f32.mrf.mxu3 }
 0x52c   : > { %2022 = vmatpush.bf16.msra.mxu1 %v4233_v59 }
 0x52d   : > { %v1078_v53 = vpop.f32.mrf.mxu1 }
 0x52e   : > { %v4403_v57 = vadd.f32 %v1078_v53, %v4213_v0 }
 0x530   : > { %v1217_v33 = vmul.f32 0.125, %v4403_v57 }
 0x532   : > { %1297 = vrot.lane.b32.xlu2 %v1247_v50, %s3396_s14 }
 0x533   : > { %v4400_v55 = vpop.f32.mrf.mxu3 }
 0x535   : > { %v1080_v46 = vpop.f32.mrf.mxu1 }
 0x536   : > { %v4406_v29 = vadd.f32 %v1080_v46, %v4213_v0 }
 0x538   : > { %v1218_v3 = vmul.f32 0.125, %v4406_v29 }
 0x53a   : > { %1295 = vrot.lane.b32.xlu2 %v1246_v11, %s3396_s14  ;;  %v4414_v41 = vpack.c.bf16 %v1218_v3, %v1217_v33 }
 0x53b   : > { %v4416_v45 = vpop.f32.mrf.mxu3 }
 0x53d   : > { %v1083_v50 = vpop.f32.mrf.mxu1 }
 0x542   : > { %1293 = vrot.lane.b32.xlu2 %v1245_v32, %s3396_s14 }
 0x543   : > { %v4422_v35 = vpop.f32.mrf.mxu3 }
 0x545   : > { %v1085_v36 = vpop.f32.mrf.mxu1 }
 0x546   : > { %v4445_v3 = vadd.f32 %v1085_v36, %v4213_v0 }
 0x54b   : > { %v4424_v5 = vpop.f32.mrf.mxu3 }
 0x54d   : > { %v1088_v27 = vpop.f32.mrf.mxu1 }
 0x54e   : > { %v1089_v14 = vadd.f32 %v1088_v27, %v4213_v0 }
 0x550   : > { %v1221_v63 = vmul.f32 0.125, %v1089_v14 }
 0x553   : > { %v4426_v58 = vpop.f32.mrf.mxu3 }
 0x555   : > { %v1090_v4 = vpop.f32.mrf.mxu1 }
 0x556   : > { %v1091_v11 = vadd.f32 %v1090_v4, %v4213_v0 }
 0x558   : > { %v1222_v17 = vmul.f32 0.125, %v1091_v11  ;;  %v1257_v46 = vpack.c.bf16 %v1091_v11, %v1089_v14 }
 0x55a   : > { %v4430_v15 = vpack.c.bf16 %v1222_v17, %v1221_v63 }
 0x55b   : > { %v4432_v34 = vpop.f32.mrf.mxu3 }
 0x55d   : > { %v1093_v19 = vpop.f32.mrf.mxu1 }
 0x55e   : > { %v1094_v32 = vadd.f32 %v1093_v19, %v4213_v0  ;;  %v4450_v19 = vadd.f32 %v1083_v50, %v4213_v0 }
 0x560   : > { %v1223_v2 = vmul.f32 0.125, %v1094_v32  ;;  %v1256_v14 = vpack.c.bf16 %v4445_v3, %v4450_v19 }
 0x563   : > { %v4434_v23 = vpop.f32.mrf.mxu3 }
 0x564   : > { %v1308_v47 = vpop.permute.xlu2 %1307 }
 0x565   : > { %v1095_v18 = vpop.f32.mrf.mxu1  ;;  %v1395_v61 = vsel %vm514_vm0, %v1308_v47, 0 }
 0x566   : > { %v1096_v8 = vadd.f32 %v1095_v18, %v4213_v0  ;;  %1421 = vmatpush.bf16.xpose.msra.mxu0 %v1395_v61  ;;  %2862 = vmatpush.bf16.xpose.msra.mxu2 %v1395_v61 }
 0x568   : > { %v1224_v60 = vmul.f32 0.125, %v1096_v8  ;;  %v1258_v43 = vpack.c.bf16 %v1096_v8, %v1094_v32 }
 0x56a   : > { %1319 = vrot.lane.b32.xlu2 %v1258_v43, %s3396_s14  ;;  %v4440_v39 = vpack.c.bf16 %v1224_v60, %v1223_v2  ;;  %v1255_v60 = vpack.c.bf16 %v4406_v29, %v4403_v57 }
 0x56b   : > { %v1184_v48 = vpop.f32.mrf.mxu3 }
 0x56c   : > { %v1306_v42 = vpop.permute.xlu2 %1305 }
 0x56d   : > { %v1098_v40 = vpop.f32.mrf.mxu1  ;;  %v1392_v53 = vsel %vm514_vm0, %v1306_v42, 0 }
 0x56e   : > { %1422 = vmatpush.bf16.xpose.msra.mxu0 %v1392_v53  ;;  %2863 = vmatpush.bf16.xpose.msra.mxu2 %v1392_v53  ;;  %v1099_v27 = vadd.f32 %v1098_v40, %v4213_v0 }
 0x570   : > { %v1225_v11 = vmul.f32 0.125, %v1099_v27 }
 0x572   : > { %1317 = vrot.lane.b32.xlu2 %v1257_v46, %s3396_s14 }
 0x573   : > { %v1187_v33 = vpop.f32.mrf.mxu3 }
 0x574   : > { %v1304_v4 = vpop.permute.xlu2 %1303 }
 0x575   : > { %v1100_v63 = vpop.f32.mrf.mxu1  ;;  %v1389_v17 = vsel %vm514_vm0, %v1304_v4, 0  ;;  %v1254_v4 = vpack.c.bf16 %v4382_v9, %v4378_v37  ;;  %v1253_v9 = vpack.c.bf16 %v4356_v62, %v4349_v49  ;;  %v1180_v49 = vadd.f32 %v4432_v34, %v4224_v28 }
 0x576   : > { %v1101_v32 = vadd.f32 %v1100_v63, %v4213_v0  ;;  %1423 = vmatpush.bf16.xpose.msra.mxu0 %v1389_v17  ;;  %2864 = vmatpush.bf16.xpose.msra.mxu2 %v1389_v17 }
 0x578   : > { %v1226_v47 = vmul.f32 0.125, %v1101_v32  ;;  %v1259_v36 = vpack.c.bf16 %v1101_v32, %v1099_v27 }
 0x57a   : > { %1321 = vrot.lane.b32.xlu1 %v1259_v36, %s3396_s14  ;;  %1315 = vrot.lane.b32.xlu2 %v1256_v14, %s3396_s14  ;;  %v4457_v18 = vpack.c.bf16 %v1226_v47, %v1225_v11 }
 0x57b   : > { %v1189_v61 = vpop.f32.mrf.mxu3 }
 0x57c   : > { %v1302_v8 = vpop.permute.xlu2 %1301  ;;  %v1190_v36 = vadd.f32 %v1189_v61, %v4224_v28  ;;  %v1183_v61 = vadd.f32 %v4434_v23, %v4224_v28  ;;  %v1175_v23 = vadd.f32 %v4424_v5, %v4224_v28  ;;  %v1168_v5 = vadd.f32 %v4400_v55, %v4224_v28 }
 0x57d   : > { %v1103_v50 = vpop.f32.mrf.mxu1  ;;  %v1386_v2 = vsel %vm514_vm0, %v1302_v8, 0  ;;  %v1188_v8 = vadd.f32 %v1187_v33, %v4224_v28  ;;  %v1160_v55 = vadd.f32 %v4368_v24, %v4224_v28 }
 0x57e   : > { %1424 = vmatpush.bf16.xpose.msra.mxu0 %v1386_v2  ;;  %2865 = vmatpush.bf16.xpose.msra.mxu2 %v1386_v2  ;;  %v1104_v42 = vadd.f32 %v1103_v50, %v4213_v0  ;;  %v1185_v50 = vadd.f32 %v1184_v48, %v4224_v28  ;;  %v1178_v48 = vadd.f32 %v4426_v58, %v4224_v28  ;;  %v1220_v58 = vmul.f32 0.125, %v4445_v3 }
 0x57f   : > { %v4483_v2 = vpack.c.bf16 %v1190_v36, %v1188_v8 }
 0x580   : > { %v1227_v63 = vmul.f32 0.125, %v1104_v42  ;;  %v4492_v62 = vpack.c.bf16 %v1185_v50, %v1183_v61  ;;  %v4499_v33 = vpack.c.bf16 %v1180_v49, %v1178_v48 }
 0x582   : > { %1313 = vrot.lane.b32.xlu2 %v1255_v60, %s3396_s14 }
 0x583   : > { %v1192_v43 = vpop.f32.mrf.mxu3 }
 0x584   : > { %v1300_v40 = vpop.permute.xlu2 %1299  ;;  %v1193_v14 = vadd.f32 %v1192_v43, %v4224_v28 }
 0x585   : > { %v1105_v53 = vpop.f32.mrf.mxu1  ;;  %v1383_v46 = vsel %vm514_vm0, %v1300_v40, 0 }
 0x586   : > { %v1106_v27 = vadd.f32 %v1105_v53, %v4213_v0  ;;  %1425 = vmatpush.bf16.xpose.msra.mxu0 %v1383_v46  ;;  %2866 = vmatpush.bf16.xpose.msra.mxu2 %v1383_v46  ;;  %v1170_v53 = vadd.f32 %v4416_v45, %v4224_v28  ;;  %v1163_v45 = vadd.f32 %v4375_v30, %v4224_v28 }
 0x588   : > { %v1228_v17 = vmul.f32 0.125, %v1106_v27  ;;  %v1260_v32 = vpack.c.bf16 %v1106_v27, %v1104_v42  ;;  %v1173_v42 = vadd.f32 %v4422_v35, %v4224_v28  ;;  %v1219_v35 = vmul.f32 0.125, %v4450_v19 }
 0x589   : > { %v1165_v27 = vadd.f32 %v4393_v20, %v4224_v28  ;;  %v1158_v20 = vadd.f32 %v4345_v25, %v4224_v28 }
 0x58a   : > { %1323 = vrot.lane.b32.xlu0 %v1260_v32, %s3396_s14  ;;  %1311 = vrot.lane.b32.xlu2 %v1254_v4, %s3396_s14  ;;  %v4470_v57 = vpack.c.bf16 %v1228_v17, %v1227_v63  ;;  %v4507_v46 = vpack.c.bf16 %v1175_v23, %v1173_v42  ;;  %v4516_v4 = vpack.c.bf16 %v1170_v53, %v1168_v5 }
 0x58b   : > { %v1194_v29 = vpop.f32.mrf.mxu3  ;;  %v4518_v63 = vpack.c.bf16 %v1220_v58, %v1219_v35  ;;  %v1270_v3 = vpack.c.bf16 %v1165_v27, %v1163_v45  ;;  %v1269_v19 = vpack.c.bf16 %v1160_v55, %v1158_v20 }
 0x58c   : > { %v1195_v11 = vadd.f32 %v1194_v29, %v4224_v28  ;;  %v1298_v0 = vpop.permute.xlu2 %1297 }
 0x58d   : > { %v1380_v47 = vsel %vm514_vm0, %v1298_v0, 0 }
 0x58e   : > { %v4476_v37 = vpack.c.bf16 %v1195_v11, %v1193_v14  ;;  %1426 = vmatpush.bf16.xpose.msra.mxu0 %v1380_v47  ;;  %2867 = vmatpush.bf16.xpose.msra.mxu2 %v1380_v47 }
 0x590   : > { %2878 = vmatpush.bf16.msra.mxu3 %v4476_v37 }
 0x592   : > { %1309 = vrot.lane.b32.xlu2 %v1253_v9, %s3396_s14 }
 0x594   : > { %2879 = vmatpush.bf16.msra.mxu3 %v4483_v2  ;;  %v1296_v60 = vpop.permute.xlu2 %1295 }
 0x595   : > { %v1377_v43 = vsel %vm514_vm0, %v1296_v60, 0 }
 0x596   : > { %1427 = vmatpush.bf16.xpose.msra.mxu0 %v1377_v43  ;;  %2868 = vmatpush.bf16.xpose.msra.mxu2 %v1377_v43 }
 0x598   : > { %2880 = vmatpush.bf16.msra.mxu3 %v4492_v62 }
 0x59c   : > { %2881 = vmatpush.bf16.msra.mxu3 %v4499_v33  ;;  %v1294_v34 = vpop.permute.xlu2 %1293 }
 0x59d   : > { %v1374_v40 = vsel %vm514_vm0, %v1294_v34, 0 }
 0x59e   : > { %1428 = vmatpush.bf16.xpose.msra.mxu0 %v1374_v40  ;;  %2869 = vmatpush.bf16.xpose.msra.mxu2 %v1374_v40 }
 0x5a0   : > { %2882 = vmatpush.bf16.msra.mxu3 %v4507_v46 }
 0x5a4   : > { %2883 = vmatpush.bf16.msra.mxu3 %v4516_v4 }
 0x5a5   : > { %2779 = vmatmul.msk.bf16.vlgmr.msra.gmra.mxu0 %vm514_vm0, %v4229_v10  ;;  %2790 = vmatmul.msk.bf16.vlgmr.msra.gmra.mxu2 %vm514_vm0, %v4518_v63 }
 0x5a8   : > { %2884 = vmatpush.bf16.msra.mxu3 %v1270_v3 }
 0x5ac   : > { %2885 = vmatpush.bf16.msra.mxu3 %v1269_v19 }
 0x5b5   : > { %2780 = vmatmul.msk.bf16.gmra.mxu0 %vm514_vm0, %v4247_v12  ;;  %2791 = vmatmul.msk.bf16.gmra.mxu2 %vm514_vm0, %v4430_v15 }
 0x5c4   : > { %v1320_v24 = vpop.permute.xlu2 %1319 }
 0x5c5   : > { %2781 = vmatmul.msk.bf16.gmra.mxu0 %vm514_vm0, %v4267_v52  ;;  %2792 = vmatmul.msk.bf16.gmra.mxu2 %vm514_vm0, %v4440_v39  ;;  %v1413_v29 = vsel %vm514_vm0, %v1320_v24, 0 }
 0x5cc   : > { %v1318_v32 = vpop.permute.xlu2 %1317 }
 0x5cd   : > { %v1410_v11 = vsel %vm514_vm0, %v1318_v32, 0 }
 0x5d4   : > { %v1316_v14 = vpop.permute.xlu2 %1315 }
 0x5d5   : > { %2782 = vmatmul.msk.bf16.gmra.mxu0 %vm514_vm0, %v4287_v44  ;;  %2793 = vmatmul.msk.bf16.gmra.mxu2 %vm514_vm0, %v4457_v18  ;;  %v1407_v0 = vsel %vm514_vm0, %v1316_v14, 0 }
 0x5dc   : > { %v1314_v47 = vpop.permute.xlu2 %1313 }
 0x5dd   : > { %v1404_v36 = vsel %vm514_vm0, %v1314_v47, 0 }
 0x5e4   : > { %v1312_v9 = vpop.permute.xlu2 %1311 }
 0x5e5   : > { %2783 = vmatmul.msk.bf16.gmra.mxu0 %vm514_vm0, %v4307_v56  ;;  %2794 = vmatmul.msk.bf16.gmra.mxu2 %vm514_vm0, %v4470_v57  ;;  %v1401_v8 = vsel %vm514_vm0, %v1312_v9, 0 }
 0x5ec   : > { %v1322_v30 = vpop.permute.xlu1 %1321  ;;  %v1310_v50 = vpop.permute.xlu2 %1309 }
 0x5ed   : > { %v1416_v17 = vsel %vm514_vm0, %v1322_v30, 0  ;;  %v1398_v61 = vsel %vm514_vm0, %v1310_v50, 0 }
 0x5f5   : > { %2784 = vmatmul.msk.bf16.gmra.mxu0 %vm514_vm0, %v4315_v51 }
 0x5fc   : > { %v1324_v28 = vpop.permute.xlu0 %1323 }
 0x5fd   : > { %v1419_v25 = vsel %vm514_vm0, %v1324_v28, 0 }
 0x5fe   : > { %1510 = vmatpush.bf16.xpose.msrb.mxu2 %v1419_v25 }
 0x605   : > { %2785 = vmatmul.msk.bf16.gmra.mxu0 %vm514_vm0, %v4323_v7 }
 0x606   : > { %1511 = vmatpush.bf16.xpose.msrb.mxu2 %v1416_v17 }
 0x60e   : > { %1512 = vmatpush.bf16.xpose.msrb.mxu2 %v1413_v29 }
 0x615   : > { %2786 = vmatmul.msk.bf16.gmra.mxu0 %vm514_vm0, %v4332_v31 }
 0x616   : > { %1513 = vmatpush.bf16.xpose.msrb.mxu2 %v1410_v11 }
 0x61e   : > { %1514 = vmatpush.bf16.xpose.msrb.mxu2 %v1407_v0 }
 0x625   : > { %2787 = vmatmul.msk.bf16.gmra.mxu0 %vm514_vm0, %v4366_v21 }
 0x626   : > { %1515 = vmatpush.bf16.xpose.msrb.mxu2 %v1404_v36 }
 0x62e   : > { %1516 = vmatpush.bf16.xpose.msrb.mxu2 %v1401_v8 }
 0x635   : > { %2788 = vmatmul.msk.bf16.gmra.mxu0 %vm514_vm0, %v4391_v16 }
 0x636   : > { %1517 = vmatpush.bf16.xpose.msrb.mxu2 %v1398_v61 }
 0x63d   : > { %2795 = vmatmul.msk.bf16.vlgmr.msrb.gmra.mxu2 %vm514_vm0, %v4229_v10  ;;  %v4584_v10 = vpop.f32.mrf.mxu2 }
 0x63e   : > { %2870 = vmatpush.bf16.msra.mxu2 %v4337_v54  ;;  %v4607_v54 = vpop.f32.mrf.mxu0 }
 0x642   : > { %2871 = vmatpush.bf16.msra.mxu2 %v4342_v26 }
 0x645   : > { %2789 = vmatmul.msk.bf16.gmra.mxu0 %vm514_vm0, %v4414_v41 }
 0x646   : > { %2872 = vmatpush.bf16.msra.mxu2 %v4353_v22  ;;  %v4613_v26 = vpop.f32.mrf.mxu0 }
 0x64a   : > { %2873 = vmatpush.bf16.msra.mxu2 %v4363_v13 }
 0x64d   : > { %2796 = vmatmul.msk.bf16.gmra.mxu2 %vm514_vm0, %v4247_v12  ;;  %v4588_v12 = vpop.f32.mrf.mxu2 }
 0x64e   : > { %2874 = vmatpush.bf16.msra.mxu2 %v4291_v1  ;;  %v4619_v22 = vpop.f32.mrf.mxu0 }
 0x652   : > { %2875 = vmatpush.bf16.msra.mxu2 %v4271_v6 }
 0x656   : > { %2876 = vmatpush.bf16.msra.mxu2 %v4251_v38  ;;  %v4623_v13 = vpop.f32.mrf.mxu0 }
 0x65a   : > { %2877 = vmatpush.bf16.msra.mxu2 %v4233_v59  ;;  %v4593_v59 = vpop.f32.mrf.mxu2 }
 0x65d   : > { %2797 = vmatmul.msk.bf16.gmra.mxu2 %vm514_vm0, %v4267_v52 }
 0x65e   : > { %2104 = vmatpush.bf16.msrb.mxu2 %v4476_v37 }
 0x662   : > { %2105 = vmatpush.bf16.msrb.mxu2 %v4483_v2  ;;  %v4595_v38 = vpop.f32.mrf.mxu2 }
 0x666   : > { %2106 = vmatpush.bf16.msrb.mxu2 %v4492_v62 }
 0x66a   : > { %2107 = vmatpush.bf16.msrb.mxu2 %v4499_v33  ;;  %v4599_v52 = vpop.f32.mrf.mxu2 }
 0x66d   : > { %2798 = vmatmul.msk.bf16.gmra.mxu2 %vm514_vm0, %v4287_v44 }
 0x66e   : > { %2108 = vmatpush.bf16.msrb.mxu2 %v4507_v46 }
 0x672   : > { %2109 = vmatpush.bf16.msrb.mxu2 %v4516_v4  ;;  %v4603_v6 = vpop.f32.mrf.mxu2 }
 0x673   : > { %5189 = vst [vmem:[#allocation15_spill] sm:$0xff] %v4603_v6 }
 0x676   : > { %2110 = vmatpush.bf16.msrb.mxu2 %v1270_v3 }
 0x67a   : > { %2111 = vmatpush.bf16.msrb.mxu2 %v1269_v19  ;;  %v4605_v1 = vpop.f32.mrf.mxu2 }
 0x67d   : > { %2799 = vmatmul.msk.bf16.gmra.mxu2 %vm514_vm0, %v4307_v56 }
 0x682   : > { %v4611_v44 = vpop.f32.mrf.mxu2 }
 0x68a   : > { %v4617_v56 = vpop.f32.mrf.mxu2 }
 0x68d   : > { %2800 = vmatmul.msk.bf16.gmra.mxu2 %vm514_vm0, %v4315_v51 }
 0x692   : > { %v4621_v51 = vpop.f32.mrf.mxu2 }
 0x69d   : > { %2801 = vmatmul.msk.bf16.gmra.mxu2 %vm514_vm0, %v4323_v7  ;;  %v4629_v7 = vpop.f32.mrf.mxu0 }
 0x6ad   : > { %2802 = vmatmul.msk.bf16.gmra.mxu2 %vm514_vm0, %v4332_v31  ;;  %v4635_v31 = vpop.f32.mrf.mxu0 }
 0x6b5   : > { %v4639_v43 = vpop.f32.mrf.mxu0 }
 0x6bd   : > { %2803 = vmatmul.msk.bf16.gmra.mxu2 %vm514_vm0, %v4366_v21  ;;  %v4647_v62 = vpop.f32.mrf.mxu0 }
 0x6c0   : > { %v4627_v37 = vpop.f32.mrf.mxu2 }
 0x6c5   : > { %v4651_v23 = vpop.f32.mrf.mxu0 }
 0x6c8   : > { %v4631_v2 = vpop.f32.mrf.mxu2 }
 0x6cd   : > { %2804 = vmatmul.msk.bf16.gmra.mxu2 %vm514_vm0, %v4391_v16  ;;  %v4659_v42 = vpop.f32.mrf.mxu0 }
 0x6d0   : > { %v4637_v60 = vpop.f32.mrf.mxu2 }
 0x6d5   : > { %v4665_v34 = vpop.f32.mrf.mxu0 }
 0x6d8   : > { %v4641_v49 = vpop.f32.mrf.mxu2 }
 0x6dd   : > { %2805 = vmatmul.msk.bf16.gmra.mxu2 %vm514_vm0, %v4414_v41  ;;  %v4673_v58 = vpop.f32.mrf.mxu0 }
 0x6de   : > { %5190 = vst [vmem:[#allocation16_spill] sm:$0xff] %v4673_v58 }
 0x6e0   : > { %v4645_v21 = vpop.f32.mrf.mxu2 }
 0x6e5   : > { %v4679_v35 = vpop.f32.mrf.mxu0 }
 0x6e8   : > { %v4649_v48 = vpop.f32.mrf.mxu2 }
 0x6ed   : > { %2806 = vmatmul.msk.bf16.gmra.mxu2 %vm514_vm0, %v4518_v63  ;;  %v4685_v27 = vpop.f32.mrf.mxu0 }
 0x6f0   : > { %v4655_v16 = vpop.f32.mrf.mxu2 }
 0x6f1   : > { %v1617_v33 = vmax.f32 %v4639_v43, %v4655_v16 }
 0x6f3   : > { %1618 = vmax.xlane.f32.xlu1 %v1617_v33 }
 0x6f5   : > { %v4689_v63 = vpop.f32.mrf.mxu0 }
 0x6f8   : > { %v4661_v41 = vpop.f32.mrf.mxu2 }
 0x6fd   : > { %2807 = vmatmul.msk.bf16.gmra.mxu2 %vm514_vm0, %v4430_v15  ;;  %v4699_v3 = vpop.f32.mrf.mxu0 }
 0x6fe   : > { %5193 = vst [vmem:[#allocation19_spill] sm:$0xff] %v4699_v3 }
 0x700   : > { %v4667_v40 = vpop.f32.mrf.mxu2 }
 0x705   : > { %v4705_v19 = vpop.f32.mrf.mxu0 }
 0x708   : > { %v4669_v53 = vpop.f32.mrf.mxu2 }
 0x709   : > { %v1626_v46 = vmax.f32 %v4659_v42, %v4669_v53 }
 0x70b   : > { %1627 = vmax.xlane.f32.xlu0 %v1626_v46 }
 0x70d   : > { %2808 = vmatmul.msk.bf16.gmra.mxu2 %vm514_vm0, %v4440_v39  ;;  %v4709_v25 = vpop.f32.mrf.mxu0 }
 0x70e   : > { %5195 = vst [vmem:[#allocation21_spill] sm:$0xff] %v4709_v25 }
 0x710   : > { %v4677_v5 = vpop.f32.mrf.mxu2 }
 0x715   : > { %v4715_v30 = vpop.f32.mrf.mxu0 }
 0x716   : > { %5197 = vst [vmem:[#allocation23_spill] sm:$0xff] %v4715_v30 }
 0x718   : > { %v4681_v15 = vpop.f32.mrf.mxu2 }
 0x719   : > { %5191 = vst [vmem:[#allocation17_spill] sm:$0xff] %v4681_v15 }
 0x71d   : > { %2809 = vmatmul.msk.bf16.gmra.mxu2 %vm514_vm0, %v4457_v18 }
 0x720   : > { %v4687_v4 = vpop.f32.mrf.mxu2 }
 0x721   : > { %5192 = vst [vmem:[#allocation18_spill] sm:$0xff] %v4687_v4 }
 0x728   : > { %v4691_v45 = vpop.f32.mrf.mxu2 }
 0x729   : > { %v1638_v39 = vmax.f32 %v4685_v27, %v4691_v45 }
 0x72b   : > { %1639 = vmax.xlane.f32.xlu1 %v1638_v39 }
 0x72d   : > { %2810 = vmatmul.msk.bf16.gmra.mxu2 %vm514_vm0, %v4470_v57 }
 0x730   : > { %v4697_v55 = vpop.f32.mrf.mxu2 }
 0x738   : > { %v4701_v18 = vpop.f32.mrf.mxu2 }
 0x739   : > { %5194 = vst [vmem:[#allocation20_spill] sm:$0xff] %v4701_v18  ;;  %v1644_v20 = vmax.f32 %v4699_v3, %v4701_v18 }
 0x73b   : > { %1645 = vmax.xlane.f32.xlu1 %v1644_v20 }
 0x740   : > { %v4707_v28 = vpop.f32.mrf.mxu2 }
 0x748   : > { %v4711_v24 = vpop.f32.mrf.mxu2 }
 0x749   : > { %5196 = vst [vmem:[#allocation22_spill] sm:$0xff] %v4711_v24  ;;  %v1650_v57 = vmax.f32 %v4709_v25, %v4711_v24  ;;  %v1611_v24 = vmax.f32 %v4629_v7, %v4645_v21 }
 0x74b   : > { %1651 = vmax.xlane.f32.xlu1 %v1650_v57 }
 0x750   : > { %v4717_v17 = vpop.f32.mrf.mxu2 }
 0x751   : > { %5198 = vst [vmem:[#allocation24_spill] sm:$0xff] %v4717_v17  ;;  %v1653_v32 = vmax.f32 %v4715_v30, %v4717_v17  ;;  %v1599_v30 = vmax.f32 %v4607_v54, %v4627_v37 }
 0x753   : > { %1654 = vmax.xlane.f32.xlu0 %v1653_v32 }
 0x758   : > { %v4721_v29 = vpop.f32.mrf.mxu2 }
 0x760   : > { %v4723_v14 = vpop.f32.mrf.mxu2 }
 0x768   : > { %v4725_v11 = vpop.f32.mrf.mxu2 }
 0x770   : > { %v4727_v0 = vpop.f32.mrf.mxu2 }
 0x778   : > { %v4729_v47 = vpop.f32.mrf.mxu2 }
 0x780   : > { %v4731_v36 = vpop.f32.mrf.mxu2 }
 0x788   : > { %v4733_v9 = vpop.f32.mrf.mxu2 }
 0x790   : > { %v4735_v8 = vpop.f32.mrf.mxu2 }
 0x798   : > { %v4737_v50 = vpop.f32.mrf.mxu2 }
 0x7a0   : > { %v1589_v61 = vpop.f32.mrf.mxu2 }
 0x7a1   : > { %v1683_v33 = vmax.f32 %v4605_v1, %v1589_v61 }
 0x7a3   : > { %1684 = vmax.xlane.f32.xlu2 %v1683_v33  ;;  %v1602_v33 = vmax.f32 %v4613_v26, %v4631_v2 }
 0x7a8   : > { %v1591_v46 = vpop.f32.mrf.mxu2 }
 0x7a9   : > { %v1686_v39 = vmax.f32 %v4611_v44, %v1591_v46 }
 0x7ab   : > { %1687 = vmax.xlane.f32.xlu2 %v1686_v39  ;;  %v1605_v39 = vmax.f32 %v4619_v22, %v4637_v60 }
 0x7b0   : > { %v1594_v20 = vpop.f32.mrf.mxu2 }
 0x7b1   : > { %v1689_v57 = vmax.f32 %v4617_v56, %v1594_v20 }
 0x7b3   : > { %1690 = vmax.xlane.f32.xlu2 %v1689_v57  ;;  %v1608_v57 = vmax.f32 %v4623_v13, %v4641_v49 }
 0x7b8   : > { %v4742_v32 = vpop.f32.mrf.mxu2 }
 0x7b9   : > { %v1692_v17 = vmax.f32 %v4621_v51, %v4742_v32 }
 0x7bb   : > { %1693 = vmax.xlane.f32.xlu2 %v1692_v17  ;;  %v1614_v17 = vmax.f32 %v4635_v31, %v4649_v48 }
 0x7c3   : > { %1600 = vmax.xlane.f32.xlu2 %v1599_v30  ;;  %v1620_v30 = vmax.f32 %v4647_v62, %v4661_v41 }
 0x7cb   : > { %1603 = vmax.xlane.f32.xlu2 %v1602_v33  ;;  %v1623_v33 = vmax.f32 %v4651_v23, %v4667_v40 }
 0x7d3   : > { %1606 = vmax.xlane.f32.xlu2 %v1605_v39  ;;  %v1629_v39 = vmax.f32 %v4665_v34, %v4677_v5 }
 0x7db   : > { %1609 = vmax.xlane.f32.xlu2 %v1608_v57  ;;  %v1632_v57 = vmax.f32 %v4673_v58, %v4681_v15 }
 0x7e3   : > { %1612 = vmax.xlane.f32.xlu2 %v1611_v24  ;;  %v1635_v24 = vmax.f32 %v4679_v35, %v4687_v4 }
 0x7eb   : > { %1615 = vmax.xlane.f32.xlu2 %v1614_v17 }
 0x7f3   : > { %1621 = vmax.xlane.f32.xlu2 %v1620_v30 }
 0x7fb   : > { %1624 = vmax.xlane.f32.xlu2 %v1623_v33  ;;  %v1641_v33 = vmax.f32 %v4689_v63, %v4697_v55 }
 0x803   : > { %1630 = vmax.xlane.f32.xlu2 %v1629_v39 }
 0x80b   : > { %1633 = vmax.xlane.f32.xlu2 %v1632_v57 }
 0x813   : > { %1636 = vmax.xlane.f32.xlu2 %v1635_v24  ;;  %v1647_v24 = vmax.f32 %v4705_v19, %v4707_v28 }
 0x816   : > { %v1685_v17 = vpop.xlane.xlu2 %1684 }
 0x817   : > { %v1751_v25 = vsub.f32 %v4605_v1, %v1685_v17  ;;  %v1752_v30 = vsub.f32 %v1589_v61, %v1685_v17 }
 0x819   : > { %v1871_v18 = vmul.f32 1.442695, %v1751_v25  ;;  %v1873_v3 = vmul.f32 1.442695, %v1752_v30 }
 0x81b   : > { %2981 = vpow2.f32 %v1871_v18  ;;  %1642 = vmax.xlane.f32.xlu2 %v1641_v33  ;;  %v4779_v18 = vpop.f32.mrf.mxu0 }
 0x81c   : > { %2983 = vpow2.f32 %v1873_v3  ;;  %v1656_v30 = vmax.f32 %v4779_v18, %v4721_v29 }
 0x81e   : > { %v1688_v39 = vpop.xlane.xlu2 %1687 }
 0x81f   : > { %v1753_v15 = vsub.f32 %v4611_v44, %v1688_v39  ;;  %v1754_v57 = vsub.f32 %v1591_v46, %v1688_v39  ;;  %v2860_v39 = vld [vmem:[#allocation8 + $0x18] sm:$0xff] }
 0x820   : > { %2361 = vmatpush.bf16.msrb.mxu0 %v2860_v39 }
 0x821   : > { %v2982_v58 = vpop.eup %2981  ;;  %v1875_v6 = vmul.f32 1.442695, %v1753_v15  ;;  %v1877_v4 = vmul.f32 1.442695, %v1754_v57 }
 0x822   : > { %v4774_v1 = vpop.eup %2983 }
 0x823   : > { %5199 = vst [vmem:[#allocation25_spill] sm:$0xff] %v4774_v1  ;;  %2985 = vpow2.f32 %v1875_v6  ;;  %1648 = vmax.xlane.f32.xlu2 %v1647_v24  ;;  %v4777_v25 = vadd.f32 %v4774_v1, %v2982_v58 }
 0x824   : > { %2987 = vpow2.f32 %v1877_v4 }
 0x826   : > { %v1691_v3 = vpop.xlane.xlu2 %1690 }
 0x827   : > { %v1755_v44 = vsub.f32 %v4617_v56, %v1691_v3  ;;  %v1756_v61 = vsub.f32 %v1594_v20, %v1691_v3  ;;  %v4793_v3 = vpop.f32.mrf.mxu0 }
 0x829   : > { %v2986_v46 = vpop.eup %2985  ;;  %v1879_v15 = vmul.f32 1.442695, %v1755_v44  ;;  %v1881_v17 = vmul.f32 1.442695, %v1756_v61 }
 0x82a   : > { %v4784_v33 = vpop.eup %2987  ;;  %v2011_v6 = vpack.c.bf16 %v2986_v46, %v2982_v58 }
 0x82b   : > { %2989 = vpow2.f32 %v1879_v15  ;;  %1657 = vmax.xlane.f32.xlu2 %v1656_v30  ;;  %v4787_v4 = vadd.f32 %v4784_v33, %v2986_v46  ;;  %v1659_v46 = vmax.f32 %v4793_v3, %v4723_v14 }
 0x82c   : > { %2991 = vpow2.f32 %v1881_v17  ;;  %2093 = vmatmul.bf16.vlgmr.msra.gmra.mxu2 %v2011_v6 }
 0x82e   : > { %v1694_v56 = vpop.xlane.xlu2 %1693 }
 0x82f   : > { %v1757_v20 = vsub.f32 %v4621_v51, %v1694_v56  ;;  %v1758_v24 = vsub.f32 %v4742_v32, %v1694_v56  ;;  %v4815_v1 = vpop.f32.mrf.mxu0 }
 0x831   : > { %v2990_v58 = vpop.eup %2989  ;;  %v1883_v44 = vmul.f32 1.442695, %v1757_v20  ;;  %v1885_v61 = vmul.f32 1.442695, %v1758_v24 }
 0x832   : > { %v4797_v15 = vpop.eup %2991 }
 0x833   : > { %5200 = vst [vmem:[#allocation26_spill] sm:$0xff] %v4797_v15  ;;  %2993 = vpow2.f32 %v1883_v44  ;;  %1660 = vmax.xlane.f32.xlu2 %v1659_v46  ;;  %v4800_v17 = vadd.f32 %v4797_v15, %v2990_v58 }
 0x834   : > { %2995 = vpow2.f32 %v1885_v61 }
 0x836   : > { %v1601_v30 = vpop.xlane.xlu2 %1600 }
 0x837   : > { %v1695_v51 = vsub.f32 %v4607_v54, %v1601_v30  ;;  %v1696_v32 = vsub.f32 %v4627_v37, %v1601_v30 }
 0x839   : > { %v2994_v6 = vpop.eup %2993  ;;  %v1759_v39 = vmul.f32 1.442695, %v1695_v51  ;;  %v1761_v56 = vmul.f32 1.442695, %v1696_v32 }
 0x83a   : > { %v4804_v20 = vpop.eup %2995  ;;  %v2013_v24 = vpack.c.bf16 %v2994_v6, %v2990_v58 }
 0x83b   : > { %5201 = vst [vmem:[#allocation27_spill] sm:$0xff] %v4804_v20  ;;  %2997 = vpow2.f32 %v1759_v39  ;;  %v4807_v57 = vadd.f32 %v4804_v20, %v2994_v6 }
 0x83c   : > { %2999 = vpow2.f32 %v1761_v56  ;;  %2098 = vmatmul.bf16.gmra.mxu2 %v2013_v24 }
 0x83e   : > { %v1604_v61 = vpop.xlane.xlu2 %1603 }
 0x83f   : > { %v1697_v54 = vsub.f32 %v4613_v26, %v1604_v61  ;;  %v1698_v37 = vsub.f32 %v4631_v2, %v1604_v61 }
 0x841   : > { %v2998_v46 = vpop.eup %2997  ;;  %v1763_v30 = vmul.f32 1.442695, %v1697_v54  ;;  %v1765_v51 = vmul.f32 1.442695, %v1698_v37  ;;  %v1662_v54 = vmax.f32 %v4815_v1, %v4725_v11  ;;  %v2859_v37 = vld [vmem:[#allocation8 + $0x10] sm:$0xff] }
 0x842   : > { %v3000_v32 = vpop.eup %2999  ;;  %2362 = vmatpush.bf16.msrb.mxu0 %v2859_v37  ;;  %v1619_v37 = vpop.xlane.xlu1 %1618 }
 0x843   : > { %3001 = vpow2.f32 %v1763_v30  ;;  %v1887_v58 = vadd.f32 %v3000_v32, %v2998_v46 }
 0x844   : > { %3003 = vpow2.f32 %v1765_v51 }
 0x845   : > { %1888 = vadd.xlane.f32.xlu1 %v1887_v58 }
 0x846   : > { %v1607_v6 = vpop.xlane.xlu2 %1606 }
 0x847   : > { %v1699_v39 = vsub.f32 %v4619_v22, %v1607_v6  ;;  %v1700_v44 = vsub.f32 %v4637_v60, %v1607_v6 }
 0x849   : > { %v3002_v56 = vpop.eup %3001  ;;  %v1767_v24 = vmul.f32 1.442695, %v1699_v39  ;;  %v1769_v15 = vmul.f32 1.442695, %v1700_v44 }
 0x84a   : > { %v3004_v20 = vpop.eup %3003  ;;  %v1983_v26 = vpack.c.bf16 %v3002_v56, %v2998_v46 }
 0x84b   : > { %v1984_v2 = vpack.c.bf16 %v3004_v20, %v3000_v32  ;;  %3005 = vpow2.f32 %v1767_v24  ;;  %v1890_v61 = vadd.f32 %v3004_v20, %v3002_v56  ;;  %v1665_v20 = vmax.f32 %v4584_v10, %v4727_v0 }
 0x84c   : > { %3007 = vpow2.f32 %v1769_v15  ;;  %2023 = vmatmul.bf16.vlgmr.msra.gmra.mxu1 %v1983_v26 }
 0x84d   : > { %2112 = vmatmul.bf16.vlgmr.msrb.gmra.mxu2 %v1984_v2  ;;  %1891 = vadd.xlane.f32.xlu0 %v1890_v61  ;;  %v1668_v61 = vmax.f32 %v4588_v12, %v4729_v47 }
 0x84e   : > { %1663 = vmax.xlane.f32.xlu1 %v1662_v54  ;;  %v1610_v22 = vpop.xlane.xlu2 %1609 }
 0x84f   : > { %v1701_v60 = vsub.f32 %v4623_v13, %v1610_v22  ;;  %v1702_v44 = vsub.f32 %v4641_v49, %v1610_v22 }
 0x851   : > { %v3006_v46 = vpop.eup %3005  ;;  %v1771_v30 = vmul.f32 1.442695, %v1701_v60  ;;  %v1773_v51 = vmul.f32 1.442695, %v1702_v44  ;;  %v1707_v44 = vsub.f32 %v4639_v43, %v1619_v37 }
 0x852   : > { %v3008_v32 = vpop.eup %3007 }
 0x853   : > { %3009 = vpow2.f32 %v1771_v30  ;;  %v1893_v15 = vadd.f32 %v3008_v32, %v3006_v46 }
 0x854   : > { %3011 = vpow2.f32 %v1773_v51 }
 0x855   : > { %1894 = vadd.xlane.f32.xlu0 %v1893_v15  ;;  %v1671_v15 = vmax.f32 %v4593_v59, %v4731_v36 }
 0x856   : > { %1666 = vmax.xlane.f32.xlu1 %v1665_v20  ;;  %v1613_v58 = vpop.xlane.xlu2 %1612 }
 0x857   : > { %v1703_v6 = vsub.f32 %v4629_v7, %v1613_v58  ;;  %v1704_v39 = vsub.f32 %v4645_v21, %v1613_v58  ;;  %v1783_v58 = vmul.f32 1.442695, %v1707_v44 }
 0x859   : > { %v3010_v13 = vpop.eup %3009  ;;  %v1775_v56 = vmul.f32 1.442695, %v1703_v6  ;;  %v1777_v49 = vmul.f32 1.442695, %v1704_v39 }
 0x85a   : > { %v3012_v24 = vpop.eup %3011  ;;  %v1985_v26 = vpack.c.bf16 %v3010_v13, %v3006_v46 }
 0x85b   : > { %3013 = vpow2.f32 %v1775_v56  ;;  %v1986_v2 = vpack.c.bf16 %v3012_v24, %v3008_v32  ;;  %v1896_v54 = vadd.f32 %v3012_v24, %v3010_v13  ;;  %v1708_v32 = vsub.f32 %v4655_v16, %v1619_v37 }
 0x85c   : > { %3015 = vpow2.f32 %v1777_v49  ;;  %2028 = vmatmul.bf16.gmra.mxu1 %v1985_v26 }
 0x85d   : > { %2117 = vmatmul.bf16.gmra.mxu2 %v1986_v2  ;;  %1669 = vmax.xlane.f32.xlu0 %v1668_v61  ;;  %v1785_v6 = vmul.f32 1.442695, %v1708_v32 }
 0x85e   : > { %1897 = vadd.xlane.f32.xlu2 %v1896_v54  ;;  %v1616_v7 = vpop.xlane.xlu2 %1615 }
 0x85f   : > { %v1705_v21 = vsub.f32 %v4635_v31, %v1616_v7  ;;  %v1706_v22 = vsub.f32 %v4649_v48, %v1616_v7  ;;  %v1628_v31 = vpop.xlane.xlu0 %1627 }
 0x860   : > { %v1713_v16 = vsub.f32 %v4659_v42, %v1628_v31  ;;  %v1714_v26 = vsub.f32 %v4669_v53, %v1628_v31 }
 0x861   : > { %v3014_v60 = vpop.eup %3013  ;;  %v1779_v46 = vmul.f32 1.442695, %v1705_v21  ;;  %v1781_v30 = vmul.f32 1.442695, %v1706_v22 }
 0x862   : > { %v3016_v51 = vpop.eup %3015  ;;  %v1797_v37 = vmul.f32 1.442695, %v1714_v26 }
 0x863   : > { %3017 = vpow2.f32 %v1779_v46  ;;  %v1899_v20 = vadd.f32 %v3016_v51, %v3014_v60 }
 0x864   : > { %3019 = vpow2.f32 %v1781_v30 }
 0x865   : > { %1672 = vmax.xlane.f32.xlu0 %v1671_v15  ;;  %3021 = vpow2.f32 %v1783_v58  ;;  %v1677_v15 = vmax.f32 %v4599_v52, %v4735_v8 }
 0x866   : > { %1900 = vadd.xlane.f32.xlu2 %v1899_v20  ;;  %v1622_v48 = vpop.xlane.xlu2 %1621  ;;  %3023 = vpow2.f32 %v1785_v6  ;;  %v1640_v20 = vpop.xlane.xlu1 %1639 }
 0x867   : > { %v1709_v39 = vsub.f32 %v4647_v62, %v1622_v48  ;;  %v1710_v43 = vsub.f32 %v4661_v41, %v1622_v48  ;;  %v1674_v62 = vmax.f32 %v4595_v38, %v4733_v9  ;;  %v1795_v41 = vmul.f32 1.442695, %v1713_v16 }
 0x869   : > { %v3018_v13 = vpop.eup %3017  ;;  %v1787_v56 = vmul.f32 1.442695, %v1709_v39  ;;  %v1789_v49 = vmul.f32 1.442695, %v1710_v43  ;;  %v1721_v39 = vsub.f32 %v4685_v27, %v1640_v20 }
 0x86a   : > { %v3020_v24 = vpop.eup %3019  ;;  %v1987_v2 = vpack.c.bf16 %v3018_v13, %v3014_v60 }
 0x86b   : > { %v1988_v61 = vpack.c.bf16 %v3020_v24, %v3016_v51  ;;  %3025 = vpow2.f32 %v1787_v56  ;;  %v1902_v54 = vadd.f32 %v3020_v24, %v3018_v13  ;;  %v3022_v7 = vpop.eup %3021  ;;  %v1722_v56 = vsub.f32 %v4691_v45, %v1640_v20 }
 0x86c   : > { %3027 = vpow2.f32 %v1789_v49  ;;  %2033 = vmatmul.bf16.gmra.mxu1 %v1987_v2  ;;  %v3024_v22 = vpop.eup %3023 }
 0x86d   : > { %2122 = vmatmul.bf16.vlgmr.msra.gmra.mxu3 %v1988_v61  ;;  %1903 = vadd.xlane.f32.xlu1 %v1902_v54  ;;  %3029 = vpow2.f32 %v1795_v41  ;;  %v1905_v32 = vadd.f32 %v3024_v22, %v3022_v7  ;;  %v1811_v54 = vmul.f32 1.442695, %v1721_v39  ;;  %v1813_v27 = vmul.f32 1.442695, %v1722_v56  ;;  %v5203_v41 = vld [vmem:[#allocation16_spill] sm:$0xff] }
 0x86e   : > { %1675 = vmax.xlane.f32.xlu2 %v1674_v62  ;;  %v1625_v42 = vpop.xlane.xlu2 %1624  ;;  %3031 = vpow2.f32 %v1797_v37  ;;  %v5204_v37 = vld [vmem:[#allocation17_spill] sm:$0xff]  ;;  %v5207_v56 = vld [vmem:[#allocation20_spill] sm:$0xff] }
 0x86f   : > { %v1711_v21 = vsub.f32 %v4651_v23, %v1625_v42  ;;  %v1712_v53 = vsub.f32 %v4667_v40, %v1625_v42 }
 0x871   : > { %v3026_v60 = vpop.eup %3025  ;;  %v1791_v44 = vmul.f32 1.442695, %v1711_v21  ;;  %v1793_v46 = vmul.f32 1.442695, %v1712_v53 }
 0x872   : > { %v3028_v30 = vpop.eup %3027  ;;  %v1989_v49 = vpack.c.bf16 %v3026_v60, %v3022_v7 }
 0x873   : > { %3033 = vpow2.f32 %v1791_v44  ;;  %v1908_v51 = vadd.f32 %v3028_v30, %v3026_v60  ;;  %v3030_v40 = vpop.eup %3029  ;;  %v1990_v24 = vpack.c.bf16 %v3028_v30, %v3024_v22  ;;  %v1646_v44 = vpop.xlane.xlu1 %1645 }
 0x874   : > { %3035 = vpow2.f32 %v1793_v46  ;;  %v3032_v31 = vpop.eup %3031 }
 0x875   : > { %1909 = vadd.xlane.f32.xlu0 %v1908_v51  ;;  %1906 = vadd.xlane.f32.xlu1 %v1905_v32  ;;  %v1914_v2 = vadd.f32 %v3032_v31, %v3030_v40  ;;  %v5205_v32 = vld [vmem:[#allocation18_spill] sm:$0xff] }
 0x876   : > { %1678 = vmax.xlane.f32.xlu2 %v1677_v15  ;;  %v1631_v23 = vpop.xlane.xlu2 %1630 }
 0x877   : > { %v1715_v58 = vsub.f32 %v4665_v34, %v1631_v23  ;;  %v1716_v6 = vsub.f32 %v4677_v5, %v1631_v23  ;;  %v5202_v34 = vld [vmem:[#allocation15_spill] sm:$0xff]  ;;  %v2858_v5 = vld [vmem:[#allocation8 + $0x8] sm:$0xff] }
 0x878   : > { %v1680_v61 = vmax.f32 %v5202_v34, %v4737_v50  ;;  %2363 = vmatpush.bf16.msrb.mxu0 %v2858_v5 }
 0x879   : > { %v3034_v48 = vpop.eup %3033  ;;  %v1799_v43 = vmul.f32 1.442695, %v1715_v58  ;;  %v1801_v13 = vmul.f32 1.442695, %v1716_v6  ;;  %v5206_v58 = vld [vmem:[#allocation19_spill] sm:$0xff] }
 0x87a   : > { %v3036_v16 = vpop.eup %3035  ;;  %v1725_v6 = vsub.f32 %v5206_v58, %v1646_v44 }
 0x87b   : > { %3037 = vpow2.f32 %v1799_v43  ;;  %v1911_v26 = vadd.f32 %v3036_v16, %v3034_v48 }
 0x87c   : > { %3039 = vpow2.f32 %v1801_v13  ;;  %2038 = vmatmul.bf16.gmra.mxu1 %v1989_v49  ;;  %v1726_v49 = vsub.f32 %v5207_v56, %v1646_v44  ;;  %v1819_v5 = vmul.f32 1.442695, %v1725_v6 }
 0x87d   : > { %2127 = vmatmul.bf16.gmra.mxu3 %v1990_v24  ;;  %1912 = vadd.xlane.f32.xlu0 %v1911_v26  ;;  %3041 = vpow2.f32 %v1811_v54  ;;  %v1991_v24 = vpack.c.bf16 %v3030_v40, %v3034_v48  ;;  %v1992_v26 = vpack.c.bf16 %v3032_v31, %v3036_v16  ;;  %v5209_v48 = vld [vmem:[#allocation22_spill] sm:$0xff] }
 0x87e   : > { %1915 = vadd.xlane.f32.xlu2 %v1914_v2  ;;  %1681 = vmax.xlane.f32.xlu1 %v1680_v61  ;;  %v1634_v62 = vpop.xlane.xlu2 %1633  ;;  %3043 = vpow2.f32 %v1813_v27  ;;  %v1652_v61 = vpop.xlane.xlu1 %1651  ;;  %v1821_v54 = vmul.f32 1.442695, %v1726_v49 }
 0x87f   : > { %v1717_v45 = vsub.f32 %v5203_v41, %v1634_v62  ;;  %v1718_v42 = vsub.f32 %v5204_v37, %v1634_v62  ;;  %v1655_v27 = vpop.xlane.xlu0 %1654  ;;  %v5208_v41 = vld [vmem:[#allocation21_spill] sm:$0xff]  ;;  %v1730_v16 = vsub.f32 %v5209_v48, %v1652_v61 }
 0x881   : > { %v4851_v7 = vpop.eup %3037  ;;  %v1803_v21 = vmul.f32 1.442695, %v1717_v45  ;;  %v1805_v53 = vmul.f32 1.442695, %v1718_v42  ;;  %v1729_v45 = vsub.f32 %v5208_v41, %v1652_v61  ;;  %v5210_v42 = vld [vmem:[#allocation23_spill] sm:$0xff] }
 0x882   : > { %v4853_v22 = vpop.eup %3039 }
 0x883   : > { %3045 = vpow2.f32 %v1803_v21  ;;  %v1917_v60 = vadd.f32 %v4853_v22, %v4851_v7  ;;  %v4857_v30 = vpop.eup %3041  ;;  %v1731_v21 = vsub.f32 %v5210_v42, %v1655_v27 }
 0x884   : > { %3047 = vpow2.f32 %v1805_v53  ;;  %v4861_v20 = vpop.eup %3043 }
 0x886   : > { %1918 = vadd.xlane.f32.xlu1 %v1917_v60  ;;  %v1637_v46 = vpop.xlane.xlu2 %1636 }
 0x887   : > { %v1719_v51 = vsub.f32 %v4679_v35, %v1637_v46  ;;  %v1720_v15 = vsub.f32 %v5205_v32, %v1637_v46  ;;  %v1926_v35 = vadd.f32 %v4861_v20, %v4857_v30  ;;  %v5211_v46 = vld [vmem:[#allocation24_spill] sm:$0xff]  ;;  %v1827_v32 = vmul.f32 1.442695, %v1729_v45 }
 0x889   : > { %v3046_v23 = vpop.eup %3045  ;;  %v1807_v39 = vmul.f32 1.442695, %v1719_v51  ;;  %v1809_v43 = vmul.f32 1.442695, %v1720_v15  ;;  %v1732_v51 = vsub.f32 %v5211_v46, %v1655_v27  ;;  %v1831_v15 = vmul.f32 1.442695, %v1731_v21 }
 0x88a   : > { %v3048_v13 = vpop.eup %3047 }
 0x88b   : > { %3049 = vpow2.f32 %v1807_v39  ;;  %v1920_v2 = vadd.f32 %v3048_v13, %v3046_v23  ;;  %v1833_v58 = vmul.f32 1.442695, %v1732_v51 }
 0x88c   : > { %3051 = vpow2.f32 %v1809_v43  ;;  %2043 = vmatmul.bf16.gmra.mxu1 %v1991_v24 }
 0x88d   : > { %2132 = vmatmul.bf16.gmra.mxu3 %v1992_v26  ;;  %1921 = vadd.xlane.f32.xlu0 %v1920_v2  ;;  %3053 = vpow2.f32 %v1819_v5  ;;  %v1994_v5 = vpack.c.bf16 %v3048_v13, %v4853_v22 }
 0x88e   : > { %1927 = vadd.xlane.f32.xlu1 %v1926_v35  ;;  %v1643_v62 = vpop.xlane.xlu2 %1642  ;;  %3055 = vpow2.f32 %v1821_v54  ;;  %v1993_v35 = vpack.c.bf16 %v3046_v23, %v4851_v7 }
 0x88f   : > { %v1723_v40 = vsub.f32 %v4689_v63, %v1643_v62  ;;  %v1724_v31 = vsub.f32 %v4697_v55, %v1643_v62  ;;  %v1829_v55 = vmul.f32 1.442695, %v1730_v16 }
 0x891   : > { %v4871_v37 = vpop.eup %3049  ;;  %v1815_v53 = vmul.f32 1.442695, %v1723_v40  ;;  %v1817_v60 = vmul.f32 1.442695, %v1724_v31 }
 0x892   : > { %v4874_v44 = vpop.eup %3051 }
 0x893   : > { %3057 = vpow2.f32 %v1815_v53  ;;  %v1923_v63 = vadd.f32 %v4874_v44, %v4871_v37  ;;  %v4879_v39 = vpop.eup %3053  ;;  %v2857_v53 = vld [vmem:[#allocation8] sm:$0xff] }
 0x894   : > { %3059 = vpow2.f32 %v1817_v60  ;;  %v4883_v49 = vpop.eup %3055  ;;  %2364 = vmatpush.bf16.msrb.mxu0 %v2857_v53 }
 0x895   : > { %1924 = vadd.xlane.f32.xlu2 %v1923_v63  ;;  %3061 = vpow2.f32 %v1827_v32  ;;  %v1995_v63 = vpack.c.bf16 %v4857_v30, %v4871_v37 }
 0x896   : > { %v1649_v6 = vpop.xlane.xlu2 %1648  ;;  %3063 = vpow2.f32 %v1829_v55  ;;  %v1996_v55 = vpack.c.bf16 %v4861_v20, %v4874_v44 }
 0x897   : > { %v1727_v43 = vsub.f32 %v4705_v19, %v1649_v6  ;;  %v1728_v56 = vsub.f32 %v4707_v28, %v1649_v6  ;;  %3065 = vpow2.f32 %v1831_v15  ;;  %v1932_v19 = vadd.f32 %v4883_v49, %v4879_v39 }
 0x898   : > { %3067 = vpow2.f32 %v1833_v58 }
 0x899   : > { %v3058_v24 = vpop.eup %3057  ;;  %v1823_v26 = vmul.f32 1.442695, %v1727_v43  ;;  %v1825_v2 = vmul.f32 1.442695, %v1728_v56 }
 0x89a   : > { %v3060_v61 = vpop.eup %3059  ;;  %v1997_v44 = vpack.c.bf16 %v4879_v39, %v3058_v24 }
 0x89b   : > { %3069 = vpow2.f32 %v1823_v26  ;;  %v1929_v54 = vadd.f32 %v3060_v61, %v3058_v24  ;;  %v4889_v28 = vpop.eup %3061  ;;  %v1998_v6 = vpack.c.bf16 %v4883_v49, %v3060_v61 }
 0x89c   : > { %3071 = vpow2.f32 %v1825_v2  ;;  %2048 = vmatmul.bf16.gmra.mxu1 %v1993_v35  ;;  %v4891_v27 = vpop.eup %3063 }
 0x89d   : > { %2137 = vmatmul.bf16.gmra.mxu3 %v1994_v5  ;;  %1930 = vadd.xlane.f32.xlu0 %v1929_v54  ;;  %v4893_v41 = vpop.eup %3065  ;;  %v1938_v48 = vadd.f32 %v4891_v27, %v4889_v28 }
 0x89e   : > { %1933 = vadd.xlane.f32.xlu2 %v1932_v19  ;;  %v1658_v62 = vpop.xlane.xlu2 %1657  ;;  %v4897_v23 = vpop.eup %3067 }
 0x89f   : > { %v1733_v7 = vsub.f32 %v4779_v18, %v1658_v62  ;;  %v1734_v22 = vsub.f32 %v4721_v29, %v1658_v62  ;;  %v1941_v42 = vadd.f32 %v4897_v23, %v4893_v41 }
 0x8a1   : > { %v3070_v13 = vpop.eup %3069  ;;  %v1835_v45 = vmul.f32 1.442695, %v1733_v7  ;;  %v1837_v40 = vmul.f32 1.442695, %v1734_v22 }
 0x8a2   : > { %v3072_v31 = vpop.eup %3071  ;;  %v1999_v7 = vpack.c.bf16 %v4889_v28, %v3070_v13 }
 0x8a3   : > { %3073 = vpow2.f32 %v1835_v45  ;;  %v1935_v16 = vadd.f32 %v3072_v31, %v3070_v13 }
 0x8a4   : > { %3075 = vpow2.f32 %v1837_v40 }
 0x8a5   : > { %1939 = vadd.xlane.f32.xlu0 %v1938_v48  ;;  %1936 = vadd.xlane.f32.xlu1 %v1935_v16 }
 0x8a6   : > { %1942 = vadd.xlane.f32.xlu2 %v1941_v42  ;;  %v1661_v18 = vpop.xlane.xlu2 %1660 }
 0x8a7   : > { %v1735_v29 = vsub.f32 %v4793_v3, %v1661_v18  ;;  %v1736_v21 = vsub.f32 %v4723_v14, %v1661_v18 }
 0x8a9   : > { %v4905_v60 = vpop.eup %3073  ;;  %v1839_v46 = vmul.f32 1.442695, %v1735_v29  ;;  %v1841_v51 = vmul.f32 1.442695, %v1736_v21 }
 0x8aa   : > { %v4907_v32 = vpop.eup %3075 }
 0x8ab   : > { %3077 = vpow2.f32 %v1839_v46  ;;  %v1944_v3 = vadd.f32 %v4907_v32, %v4905_v60 }
 0x8ac   : > { %3079 = vpow2.f32 %v1841_v51  ;;  %2053 = vmatmul.bf16.gmra.mxu1 %v1995_v63 }
 0x8ad   : > { %2142 = vmatmul.bf16.gmra.mxu3 %v1996_v55  ;;  %1945 = vadd.xlane.f32.xlu1 %v1944_v3 }
 0x8af   : > { %v4915_v14 = vpop.f32.mrf.mxu2 }
 0x8b1   : > { %v4917_v15 = vpop.eup %3077 }
 0x8b2   : > { %v4919_v58 = vpop.eup %3079 }
 0x8b3   : > { %v1947_v30 = vadd.f32 %v4919_v58, %v4917_v15 }
 0x8b5   : > { %1948 = vadd.xlane.f32.xlu0 %v1947_v30 }
 0x8b7   : > { %v4923_v37 = vpop.f32.mrf.mxu2 }
 0x8b8   : > { %v1889_v20 = vpop.xlane.xlu1 %1888 }
 0x8bc   : > { %2058 = vmatmul.bf16.gmra.mxu1 %v1997_v44  ;;  %v2001_v44 = vpack.c.bf16 %v4905_v60, %v4893_v41 }
 0x8bd   : > { %2147 = vmatmul.bf16.gmra.mxu3 %v1998_v6  ;;  %v2002_v6 = vpack.c.bf16 %v4907_v32, %v4897_v23 }
 0x8bf   : > { %v4927_v43 = vpop.f32.mrf.mxu2 }
 0x8c0   : > { %v1892_v56 = vpop.xlane.xlu0 %1891 }
 0x8c1   : > { %v1664_v26 = vpop.xlane.xlu1 %1663 }
 0x8c2   : > { %v1737_v2 = vsub.f32 %v4815_v1, %v1664_v26  ;;  %v1738_v35 = vsub.f32 %v4725_v11, %v1664_v26  ;;  %v2000_v1 = vpack.c.bf16 %v4891_v27, %v3072_v31 }
 0x8c4   : > { %v1843_v5 = vmul.f32 1.442695, %v1737_v2  ;;  %v1845_v54 = vmul.f32 1.442695, %v1738_v35 }
 0x8c6   : > { %3081 = vpow2.f32 %v1843_v5 }
 0x8c7   : > { %3083 = vpow2.f32 %v1845_v54  ;;  %v4931_v19 = vpop.f32.mrf.mxu2 }
 0x8c8   : > { %v4933_v62 = vpop.xlane.xlu0 %1894 }
 0x8c9   : > { %v1667_v39 = vpop.xlane.xlu1 %1666  ;;  %v2024_v49 = vpop.f32.mrf.mxu1 }
 0x8ca   : > { %v1739_v24 = vsub.f32 %v4584_v10, %v1667_v39  ;;  %v1740_v61 = vsub.f32 %v4727_v0, %v1667_v39 }
 0x8cc   : > { %v4939_v22 = vpop.eup %3081  ;;  %v1847_v11 = vmul.f32 1.442695, %v1739_v24  ;;  %v1849_v45 = vmul.f32 1.442695, %v1740_v61  ;;  %2063 = vmatmul.bf16.gmra.mxu1 %v1999_v7 }
 0x8cd   : > { %v4941_v40 = vpop.eup %3083  ;;  %2152 = vmatmul.bf16.gmra.mxu3 %v2000_v1 }
 0x8ce   : > { %3085 = vpow2.f32 %v1847_v11  ;;  %v1950_v48 = vadd.f32 %v4941_v40, %v4939_v22 }
 0x8cf   : > { %3087 = vpow2.f32 %v1849_v45 }
 0x8d0   : > { %1951 = vadd.xlane.f32.xlu2 %v1950_v48  ;;  %v2113_v10 = vpop.f32.mrf.mxu2  ;;  %v1670_v0 = vpop.xlane.xlu0 %1669  ;;  %3089 = vrcp.f32 %v1889_v20 }
 0x8d1   : > { %v1741_v28 = vsub.f32 %v4588_v12, %v1670_v0  ;;  %v1742_v27 = vsub.f32 %v4729_v47, %v1670_v0  ;;  %v1898_v13 = vpop.xlane.xlu2 %1897  ;;  %v2026_v31 = vpop.f32.mrf.mxu1  ;;  %3091 = vrcp.f32 %v1892_v56  ;;  %v2114_v53 = vadd.f32 %v2113_v10, %v2024_v49 }
 0x8d3   : > { %v1851_v16 = vmul.f32 1.442695, %v1741_v28  ;;  %v1853_v42 = vmul.f32 1.442695, %v1742_v27 }
 0x8d4   : > { %v4947_v18 = vpop.eup %3085 }
 0x8d5   : > { %v4949_v29 = vpop.eup %3087  ;;  %3093 = vpow2.f32 %v1851_v16 }
 0x8d6   : > { %3095 = vpow2.f32 %v1853_v42  ;;  %v1953_v21 = vadd.f32 %v4949_v29, %v4947_v18  ;;  %v3090_v47 = vpop.eup %3089 }
 0x8d7   : > { %v3092_v20 = vpop.eup %3091  ;;  %v2225_v26 = vmul.f32 %v3090_v47, %v2114_v53 }
 0x8d8   : > { %1954 = vadd.xlane.f32.xlu1 %v1953_v21  ;;  %v2115_v12 = vpop.f32.mrf.mxu2  ;;  %v1673_v46 = vpop.xlane.xlu0 %1672  ;;  %v2004_v21 = vpack.c.bf16 %v4941_v40, %v4919_v58 }
 0x8d9   : > { %v2116_v51 = vadd.f32 %v2115_v12, %v2026_v31  ;;  %v1743_v63 = vsub.f32 %v4593_v59, %v1673_v46  ;;  %v1744_v55 = vsub.f32 %v4731_v36, %v1673_v46  ;;  %v4955_v3 = vpop.xlane.xlu2 %1900  ;;  %v2029_v30 = vpop.f32.mrf.mxu1  ;;  %v2003_v31 = vpack.c.bf16 %v4939_v22, %v4917_v15 }
 0x8db   : > { %v4961_v56 = vpop.eup %3093  ;;  %v2226_v2 = vmul.f32 %v3092_v20, %v2116_v51  ;;  %v1855_v35 = vmul.f32 1.442695, %v1743_v63  ;;  %v1857_v5 = vmul.f32 1.442695, %v1744_v55 }
 0x8dc   : > { %v4963_v54 = vpop.eup %3095  ;;  %2068 = vmatmul.bf16.gmra.mxu1 %v2001_v44 }
 0x8dd   : > { %v2257_v59 = vpack.c.bf16 %v2226_v2, %v2225_v26  ;;  %3097 = vpow2.f32 %v1855_v35  ;;  %2157 = vmatmul.bf16.gmra.mxu3 %v2002_v6  ;;  %v1956_v36 = vadd.f32 %v4963_v54, %v4961_v56  ;;  %v2005_v35 = vpack.c.bf16 %v4961_v56, %v4947_v18 }
 0x8de   : > { %3099 = vpow2.f32 %v1857_v5 }
 0x8df   : > { %1957 = vadd.xlane.f32.xlu0 %v1956_v36  ;;  %2827 = vmatmul.msk.bf16.vlgmr.msrb.gmra.mxu0 %vm514_vm0, %v2257_v59  ;;  %3101 = vrcp.f32 %v4933_v62  ;;  %v2006_v36 = vpack.c.bf16 %v4963_v54, %v4949_v29 }
 0x8e0   : > { %v2118_v41 = vpop.f32.mrf.mxu2  ;;  %v1904_v23 = vpop.xlane.xlu1 %1903  ;;  %3103 = vrcp.f32 %v1898_v13 }
 0x8e1   : > { %v1676_v60 = vpop.xlane.xlu2 %1675  ;;  %v2031_v32 = vpop.f32.mrf.mxu1  ;;  %v2119_v45 = vadd.f32 %v2118_v41, %v2029_v30 }
 0x8e2   : > { %v1745_v39 = vsub.f32 %v4595_v38, %v1676_v60  ;;  %v1746_v49 = vsub.f32 %v4733_v9, %v1676_v60 }
 0x8e3   : > { %v4970_v24 = vpop.eup %3097 }
 0x8e4   : > { %v4973_v61 = vpop.eup %3099  ;;  %v1859_v7 = vmul.f32 1.442695, %v1745_v39  ;;  %v1861_v1 = vmul.f32 1.442695, %v1746_v49 }
 0x8e5   : > { %v1959_v11 = vadd.f32 %v4973_v61, %v4970_v24  ;;  %v3102_v38 = vpop.eup %3101 }
 0x8e6   : > { %3105 = vpow2.f32 %v1859_v7  ;;  %v3104_v28 = vpop.eup %3103  ;;  %v2227_v16 = vmul.f32 %v3102_v38, %v2119_v45 }
 0x8e7   : > { %3107 = vpow2.f32 %v1861_v1  ;;  %1960 = vadd.xlane.f32.xlu2 %v1959_v11 }
 0x8e8   : > { %v2120_v48 = vpop.f32.mrf.mxu2  ;;  %v1907_v0 = vpop.xlane.xlu1 %1906 }
 0x8e9   : > { %v2121_v10 = vadd.f32 %v2120_v48, %v2031_v32  ;;  %v1679_v9 = vpop.xlane.xlu2 %1678  ;;  %v2034_v13 = vpop.f32.mrf.mxu1 }
 0x8ea   : > { %v1747_v62 = vsub.f32 %v4599_v52, %v1679_v9  ;;  %v1748_v27 = vsub.f32 %v4735_v8, %v1679_v9 }
 0x8eb   : > { %v2228_v42 = vmul.f32 %v3104_v28, %v2121_v10 }
 0x8ec   : > { %v4983_v53 = vpop.eup %3105  ;;  %v1863_v12 = vmul.f32 1.442695, %v1747_v62  ;;  %v1865_v46 = vmul.f32 1.442695, %v1748_v27  ;;  %2073 = vmatmul.bf16.gmra.mxu1 %v2003_v31 }
 0x8ed   : > { %v3108_v47 = vpop.eup %3107  ;;  %v2258_v51 = vpack.c.bf16 %v2228_v42, %v2227_v16  ;;  %2162 = vmatmul.bf16.gmra.mxu3 %v2004_v21  ;;  %v2007_v11 = vpack.c.bf16 %v4983_v53, %v4970_v24 }
 0x8ee   : > { %3109 = vpow2.f32 %v1863_v12  ;;  %v1962_v52 = vadd.f32 %v3108_v47, %v4983_v53 }
 0x8ef   : > { %3111 = vpow2.f32 %v1865_v46  ;;  %2828 = vmatmul.msk.bf16.gmra.mxu0 %vm514_vm0, %v2258_v51 }
 0x8f0   : > { %1963 = vadd.xlane.f32.xlu1 %v1962_v52  ;;  %v2123_v8 = vpop.f32.mrf.mxu3  ;;  %3113 = vrcp.f32 %v4955_v3 }
 0x8f1   : > { %v1682_v15 = vpop.xlane.xlu1 %1681  ;;  %v2036_v40 = vpop.f32.mrf.mxu1  ;;  %3115 = vrcp.f32 %v1904_v23  ;;  %v2124_v6 = vadd.f32 %v2123_v8, %v2034_v13 }
 0x8f2   : > { %v1749_v22 = vsub.f32 %v5202_v34, %v1682_v15  ;;  %v1750_v58 = vsub.f32 %v4737_v50, %v1682_v15  ;;  %v1916_v9 = vpop.xlane.xlu2 %1915 }
 0x8f4   : > { %v4990_v63 = vpop.eup %3109  ;;  %v1867_v55 = vmul.f32 1.442695, %v1749_v22  ;;  %v1869_v30 = vmul.f32 1.442695, %v1750_v58 }
 0x8f5   : > { %v4992_v20 = vpop.eup %3111 }
 0x8f6   : > { %3117 = vpow2.f32 %v1867_v55  ;;  %v1965_v44 = vadd.f32 %v4992_v20, %v4990_v63  ;;  %v3114_v34 = vpop.eup %3113 }
 0x8f7   : > { %3119 = vpow2.f32 %v1869_v30  ;;  %v3116_v3 = vpop.eup %3115  ;;  %v2229_v5 = vmul.f32 %v3114_v34, %v2124_v6  ;;  %v5212_v30 = vld [vmem:[#allocation25_spill] sm:$0xff] }
 0x8f8   : > { %1966 = vadd.xlane.f32.xlu0 %v1965_v44  ;;  %1972 = vadd.xlane.f32.xlu1 %v4777_v25  ;;  %v2125_v50 = vpop.f32.mrf.mxu3  ;;  %v1910_v25 = vpop.xlane.xlu0 %1909 }
 0x8f9   : > { %v2126_v26 = vadd.f32 %v2125_v50, %v2036_v40  ;;  %v2039_v2 = vpop.f32.mrf.mxu1  ;;  %3121 = vrcp.f32 %v1910_v25  ;;  %v1919_v53 = vpop.xlane.xlu1 %1918 }
 0x8fa   : > { %3123 = vrcp.f32 %v1907_v0 }
 0x8fb   : > { %v2230_v59 = vmul.f32 %v3116_v3, %v2126_v26 }
 0x8fc   : > { %v3118_v41 = vpop.eup %3117  ;;  %2078 = vmatmul.bf16.gmra.mxu1 %v2005_v35 }
 0x8fd   : > { %v3120_v23 = vpop.eup %3119  ;;  %v2259_v60 = vpack.c.bf16 %v2230_v59, %v2229_v5  ;;  %2167 = vmatmul.bf16.gmra.mxu3 %v2006_v36  ;;  %v2009_v31 = vpack.c.bf16 %v3118_v41, %v4990_v63 }
 0x8fe   : > { %v1968_v32 = vadd.f32 %v3120_v23, %v3118_v41  ;;  %v2010_v42 = vpack.c.bf16 %v3120_v23, %v4992_v20  ;;  %v5213_v20 = vpack.c.bf16 %v4784_v33, %v5212_v30  ;;  %v5215_v33 = vld [vmem:[#allocation26_spill] sm:$0xff] }
 0x8ff   : > { %2829 = vmatmul.msk.bf16.gmra.mxu0 %vm514_vm0, %v2259_v60  ;;  %v3122_v54 = vpop.eup %3121  ;;  %v5214_v60 = vld [vmem:[#allocation27_spill] sm:$0xff] }
 0x900   : > { %1975 = vadd.xlane.f32.xlu0 %v4787_v4  ;;  %1981 = vadd.xlane.f32.xlu1 %v4807_v57  ;;  %v2128_v39 = vpop.f32.mrf.mxu3  ;;  %v3124_v7 = vpop.eup %3123  ;;  %v2008_v57 = vpack.c.bf16 %v3108_v47, %v4973_v61 }
 0x901   : > { %1969 = vadd.xlane.f32.xlu2 %v1968_v32  ;;  %v2041_v18 = vpop.f32.mrf.mxu1  ;;  %v2129_v56 = vadd.f32 %v2128_v39, %v2039_v2  ;;  %v1913_v38 = vpop.xlane.xlu0 %1912  ;;  %v5216_v32 = vpack.c.bf16 %v5214_v60, %v5215_v33 }
 0x902   : > { %3125 = vrcp.f32 %v1913_v38  ;;  %v1928_v44 = vpop.xlane.xlu1 %1927 }
 0x903   : > { %v2231_v45 = vmul.f32 %v3124_v7, %v2129_v56  ;;  %3127 = vrcp.f32 %v1916_v9 }
 0x904   : > { %3129 = vrcp.f32 %v1919_v53 }
 0x908   : > { %v2130_v29 = vpop.f32.mrf.mxu3  ;;  %v3126_v62 = vpop.eup %3125 }
 0x909   : > { %1978 = vadd.xlane.f32.xlu2 %v4800_v17  ;;  %v2131_v49 = vadd.f32 %v2130_v29, %v2041_v18  ;;  %v2044_v1 = vpop.f32.mrf.mxu1  ;;  %v3128_v24 = vpop.eup %3127 }
 0x90a   : > { %v1922_v46 = vpop.xlane.xlu0 %1921  ;;  %v3130_v8 = vpop.eup %3129 }
 0x90b   : > { %v2232_v4 = vmul.f32 %v3122_v54, %v2131_v49  ;;  %3131 = vrcp.f32 %v1922_v46  ;;  %v1925_v50 = vpop.xlane.xlu2 %1924 }
 0x90c   : > { %2083 = vmatmul.bf16.gmra.mxu1 %v2007_v11  ;;  %3133 = vrcp.f32 %v1928_v44 }
 0x90d   : > { %v2260_v48 = vpack.c.bf16 %v2232_v4, %v2231_v45  ;;  %2172 = vmatmul.bf16.gmra.mxu3 %v2008_v57  ;;  %3135 = vrcp.f32 %v1925_v50 }
 0x90f   : > { %2830 = vmatmul.msk.bf16.gmra.mxu0 %vm514_vm0, %v2260_v48 }
 0x910   : > { %v2133_v10 = vpop.f32.mrf.mxu3 }
 0x911   : > { %v2046_v0 = vpop.f32.mrf.mxu1  ;;  %v2134_v17 = vadd.f32 %v2133_v10, %v2044_v1  ;;  %v3132_v22 = vpop.eup %3131 }
 0x912   : > { %v3134_v2 = vpop.eup %3133  ;;  %v1931_v25 = vpop.xlane.xlu0 %1930 }
 0x913   : > { %v2233_v61 = vmul.f32 %v3126_v62, %v2134_v17  ;;  %v3136_v5 = vpop.eup %3135  ;;  %v1934_v18 = vpop.xlane.xlu2 %1933  ;;  %3137 = vrcp.f32 %v1931_v25 }
 0x914   : > { %3139 = vrcp.f32 %v1934_v18 }
 0x918   : > { %v2135_v28 = vpop.f32.mrf.mxu3  ;;  %v1937_v10 = vpop.xlane.xlu1 %1936 }
 0x919   : > { %v2136_v27 = vadd.f32 %v2135_v28, %v2046_v0  ;;  %v2049_v13 = vpop.f32.mrf.mxu1  ;;  %v3138_v49 = vpop.eup %3137 }
 0x91a   : > { %v3140_v1 = vpop.eup %3139  ;;  %v1940_v48 = vpop.xlane.xlu0 %1939 }
 0x91b   : > { %v2234_v16 = vmul.f32 %v3128_v24, %v2136_v27  ;;  %3141 = vrcp.f32 %v1940_v48  ;;  %v5024_v27 = vld [vmem:[%s5146_s6] ss:$0 sm:$0xff]  ;;  %v1943_v53 = vpop.xlane.xlu2 %1942 }
 0x91c   : > { %2088 = vmatmul.bf16.gmra.mxu1 %v2009_v31  ;;  %3143 = vrcp.f32 %v1937_v10 }
 0x91d   : > { %v2261_v21 = vpack.c.bf16 %v2234_v16, %v2233_v61  ;;  %2177 = vmatmul.bf16.gmra.mxu3 %v2010_v42  ;;  %3145 = vrcp.f32 %v1943_v53 }
 0x91f   : > { %2831 = vmatmul.msk.bf16.gmra.mxu0 %vm514_vm0, %v2261_v21 }
 0x920   : > { %v2138_v12 = vpop.f32.mrf.mxu3  ;;  %v1946_v46 = vpop.xlane.xlu1 %1945 }
 0x921   : > { %v2051_v47 = vpop.f32.mrf.mxu1  ;;  %v2139_v51 = vadd.f32 %v2138_v12, %v2049_v13  ;;  %v3142_v28 = vpop.eup %3141  ;;  %3147 = vrcp.f32 %v1946_v46 }
 0x922   : > { %v3144_v24 = vpop.eup %3143 }
 0x923   : > { %v2235_v40 = vmul.f32 %v3130_v8, %v2139_v51 }
 0x928   : > { %v2140_v52 = vpop.f32.mrf.mxu3  ;;  %v1949_v50 = vpop.xlane.xlu0 %1948 }
 0x929   : > { %v2141_v15 = vadd.f32 %v2140_v52, %v2051_v47  ;;  %v2054_v58 = vpop.f32.mrf.mxu1  ;;  %3149 = vrcp.f32 %v1949_v50 }
 0x92b   : > { %v2236_v63 = vmul.f32 %v3132_v22, %v2141_v15  ;;  %v3146_v22 = vpop.eup %3145 }
 0x92d   : > { %v2262_v55 = vpack.c.bf16 %v2236_v63, %v2235_v40  ;;  %2182 = vmatmul.bf16.gmra.mxu3 %v5213_v20  ;;  %v3148_v40 = vpop.eup %3147 }
 0x92f   : > { %2832 = vmatmul.msk.bf16.gmra.mxu0 %vm514_vm0, %v2262_v55 }
 0x930   : > { %v2143_v6 = vpop.f32.mrf.mxu3 }
 0x931   : > { %v2056_v34 = vpop.f32.mrf.mxu1  ;;  %v2144_v26 = vadd.f32 %v2143_v6, %v2054_v58 }
 0x933   : > { %v2237_v36 = vmul.f32 %v3136_v5, %v2144_v26 }
 0x938   : > { %v2145_v3 = vpop.f32.mrf.mxu3 }
 0x939   : > { %v2146_v35 = vadd.f32 %v2145_v3, %v2056_v34  ;;  %v2059_v59 = vpop.f32.mrf.mxu1 }
 0x93b   : > { %v2238_v41 = vmul.f32 %v3134_v2, %v2146_v35 }
 0x93d   : > { %v2263_v23 = vpack.c.bf16 %v2238_v41, %v2237_v36  ;;  %2187 = vmatmul.bf16.gmra.mxu3 %v5216_v32  ;;  %v3150_v36 = vpop.eup %3149 }
 0x93f   : > { %2833 = vmatmul.msk.bf16.gmra.mxu0 %vm514_vm0, %v2263_v23 }
 0x940   : > { %v2148_v39 = vpop.f32.mrf.mxu3 }
 0x941   : > { %v2061_v56 = vpop.f32.mrf.mxu1  ;;  %v2149_v29 = vadd.f32 %v2148_v39, %v2059_v59 }
 0x943   : > { %v2239_v45 = vmul.f32 %v3138_v49, %v2149_v29  ;;  %v1952_v26 = vpop.xlane.xlu2 %1951 }
 0x944   : > { %3151 = vrcp.f32 %v1952_v26 }
 0x948   : > { %v2150_v54 = vpop.f32.mrf.mxu3 }
 0x949   : > { %v2151_v7 = vadd.f32 %v2150_v54, %v2061_v56  ;;  %v2064_v11 = vpop.f32.mrf.mxu1 }
 0x94a   : > { %v3152_v23 = vpop.eup %3151 }
 0x94b   : > { %v2240_v4 = vmul.f32 %v3140_v1, %v2151_v7  ;;  %v1955_v56 = vpop.xlane.xlu1 %1954 }
 0x94c   : > { %3153 = vrcp.f32 %v1955_v56 }
 0x94d   : > { %v2264_v57 = vpack.c.bf16 %v2240_v4, %v2239_v45 }
 0x94f   : > { %2834 = vmatmul.msk.bf16.gmra.mxu0 %vm514_vm0, %v2264_v57 }
 0x950   : > { %v2153_v38 = vpop.f32.mrf.mxu3 }
 0x951   : > { %v2066_v9 = vpop.f32.mrf.mxu1  ;;  %v2154_v0 = vadd.f32 %v2153_v38, %v2064_v11 }
 0x952   : > { %v1958_v54 = vpop.xlane.xlu0 %1957  ;;  %v3154_v4 = vpop.eup %3153 }
 0x953   : > { %v2241_v31 = vmul.f32 %v3144_v24, %v2154_v0  ;;  %3155 = vrcp.f32 %v1958_v54 }
 0x958   : > { %v2155_v17 = vpop.f32.mrf.mxu3 }
 0x959   : > { %v2156_v62 = vadd.f32 %v2155_v17, %v2066_v9  ;;  %v2069_v13 = vpop.f32.mrf.mxu1  ;;  %v3156_v48 = vpop.eup %3155 }
 0x95b   : > { %v2242_v61 = vmul.f32 %v3142_v28, %v2156_v62  ;;  %v1961_v62 = vpop.xlane.xlu2 %1960 }
 0x95c   : > { %v2366_v16 = vpop.f32.mrf.mxu0  ;;  %3157 = vrcp.f32 %v1961_v62 }
 0x95d   : > { %v2265_v42 = vpack.c.bf16 %v2242_v61, %v2241_v31  ;;  %v2367_v21 = vadd.f32 %v5024_v27, %v2366_v16 }
 0x95f   : > { %2446 = vxpose.xlu0.b32.start [1/16] (narrow) %v2367_v21, 64  ;;  %2835 = vmatmul.msk.bf16.gmra.mxu0 %vm514_vm0, %v2265_v42 }
 0x960   : > { %v2158_v12 = vpop.f32.mrf.mxu3 }
 0x961   : > { %v2071_v47 = vpop.f32.mrf.mxu1  ;;  %v2159_v8 = vadd.f32 %v2158_v12, %v2069_v13 }
 0x962   : > { %v3158_v53 = vpop.eup %3157 }
 0x963   : > { %v2243_v55 = vmul.f32 %v3146_v22, %v2159_v8  ;;  %v1964_v13 = vpop.xlane.xlu1 %1963 }
 0x964   : > { %v2368_v51 = vpop.f32.mrf.mxu0  ;;  %3159 = vrcp.f32 %v1964_v13 }
 0x965   : > { %v2369_v52 = vadd.f32 %v5024_v27, %v2368_v51 }
 0x967   : > { %2447 = vxpose.xlu0.b32.cont [2/16] (narrow) %v2369_v52, 64 }
 0x968   : > { %v2160_v15 = vpop.f32.mrf.mxu3 }
 0x969   : > { %v2161_v58 = vadd.f32 %v2160_v15, %v2071_v47  ;;  %v2074_v63 = vpop.f32.mrf.mxu1 }
 0x96a   : > { %v3160_v46 = vpop.eup %3159 }
 0x96b   : > { %v2244_v30 = vmul.f32 %v3148_v40, %v2161_v58  ;;  %v1967_v58 = vpop.xlane.xlu0 %1966 }
 0x96c   : > { %v2371_v20 = vpop.f32.mrf.mxu0  ;;  %3161 = vrcp.f32 %v1967_v58 }
 0x96d   : > { %v2266_v44 = vpack.c.bf16 %v2244_v30, %v2243_v55  ;;  %v2372_v6 = vadd.f32 %v5024_v27, %v2371_v20 }
 0x96f   : > { %2448 = vxpose.xlu0.b32.cont [3/16] (narrow) %v2372_v6, 64  ;;  %2836 = vmatmul.msk.bf16.gmra.mxu0 %vm514_vm0, %v2266_v44 }
 0x970   : > { %v2163_v34 = vpop.f32.mrf.mxu3 }
 0x971   : > { %v2076_v3 = vpop.f32.mrf.mxu1  ;;  %v2164_v5 = vadd.f32 %v2163_v34, %v2074_v63 }
 0x972   : > { %v3162_v50 = vpop.eup %3161 }
 0x973   : > { %v2245_v33 = vmul.f32 %v3150_v36, %v2164_v5  ;;  %v1973_v36 = vpop.xlane.xlu1 %1972 }
 0x974   : > { %v2373_v2 = vpop.f32.mrf.mxu0  ;;  %v1970_v63 = vpop.xlane.xlu2 %1969 }
 0x975   : > { %v2374_v35 = vadd.f32 %v5024_v27, %v2373_v2  ;;  %3163 = vrcp.f32 %v1970_v63 }
 0x976   : > { %3165 = vrcp.f32 %v1973_v36 }
 0x977   : > { %2449 = vxpose.xlu0.b32.cont [4/16] (narrow) %v2374_v35, 64 }
 0x978   : > { %v2165_v59 = vpop.f32.mrf.mxu3 }
 0x979   : > { %v2166_v41 = vadd.f32 %v2165_v59, %v2076_v3  ;;  %v2079_v60 = vpop.f32.mrf.mxu1 }
 0x97b   : > { %v2246_v32 = vmul.f32 %v3152_v23, %v2166_v41  ;;  %v3164_v26 = vpop.eup %3163  ;;  %v1976_v23 = vpop.xlane.xlu0 %1975 }
 0x97c   : > { %v2376_v25 = vpop.f32.mrf.mxu0  ;;  %3167 = vrcp.f32 %v1976_v23 }
 0x97d   : > { %v2267_v39 = vpack.c.bf16 %v2246_v32, %v2245_v33  ;;  %v2377_v18 = vadd.f32 %v5024_v27, %v2376_v25 }
 0x97f   : > { %2450 = vxpose.xlu0.b32.cont [5/16] (narrow) %v2377_v18, 64  ;;  %2837 = vmatmul.msk.bf16.gmra.mxu0 %vm514_vm0, %v2267_v39  ;;  %v3166_v39 = vpop.eup %3165 }
 0x980   : > { %v2168_v29 = vpop.f32.mrf.mxu3 }
 0x981   : > { %v2081_v49 = vpop.f32.mrf.mxu1  ;;  %v2169_v11 = vadd.f32 %v2168_v29, %v2079_v60 }
 0x982   : > { %v3168_v56 = vpop.eup %3167 }
 0x983   : > { %v2247_v10 = vmul.f32 %v3154_v4, %v2169_v11  ;;  %v1982_v11 = vpop.xlane.xlu1 %1981  ;;  %v1979_v4 = vpop.xlane.xlu2 %1978 }
 0x984   : > { %v2378_v7 = vpop.f32.mrf.mxu0  ;;  %3169 = vrcp.f32 %v1982_v11 }
 0x985   : > { %v2379_v1 = vadd.f32 %v5024_v27, %v2378_v7  ;;  %3171 = vrcp.f32 %v1979_v4 }
 0x987   : > { %2451 = vxpose.xlu0.b32.cont [6/16] (narrow) %v2379_v1, 64 }
 0x988   : > { %v2170_v45 = vpop.f32.mrf.mxu3 }
 0x989   : > { %v2171_v57 = vadd.f32 %v2170_v45, %v2081_v49  ;;  %v2084_v38 = vpop.f32.mrf.mxu1 }
 0x98b   : > { %v2248_v9 = vmul.f32 %v3156_v48, %v2171_v57 }
 0x98c   : > { %v2381_v0 = vpop.f32.mrf.mxu0 }
 0x98d   : > { %v2268_v17 = vpack.c.bf16 %v2248_v9, %v2247_v10  ;;  %v2382_v28 = vadd.f32 %v5024_v27, %v2381_v0 }
 0x98f   : > { %2452 = vxpose.xlu0.b32.cont [7/16] (narrow) %v2382_v28, 64  ;;  %2838 = vmatmul.msk.bf16.gmra.mxu0 %vm514_vm0, %v2268_v17 }
 0x990   : > { %v2173_v24 = vpop.f32.mrf.mxu3 }
 0x991   : > { %v2086_v31 = vpop.f32.mrf.mxu1  ;;  %v2174_v42 = vadd.f32 %v2173_v24, %v2084_v38  ;;  %v3170_v38 = vpop.eup %3169 }
 0x992   : > { %v3172_v9 = vpop.eup %3171 }
 0x993   : > { %v2249_v47 = vmul.f32 %v3158_v53, %v2174_v42 }
 0x994   : > { %v2383_v61 = vpop.f32.mrf.mxu0 }
 0x995   : > { %v2384_v16 = vadd.f32 %v5024_v27, %v2383_v61 }
 0x997   : > { %2453 = vxpose.xlu0.b32.cont [8/16] (narrow) %v2384_v16, 64 }
 0x998   : > { %v2175_v21 = vpop.f32.mrf.mxu3 }
 0x999   : > { %v2176_v12 = vadd.f32 %v2175_v21, %v2086_v31  ;;  %v2089_v22 = vpop.f32.mrf.mxu1 }
 0x99b   : > { %v2250_v51 = vmul.f32 %v3160_v46, %v2176_v12 }
 0x99c   : > { %v2386_v52 = vpop.f32.mrf.mxu0 }
 0x99d   : > { %v2269_v8 = vpack.c.bf16 %v2250_v51, %v2249_v47  ;;  %v2387_v15 = vadd.f32 %v5024_v27, %v2386_v52 }
 0x99f   : > { %2454 = vxpose.xlu0.b32.cont [9/16] (narrow) %v2387_v15, 64  ;;  %2839 = vmatmul.msk.bf16.gmra.mxu0 %vm514_vm0, %v2269_v8 }
 0x9a0   : > { %v2178_v40 = vpop.f32.mrf.mxu3 }
 0x9a1   : > { %v2179_v20 = vadd.f32 %v2178_v40, %v2089_v22  ;;  %v2091_v44 = vpop.f32.mrf.mxu1 }
 0x9a3   : > { %v2251_v3 = vmul.f32 %v3162_v50, %v2179_v20 }
 0x9a4   : > { %v2388_v55 = vpop.f32.mrf.mxu0 }
 0x9a5   : > { %v2389_v30 = vadd.f32 %v5024_v27, %v2388_v55 }
 0x9a7   : > { %2455 = vxpose.xlu0.b32.cont [10/16] (narrow) %v2389_v30, 64 }
 0x9a8   : > { %v2180_v6 = vpop.f32.mrf.mxu3 }
 0x9a9   : > { %v2181_v34 = vadd.f32 %v2180_v6, %v2091_v44 }
 0x9ab   : > { %v2252_v2 = vmul.f32 %v3164_v26, %v2181_v34  ;;  %v3173_v26 = vld [vmem:[%s3556_s22] sm:$0xff] }
 0x9ac   : > { %v2391_v35 = vpop.f32.mrf.mxu0 }
 0x9ad   : > { %v2270_v5 = vpack.c.bf16 %v2252_v2, %v2251_v3  ;;  %v2392_v59 = vadd.f32 %v5024_v27, %v2391_v35 }
 0x9af   : > { %2456 = vxpose.xlu0.b32.cont [11/16] (narrow) %v2392_v59, 64  ;;  %2840 = vmatmul.msk.bf16.gmra.mxu0 %vm514_vm0, %v2270_v5 }
 0x9b0   : > { %v2183_v41 = vpop.f32.mrf.mxu3 }
 0x9b1   : > { %v2184_v32 = vadd.f32 %v2183_v41, %v4915_v14 }
 0x9b3   : > { %v2253_v29 = vmul.f32 %v3166_v39, %v2184_v32  ;;  %v3174_v32 = vld [vmem:[%s3556_s22 + $0x10] sm:$0xff] }
 0x9b4   : > { %v2393_v60 = vpop.f32.mrf.mxu0 }
 0x9b5   : > { %v2394_v33 = vadd.f32 %v5024_v27, %v2393_v60 }
 0x9b7   : > { %2457 = vxpose.xlu0.b32.cont [12/16] (narrow) %v2394_v33, 64 }
 0x9b8   : > { %v2185_v25 = vpop.f32.mrf.mxu3 }
 0x9b9   : > { %v2186_v18 = vadd.f32 %v2185_v25, %v4923_v37 }
 0x9bb   : > { %v2254_v54 = vmul.f32 %v3168_v56, %v2186_v18  ;;  %v3175_v18 = vld [vmem:[%s3556_s22 + $0x20] sm:$0xff] }
 0x9bc   : > { %v2396_v49 = vpop.f32.mrf.mxu0 }
 0x9bd   : > { %v2271_v7 = vpack.c.bf16 %v2254_v54, %v2253_v29  ;;  %v2397_v1 = vadd.f32 %v5024_v27, %v2396_v49  ;;  %v3176_v54 = vld [vmem:[%s3556_s22 + $0x30] sm:$0xff] }
 0x9bf   : > { %2458 = vxpose.xlu0.b32.cont [13/16] (narrow) %v2397_v1, 64  ;;  %2841 = vmatmul.msk.bf16.gmra.mxu0 %vm514_vm0, %v2271_v7  ;;  %v3177_v7 = vld [vmem:[%s3556_s22 + $0x40] sm:$0xff] }
 0x9c0   : > { %v2188_v45 = vpop.f32.mrf.mxu3 }
 0x9c1   : > { %v2189_v37 = vadd.f32 %v2188_v45, %v4927_v43  ;;  %v3178_v45 = vld [vmem:[%s3556_s22 + $0x8] sm:$0xff] }
 0x9c3   : > { %v2255_v0 = vmul.f32 %v3172_v9, %v2189_v37 }
 0x9c4   : > { %v2398_v14 = vpop.f32.mrf.mxu0 }
 0x9c5   : > { %v2399_v57 = vadd.f32 %v5024_v27, %v2398_v14 }
 0x9c7   : > { %2459 = vxpose.xlu0.b32.cont [14/16] (narrow) %v2399_v57, 64  ;;  %v3179_v57 = vld [vmem:[%s3556_s22 + $0x50] sm:$0xff] }
 0x9c8   : > { %v2190_v48 = vpop.f32.mrf.mxu3 }
 0x9c9   : > { %v2191_v10 = vadd.f32 %v2190_v48, %v4931_v19 }
 0x9cb   : > { %v2256_v17 = vmul.f32 %v3170_v38, %v2191_v10  ;;  %v3180_v38 = vld [vmem:[%s3556_s22 + $0x18] sm:$0xff] }
 0x9cc   : > { %v2401_v28 = vpop.f32.mrf.mxu0 }
 0x9cd   : > { %v2272_v62 = vpack.c.bf16 %v2256_v17, %v2255_v0  ;;  %v2402_v24 = vadd.f32 %v5024_v27, %v2401_v28  ;;  %v3181_v0 = vld [vmem:[%s3556_s22 + $0x60] sm:$0xff] }
 0x9cf   : > { %2460 = vxpose.xlu0.b32.cont [15/16] (narrow) %v2402_v24, 64  ;;  %2842 = vmatmul.msk.bf16.gmra.mxu0 %vm514_vm0, %v2272_v62  ;;  %v3182_v62 = vld [vmem:[%s3556_s22 + $0x28] sm:$0xff] }
 0x9d4   : > { %v2403_v13 = vpop.f32.mrf.mxu0 }
 0x9d5   : > { %v2404_v31 = vadd.f32 %v5024_v27, %v2403_v13 }
 0x9d7   : > { %2461 = vxpose.xlu0.b32.end [16/16] (narrow) %v2404_v31, 64  ;;  %v3183_v31 = vld [vmem:[%s3556_s22 + $0x70] sm:$0xff] }
 0x9dc   : > { %v2406_v43 = vpop.f32.mrf.mxu0 }
 0x9dd   : > { %v2407_v61 = vadd.f32 %v5024_v27, %v2406_v43 }
 0x9df   : > { %2478 = vxpose.xlu2.b32.start [1/16] (narrow) %v2407_v61, 64 }
 0x9e4   : > { %v2408_v16 = vpop.f32.mrf.mxu0 }
 0x9e5   : > { %v2409_v19 = vadd.f32 %v5024_v27, %v2408_v16  ;;  %v3184_v16 = vld [vmem:[%s3556_s22 + $0x38] sm:$0xff] }
 0x9e7   : > { %2479 = vxpose.xlu2.b32.cont [2/16] (narrow) %v2409_v19, 64 }
 0x9ec   : > { %v2411_v42 = vpop.f32.mrf.mxu0 }
 0x9ed   : > { %v2412_v21 = vadd.f32 %v5024_v27, %v2411_v42 }
 0x9ef   : > { %2480 = vxpose.xlu2.b32.cont [3/16] (narrow) %v2412_v21, 64  ;;  %v3185_v21 = vld [vmem:[%s3556_s22 + $0x48] sm:$0xff] }
 0x9f4   : > { %v2413_v53 = vpop.f32.mrf.mxu0 }
 0x9f5   : > { %v2414_v12 = vadd.f32 %v5024_v27, %v2413_v53 }
 0x9f7   : > { %2481 = vxpose.xlu2.b32.cont [4/16] (narrow) %v2414_v12, 64 }
 0x9fc   : > { %v2416_v46 = vpop.f32.mrf.mxu0 }
 0x9fd   : > { %v2417_v47 = vadd.f32 %v5024_v27, %v2416_v46  ;;  %v3186_v46 = vld [vmem:[%s3556_s22 + $0x58] sm:$0xff] }
 0x9ff   : > { %2482 = vxpose.xlu2.b32.cont [5/16] (narrow) %v2417_v47, 64 }
 0xa03   : > { %v2462_v34 = vpop.trf.xlu0 }
 0xa04   : > { %v2418_v51 = vpop.f32.mrf.mxu0  ;;  %v2510_v3 = vadd.f32 %v3173_v26, %v2462_v34 }
 0xa05   : > { %v2419_v52 = vadd.f32 %v5024_v27, %v2418_v51 }
 0xa06   : > { %2526 = vst [vmem:[%s5069_s29] sm:$0xff] %v2510_v3 }
 0xa07   : > { %2483 = vxpose.xlu2.b32.cont [6/16] (narrow) %v2419_v52, 64  ;;  %v3187_v52 = vld [vmem:[%s3556_s22 + $0x68] sm:$0xff] }
 0xa0b   : > { %v2463_v33 = vpop.trf.xlu0 }
 0xa0c   : > { %v2421_v8 = vpop.f32.mrf.mxu0  ;;  %v2512_v25 = vadd.f32 %v3174_v32, %v2463_v33 }
 0xa0d   : > { %v2422_v15 = vadd.f32 %v5024_v27, %v2421_v8 }
 0xa0e   : > { %2528 = vst [vmem:[%s5069_s29 + $0x10] sm:$0xff] %v2512_v25 }
 0xa0f   : > { %2484 = vxpose.xlu2.b32.cont [7/16] (narrow) %v2422_v15, 64 }
 0xa13   : > { %v2464_v39 = vpop.trf.xlu0 }
 0xa14   : > { %v2423_v22 = vpop.f32.mrf.mxu0  ;;  %v2514_v56 = vadd.f32 %v3175_v18, %v2464_v39 }
 0xa15   : > { %v2424_v58 = vadd.f32 %v5024_v27, %v2423_v22  ;;  %v3188_v22 = vld [vmem:[%s3556_s22 + $0x78] sm:$0xff] }
 0xa16   : > { %2530 = vst [vmem:[%s5069_s29 + $0x20] sm:$0xff] %v2514_v56 }
 0xa17   : > { %2485 = vxpose.xlu2.b32.cont [8/16] (narrow) %v2424_v58, 64 }
 0xa1b   : > { %v2465_v29 = vpop.trf.xlu0 }
 0xa1c   : > { %v2426_v40 = vpop.f32.mrf.mxu0  ;;  %v2516_v49 = vadd.f32 %v3176_v54, %v2465_v29 }
 0xa1d   : > { %v2427_v63 = vadd.f32 %v5024_v27, %v2426_v40 }
 0xa1e   : > { %2532 = vst [vmem:[%s5069_s29 + $0x30] sm:$0xff] %v2516_v49 }
 0xa1f   : > { %2486 = vxpose.xlu2.b32.cont [9/16] (narrow) %v2427_v63, 64 }
 0xa24   : > { %v2428_v55 = vpop.f32.mrf.mxu0 }
 0xa25   : > { %v2429_v30 = vadd.f32 %v5024_v27, %v2428_v55 }
 0xa27   : > { %2487 = vxpose.xlu2.b32.cont [10/16] (narrow) %v2429_v30, 64 }
 0xa2c   : > { %v2431_v20 = vpop.f32.mrf.mxu0 }
 0xa2d   : > { %v2432_v44 = vadd.f32 %v5024_v27, %v2431_v20 }
 0xa2f   : > { %2488 = vxpose.xlu2.b32.cont [11/16] (narrow) %v2432_v44, 64 }
 0xa34   : > { %v2433_v6 = vpop.f32.mrf.mxu0 }
 0xa35   : > { %v2434_v50 = vadd.f32 %v5024_v27, %v2433_v6 }
 0xa37   : > { %2489 = vxpose.xlu2.b32.cont [12/16] (narrow) %v2434_v50, 64 }
 0xa3c   : > { %v2436_v2 = vpop.f32.mrf.mxu0 }
 0xa3d   : > { %v2437_v35 = vadd.f32 %v5024_v27, %v2436_v2 }
 0xa3f   : > { %2490 = vxpose.xlu2.b32.cont [13/16] (narrow) %v2437_v35, 64 }
 0xa44   : > { %v2438_v5 = vpop.f32.mrf.mxu0 }
 0xa45   : > { %v2439_v59 = vadd.f32 %v5024_v27, %v2438_v5 }
 0xa47   : > { %2491 = vxpose.xlu2.b32.cont [14/16] (narrow) %v2439_v59, 64 }
 0xa4c   : > { %v2441_v36 = vpop.f32.mrf.mxu0 }
 0xa4d   : > { %v2442_v41 = vadd.f32 %v5024_v27, %v2441_v36 }
 0xa4f   : > { %2492 = vxpose.xlu2.b32.cont [15/16] (narrow) %v2442_v41, 64 }
 0xa54   : > { %v2443_v23 = vpop.f32.mrf.mxu0 }
 0xa55   : > { %v2444_v60 = vadd.f32 %v5024_v27, %v2443_v23  ;;  %v2466_v27 = vpop.trf.xlu0 }
 0xa56   : > { %v2518_v1 = vadd.f32 %v3177_v7, %v2466_v27 }
 0xa57   : > { %2493 = vxpose.xlu2.b32.end [16/16] (narrow) %v2444_v60, 64 }
 0xa58   : > { %2534 = vst [vmem:[%s5069_s29 + $0x40] sm:$0xff] %v2518_v1 }
 0xa5d   : > { %v2467_v14 = vpop.trf.xlu0 }
 0xa5e   : > { %v2520_v37 = vadd.f32 %v3179_v57, %v2467_v14 }
 0xa60   : > { %2536 = vst [vmem:[%s5069_s29 + $0x50] sm:$0xff] %v2520_v37 }
 0xa65   : > { %v2468_v9 = vpop.trf.xlu0 }
 0xa66   : > { %v2522_v17 = vadd.f32 %v3181_v0, %v2468_v9 }
 0xa68   : > { %2538 = vst [vmem:[%s5069_s29 + $0x60] sm:$0xff] %v2522_v17 }
 0xa6d   : > { %v2469_v13 = vpop.trf.xlu0 }
 0xa6e   : > { %v2524_v43 = vadd.f32 %v3183_v31, %v2469_v13 }
 0xa70   : > { %2540 = vst [vmem:[%s5069_s29 + $0x70] sm:$0xff] %v2524_v43 }
 0xa78   : > { %v2494_v11 = vpop.trf.xlu2 }
 0xa79   : > { %v2511_v4 = vadd.f32 %v3178_v45, %v2494_v11 }
 0xa7b   : > { %2527 = vst [vmem:[%s5069_s29 + $0x8] sm:$0xff] %v2511_v4 }
 0xa80   : > { %v2495_v48 = vpop.trf.xlu2 }
 0xa81   : > { %v2513_v10 = vadd.f32 %v3180_v38, %v2495_v48 }
 0xa83   : > { %2529 = vst [vmem:[%s5069_s29 + $0x18] sm:$0xff] %v2513_v10 }
 0xa88   : > { %v2496_v28 = vpop.trf.xlu2 }
 0xa89   : > { %v2515_v24 = vadd.f32 %v3182_v62, %v2496_v28 }
 0xa8b   : > { %2531 = vst [vmem:[%s5069_s29 + $0x28] sm:$0xff] %v2515_v24 }
 0xa90   : > { %v2497_v61 = vpop.trf.xlu2 }
 0xa91   : > { %v2517_v19 = vadd.f32 %v3184_v16, %v2497_v61 }
 0xa93   : > { %2533 = vst [vmem:[%s5069_s29 + $0x38] sm:$0xff] %v2517_v19 }
 0xa98   : > { %v2498_v42 = vpop.trf.xlu2 }
 0xa99   : > { %v2519_v53 = vadd.f32 %v3185_v21, %v2498_v42 }
 0xa9b   : > { %2535 = vst [vmem:[%s5069_s29 + $0x48] sm:$0xff] %v2519_v53 }
 0xaa0   : > { %v2499_v12 = vpop.trf.xlu2 }
 0xaa1   : > { %v2521_v47 = vadd.f32 %v3186_v46, %v2499_v12 }
 0xaa3   : > { %2537 = vst [vmem:[%s5069_s29 + $0x58] sm:$0xff] %v2521_v47 }
 0xaa8   : > { %v2500_v51 = vpop.trf.xlu2 }
 0xaa9   : > { %v2523_v8 = vadd.f32 %v3187_v52, %v2500_v51 }
 0xaab   : > { %2539 = vst [vmem:[%s5069_s29 + $0x68] sm:$0xff] %v2523_v8 }
 0xab0   : > { %v2501_v15 = vpop.trf.xlu2 }
 0xab1   : > { %v2525_v58 = vadd.f32 %v3188_v22, %v2501_v15 }
 0xab3   : > { %2541 = vst [vmem:[%s5069_s29 + $0x78] sm:$0xff] %v2525_v58 }
 0xab4   : > { %3336 = shalt.err (!%p3333_p11)
}
 0xab5   : > { %s3397_s21 = smov 256   ;;  %s3398_s22 = smov 16  }
 0xab6   : > { %2900 = dma.vmem_to_hbm [thread:$0]  (%p3522_p7), %s2556_s1, 2048, %s2558_s30, %s2543_s12, %s3397_s21, %s3397_s21, %s3398_s22  }
 0xab7 PF: > { %s2572_s29 = sand.u32 1, %s3371_s24   ;;  %p5217_p12 = scmp.ge.s32.totalorder %s3383_s27, 2 }
 0xab8   : > { %s2573_s18 = scalar_lea.sflag [#allocation4], %s2572_s29 }
 0xab9   : > { %p2917_p13 = pnand %p5217_p12, %p3474_p6 }
 0xabb   : > { %p2918_p0 = pneg %p2917_p13 }
 0xabd   : > { %3366 = dma.done.wait (%p2918_p0), %s2573_s18, 2048  }
 0xabe   : > { %3368 = vsyncadd (%p2918_p0), %s2573_s18, 4294965248  ;;  %p22_p3 = scmp.ge.s32.totalorder %s3508_s15, 4   ;;  %s5218_s24 = smov %s3375_s25 }
 0xabf   : > { %s5219_s25 = smov %s3379_s26  ;;  %s5220_s26 = smov %s3518_s19 }
 0xac0   : > { %s5221_s27 = smov %s3508_s15  ;;  %24 = sbr.rel (!%p22_p3) target bundleno = 9 (0x9), region = 105 }
 0xac5   :  { %2579 = vsyncpa [#allocation3], 1 }
 0xac6   :  { %2581 = vsyncpa [#allocation3 + $0x1], 1 }
 0xac7   :  { %2582 = vsyncpa [#allocation6], 1 }
 0xac8   :  { %2583 = vsyncpa [#allocation9], 1 }
 0xac9   :  { %2584 = vsyncpa [#allocation4], 1 }
 0xaca   :  { %2586 = vsyncpa [#allocation4 + $0x1], 1 }

</bundles_post_ra>
